<compile_context>
chip_gen: v7x
topology: tpu7x:2x2x1
jax: 0.10.0
libtpu: 0.0.40
codegen_flags: <defaults>
</compile_context>

<pallas_src>
import functools

import jax
import jax.numpy as jnp
from jax.experimental import pallas as pl
from jax.experimental.pallas import tpu as pltpu


def _round_up(x, m):
    return (x + m - 1) // m * m


_VMEM_BUDGET = 40 << 20        # conservative tile budget (fits v7x 64 MiB VMEM)
_VMEM_LIMIT_MIN = 32 << 20
_VMEM_LIMIT_MAX = 60 << 20


def _vmem_estimate(b_tile, t_blk, L, Ip, Hp, mm_bytes, out_bytes, st_bytes):
    """Rough VMEM footprint (bytes) for the chosen tiling (2x double-buffering)."""
    stream = 2 * b_tile * (
        t_blk * Ip * mm_bytes          # x block
        + t_blk * Hp * out_bytes       # output block
        + 2 * L * Hp * mm_bytes        # ctx_att + ctx_out blocks
        + 4 * Hp * st_bytes)           # h0, c0, hN, cN blocks
    # Constant-index weight blocks (conservatively assume double-buffered).
    weights = 2 * ((Ip * 4 * Hp + Hp * 4 * Hp + Hp * Hp) * mm_bytes + 4 * Hp * 4)
    scratch = 4 * (2 * b_tile * Hp + t_blk * b_tile * 4 * Hp)   # f32 carries + x-proj
    return stream + weights + scratch


def _choose_b_tile(Bp, t_blk, L, Ip, Hp, mm_bytes, out_bytes, st_bytes):
    """Largest multiple-of-8 divisor of Bp whose tiles fit the VMEM budget."""
    best = 8
    for cand in range(8, Bp + 1, 8):
        if Bp % cand:
            continue
        if _vmem_estimate(cand, t_blk, L, Ip, Hp,
                          mm_bytes, out_bytes, st_bytes) <= _VMEM_BUDGET:
            best = cand
    return best


def _lstm_attn_kernel(x_ref, h0_ref, c0_ref, ctx_att_ref, ctx_out_ref,
                      w_in_ref, w_h_ref, b_ref, wo_hy_ref,
                      out_ref, hN_ref, cN_ref,
                      h_scr, c_scr, gx_scr,
                      *, hidden_pad, t_blk, seq_len, masked_tail):
    tb = pl.program_id(1)              # time-block index (trailing, "arbitrary")
    Hp = hidden_pad
    bT = h_scr.shape[0]
    w_dt = w_h_ref.dtype               # matmul operand dtype (bf16 or f32)

    # Initialize the carried state from (h0, c0) at the first time block.
    @pl.when(tb == 0)
    def _():
        h_scr[...] = h0_ref[...].astype(jnp.float32)
        c_scr[...] = c0_ref[...].astype(jnp.float32)

    # ---- per-time-block precompute: x projection for all t_blk steps --------
    # One well-shaped (t_blk*bT, Ip) x (Ip, 4Hp) matmul instead of t_blk
    # latency-bound matmuls with tiny M; bias broadcast happens once per block.
    x_blk = x_ref[...]                                            # (t_blk, bT, Ip)
    gx = jnp.dot(x_blk.reshape(t_blk * bT, x_blk.shape[-1]), w_in_ref[...],
                 preferred_element_type=jnp.float32)
    gx = gx + b_ref[...]                                          # (1, 4Hp) f32
    gx_scr[...] = gx.reshape(t_blk, bT, 4 * Hp)

    for tt in range(t_blk):                                       # static unroll
        hx = h_scr[...]                                           # (bT, Hp) f32
        cx = c_scr[...]

        # --- LSTM cell: only the recurrent matmul stays on the serial path ---
        gates = gx_scr[tt] + jnp.dot(hx.astype(w_dt), w_h_ref[...],
                                     preferred_element_type=jnp.float32)
        ingate = jax.nn.sigmoid(gates[:, 0 * Hp:1 * Hp])
        forgetgate = jax.nn.sigmoid(gates[:, 1 * Hp:2 * Hp])
        cellgate = jnp.tanh(gates[:, 2 * Hp:3 * Hp])
        outgate = jax.nn.sigmoid(gates[:, 3 * Hp:4 * Hp])
        cy = forgetgate * cx + ingate * cellgate                  # (bT, Hp)
        hy = outgate * jnp.tanh(cy)                               # (bT, Hp)

        # --- SoftDotAttention with ctx-side weights pre-folded ---------------
        # logits[b,l] = sum_h hy[b,h] * (ctx @ W_att_in)[b,l,h]
        # (VPU broadcast-multiply + lane reduce; no M=1 MXU micro-matmuls)
        logits = jnp.sum(hy[:, None, :] * ctx_att_ref[...], axis=-1)   # (bT, L)
        logits = logits - jnp.max(logits, axis=-1, keepdims=True)
        e = jnp.exp(logits)
        s = jnp.sum(e, axis=-1, keepdims=True)
        r = pl.reciprocal(s, approx=True)
        r = r * (2.0 - s * r)              # one Newton step -> ~f32 accuracy
        attn = e * r                                                     # (bT, L)

        # Weighted-context term, already projected by W_out[:, :H] in wrapper.
        w_ctx = jnp.sum(attn[:, :, None] * ctx_out_ref[...], axis=1)     # (bT, Hp)

        # h_tilde = tanh(linear_out(cat(weighted_context, hy)))
        h_tilde = jnp.tanh(
            w_ctx + jnp.dot(hy.astype(w_dt), wo_hy_ref[...],
                            preferred_element_type=jnp.float32))         # (bT, Hp)

        out_ref[tt] = h_tilde.astype(out_ref.dtype)

        if masked_tail:
            # Padded (beyond-seq) timesteps must not advance the recurrence.
            valid = (tb * t_blk + tt) < seq_len
            h_scr[...] = jnp.where(valid, h_tilde, hx)
            c_scr[...] = jnp.where(valid, cy, cx)
        else:
            h_scr[...] = h_tilde
            c_scr[...] = cy

    # Final state is only emitted on the last time block (the hN/cN blocks stay
    # resident across the trailing "arbitrary" tb axis).
    @pl.when(tb == pl.num_programs(1) - 1)
    def _():
        hN_ref[...] = h_scr[...].astype(hN_ref.dtype)
        cN_ref[...] = c_scr[...].astype(cN_ref.dtype)


def lstm_attention_dot(x, h0, c0, ctx, params, *, batch_first=True, t_blk=8,
                       mm_dtype=jnp.float32, out_dtype=None):
    """Forward pass matching LSTMAttentionDot.forward.

    x     : (B, seq, input_size) if batch_first else (seq, B, input_size)
    h0,c0 : (B, hidden)
    ctx   : (sourceL, B, hidden)     (same convention as the PyTorch module)
    mm_dtype : dtype of MXU operands (x / folded ctx / weights); recurrence,
               gates and softmax stay in f32.
    Returns (output, (hN, cN)) with output (B, seq, hidden) if batch_first.
    """
    if batch_first:
        x_tm = jnp.transpose(x, (1, 0, 2))              # (seq, B, I)
    else:
        x_tm = x
    seq, B, I = x_tm.shape
    H = h0.shape[-1]
    L = ctx.shape[0]
    out_dtype = x.dtype if out_dtype is None else jnp.dtype(out_dtype)
    state_dtype = h0.dtype
    f32 = jnp.float32

    # --- padded sizes (lane / sublane alignment only; no batch round-to-128) ---
    Hp = _round_up(H, 128)
    Ip = _round_up(I, 128)
    Bp = _round_up(B, 8)
    t_blk = max(1, min(t_blk, seq))
    seq_pad = _round_up(seq, t_blk)

    mm_bytes = jnp.dtype(mm_dtype).itemsize
    out_bytes = jnp.dtype(out_dtype).itemsize
    st_bytes = jnp.dtype(state_dtype).itemsize
    b_tile = _choose_b_tile(Bp, t_blk, L, Ip, Hp, mm_bytes, out_bytes, st_bytes)
    vmem_est = _vmem_estimate(b_tile, t_blk, L, Ip, Hp, mm_bytes, out_bytes, st_bytes)
    vmem_limit = int(min(max(vmem_est * 3 // 2, _VMEM_LIMIT_MIN), _VMEM_LIMIT_MAX))

    # --- fold time-invariant attention weights into the context (wrapper) ---
    # logits = hy . (ctx @ W_att_in)
    # weighted-context output term = attn . (ctx @ W_out[:, :H]^T)
    ctx_b = jnp.transpose(ctx, (1, 0, 2)).astype(f32)   # (B, L, H) == ctx.transpose(0,1)
    w_att_in = params["w_att_in"].astype(f32)           # (H, H), PyTorch (out, in)
    w_out = params["w_att_out"].astype(f32)             # (H, 2H)
    ctx_att = jnp.einsum("blo,oi->bli", ctx_b, w_att_in)        # (B, L, H)
    ctx_out = jnp.einsum("blj,oj->blo", ctx_b, w_out[:, :H])    # (B, L, H)

    # --- pad activations (zero pads keep padded lanes exactly 0 in-kernel) ---
    x_p = jnp.pad(x_tm, ((0, seq_pad - seq), (0, Bp - B), (0, Ip - I))).astype(mm_dtype)
    h0_p = jnp.pad(h0, ((0, Bp - B), (0, Hp - H)))
    c0_p = jnp.pad(c0, ((0, Bp - B), (0, Hp - H)))
    ctx_att_p = jnp.pad(ctx_att, ((0, Bp - B), (0, 0), (0, Hp - H))).astype(mm_dtype)
    ctx_out_p = jnp.pad(ctx_out, ((0, Bp - B), (0, 0), (0, Hp - H))).astype(mm_dtype)

    # --- pad / pre-transpose gate weights (PyTorch Linear stores (out, in)) ---
    def pad_gate_w(w, in_dim, in_pad):                  # (4H, in) -> (in_pad, 4Hp)
        w4 = w.astype(f32).reshape(4, H, in_dim)
        w4 = jnp.pad(w4, ((0, 0), (0, Hp - H), (0, in_pad - in_dim)))
        return jnp.transpose(w4.reshape(4 * Hp, in_pad)).astype(mm_dtype)

    w_in_t = pad_gate_w(params["w_in"], I, Ip)          # (Ip, 4Hp)
    w_h_t = pad_gate_w(params["w_h"], H, Hp)            # (Hp, 4Hp)
    b4 = (params["b_in"] + params["b_h"]).astype(f32).reshape(4, H)
    b_p = jnp.pad(b4, ((0, 0), (0, Hp - H))).reshape(1, 4 * Hp)   # f32, pre-summed

    # hy half of linear_out: hy @ W_out[:, H:]^T
    wo_hy = jnp.pad(w_out[:, H:], ((0, Hp - H), (0, Hp - H))).T.astype(mm_dtype)

    n_bt = Bp // b_tile
    n_tb = seq_pad // t_blk
    grid = (n_bt, n_tb)

    out_shapes = (
        jax.ShapeDtypeStruct((seq_pad, Bp, Hp), out_dtype),   # per-step h_tilde
        jax.ShapeDtypeStruct((Bp, Hp), state_dtype),          # final h
        jax.ShapeDtypeStruct((Bp, Hp), state_dtype),          # final c
    )

    kernel = functools.partial(
        _lstm_attn_kernel, hidden_pad=Hp, t_blk=t_blk,
        seq_len=seq, masked_tail=(seq_pad != seq))

    const2 = lambda bt, tb: (0, 0)

    # TODO(synk): on v7x also single-buffer the constant weight BlockSpecs
    # (pipeline_mode=pl.Buffered(1)) and hold W_h weight-stationary via
    # pltpu.matmul_push_rhs/acc_lhs/pop; kept off here for portability.
    out, hN, cN = pl.pallas_call(
        kernel,
        out_shape=out_shapes,
        grid_spec=pltpu.PrefetchScalarGridSpec(
            num_scalar_prefetch=0,
            grid=grid,
            in_specs=[
                pl.BlockSpec((t_blk, b_tile, Ip), lambda bt, tb: (tb, bt, 0)),   # x
                pl.BlockSpec((b_tile, Hp), lambda bt, tb: (bt, 0)),              # h0
                pl.BlockSpec((b_tile, Hp), lambda bt, tb: (bt, 0)),              # c0
                pl.BlockSpec((b_tile, L, Hp), lambda bt, tb: (bt, 0, 0)),        # ctx@W_att_in
                pl.BlockSpec((b_tile, L, Hp), lambda bt, tb: (bt, 0, 0)),        # ctx@W_out[:, :H]^T
                pl.BlockSpec((Ip, 4 * Hp), const2),                              # W_in^T
                pl.BlockSpec((Hp, 4 * Hp), const2),                              # W_h^T
                pl.BlockSpec((1, 4 * Hp), const2),                               # b_in + b_h
                pl.BlockSpec((Hp, Hp), const2),                                  # W_out (hy half)^T
            ],
            out_specs=[
                pl.BlockSpec((t_blk, b_tile, Hp), lambda bt, tb: (tb, bt, 0)),   # output seq
                pl.BlockSpec((b_tile, Hp), lambda bt, tb: (bt, 0)),              # final h
                pl.BlockSpec((b_tile, Hp), lambda bt, tb: (bt, 0)),              # final c
            ],
            scratch_shapes=[
                pltpu.VMEM((b_tile, Hp), jnp.float32),               # h carry
                pltpu.VMEM((b_tile, Hp), jnp.float32),               # c carry
                pltpu.VMEM((t_blk, b_tile, 4 * Hp), jnp.float32),    # x projection
            ],
        ),
        compiler_params=pltpu.CompilerParams(
            dimension_semantics=("parallel", "arbitrary"),
            vmem_limit_bytes=vmem_limit),
    )(x_p, h0_p, c0_p, ctx_att_p, ctx_out_p, w_in_t, w_h_t, b_p, wo_hy)

    out = out[:seq, :B, :H]
    if batch_first:
        out = jnp.transpose(out, (1, 0, 2))                  # (B, seq, H)
    return out, (hN[:B, :H], cN[:B, :H])


def _reference_jax(x, h0, c0, ctx, params):
    """Pure-JAX reference mirroring the PyTorch forward (batch_first=True)."""
    ctx_b = jnp.transpose(ctx, (1, 0, 2))                    # (B, L, H)
    x_tm = jnp.transpose(x, (1, 0, 2))                       # (seq, B, I)

    def step(carry, x_t):
        hx, cx = carry
        gates = x_t @ params["w_in"].T + params["b_in"] \
            + hx @ params["w_h"].T + params["b_h"]
        i, f, g, o = jnp.split(gates, 4, axis=1)
        i, f, g, o = jax.nn.sigmoid(i), jax.nn.sigmoid(f), jnp.tanh(g), jax.nn.sigmoid(o)
        cy = f * cx + i * g
        hy = o * jnp.tanh(cy)
        target = hy @ params["w_att_in"].T
        logits = jnp.einsum("blh,bh->bl", ctx_b, target)
        attn = jax.nn.softmax(logits, axis=-1)
        weighted = jnp.einsum("bl,blh->bh", attn, ctx_b)
        h_tilde = jnp.tanh(jnp.concatenate([weighted, hy], axis=1) @ params["w_att_out"].T)
        return (h_tilde, cy), h_tilde

    (hN, cN), out = jax.lax.scan(step, (h0, c0), x_tm)
    return jnp.transpose(out, (1, 0, 2)), (hN, cN)


if __name__ == "__main__":
    B, SEQ, I, H, L = 2, 6, 16, 32, 8
    key = jax.random.PRNGKey(0)
    ks = jax.random.split(key, 10)

    # Deterministic synthetic parameters (PyTorch-Linear shapes).
    scale = 0.1
    params = {
        "w_in": scale * jax.random.normal(ks[0], (4 * H, I), jnp.float32),
        "b_in": scale * jax.random.normal(ks[1], (4 * H,), jnp.float32),
        "w_h": scale * jax.random.normal(ks[2], (4 * H, H), jnp.float32),
        "b_h": scale * jax.random.normal(ks[3], (4 * H,), jnp.float32),
        "w_att_in": scale * jax.random.normal(ks[4], (H, H), jnp.float32),
        "w_att_out": scale * jax.random.normal(ks[5], (H, 2 * H), jnp.float32),
    }

    x = jax.random.normal(ks[6], (B, SEQ, I), jnp.float32)       # batch_first input
    h0 = jax.random.normal(ks[7], (B, H), jnp.float32)
    c0 = jax.random.normal(ks[8], (B, H), jnp.float32)
    ctx = jax.random.normal(ks[9], (L, B, H), jnp.float32)       # (sourceL, B, H)

    out_ref, (hN_ref, cN_ref) = _reference_jax(x, h0, c0, ctx, params)

    # f32-operand run: t_blk=4 with SEQ=6 exercises the cross-block state carry
    # and the padded-timestep masking path.
    out, (hN, cN) = lstm_attention_dot(x, h0, c0, ctx, params,
                                       batch_first=True, t_blk=4,
                                       mm_dtype=jnp.float32)
    jax.block_until_ready((out, hN, cN))
    assert jnp.allclose(out, out_ref, atol=1e-4, rtol=1e-4), "f32 output mismatch"
    assert jnp.allclose(hN, hN_ref, atol=1e-4, rtol=1e-4), "f32 hN mismatch"
    assert jnp.allclose(cN, cN_ref, atol=1e-4, rtol=1e-4), "f32 cN mismatch"

    # bf16-operand run (perf config): single time block, bf16 output stream.
    out_b, (hN_b, cN_b) = lstm_attention_dot(x, h0, c0, ctx, params,
                                             batch_first=True, t_blk=8,
                                             mm_dtype=jnp.bfloat16,
                                             out_dtype=jnp.bfloat16)
    jax.block_until_ready((out_b, hN_b, cN_b))
    assert jnp.allclose(out_b.astype(jnp.float32), out_ref,
                        atol=5e-2, rtol=5e-2), "bf16 output mismatch"
    assert jnp.allclose(hN_b, hN_ref, atol=5e-2, rtol=5e-2), "bf16 hN mismatch"
    assert jnp.allclose(cN_b, cN_ref, atol=5e-2, rtol=5e-2), "bf16 cN mismatch"

    print("KERNEL_OK")
</pallas_src>

<mosaic_0001>
module attributes {stable_mosaic.version = 11 : i64} {
  func.func @_lstm_attn_kernel(%arg0: i32, %arg1: i32, %arg2: memref<4x8x128xf32, #tpu.memory_space<vmem>>, %arg3: memref<8x128xf32, #tpu.memory_space<vmem>>, %arg4: memref<8x128xf32, #tpu.memory_space<vmem>>, %arg5: memref<8x8x128xf32, #tpu.memory_space<vmem>>, %arg6: memref<8x8x128xf32, #tpu.memory_space<vmem>>, %arg7: memref<128x512xf32, #tpu.memory_space<vmem>>, %arg8: memref<128x512xf32, #tpu.memory_space<vmem>>, %arg9: memref<1x512xf32, #tpu.memory_space<vmem>>, %arg10: memref<128x128xf32, #tpu.memory_space<vmem>>, %arg11: memref<4x8x128xf32, #tpu.memory_space<vmem>>, %arg12: memref<8x128xf32, #tpu.memory_space<vmem>>, %arg13: memref<8x128xf32, #tpu.memory_space<vmem>>, %arg14: memref<8x128xf32, #tpu.memory_space<vmem>>, %arg15: memref<8x128xf32, #tpu.memory_space<vmem>>, %arg16: memref<4x8x512xf32, #tpu.memory_space<vmem>>) attributes {dimension_semantics = [#tpu.dimension_semantics<parallel>, #tpu.dimension_semantics<arbitrary>], iteration_bounds = array<i64: 1, 2>, scalar_prefetch = 0 : i64, scratch_operands = 3 : i64, tpu.core_type = #tpu.core_type<tc>, window_params = [{transform_indices = @transform_0, window_bounds = array<i64: 4, 8, 128>}, {transform_indices = @transform_1, window_bounds = array<i64: 8, 128>}, {transform_indices = @transform_2, window_bounds = array<i64: 8, 128>}, {transform_indices = @transform_3, window_bounds = array<i64: 8, 8, 128>}, {transform_indices = @transform_4, window_bounds = array<i64: 8, 8, 128>}, {pipeline_mode = #tpu.pipeline_mode<synchronous>, transform_indices = @transform_5, window_bounds = array<i64: 128, 512>}, {pipeline_mode = #tpu.pipeline_mode<synchronous>, transform_indices = @transform_6, window_bounds = array<i64: 128, 512>}, {pipeline_mode = #tpu.pipeline_mode<synchronous>, transform_indices = @transform_7, window_bounds = array<i64: 1, 512>}, {pipeline_mode = #tpu.pipeline_mode<synchronous>, transform_indices = @transform_8, window_bounds = array<i64: 128, 128>}, {transform_indices = @transform_9, window_bounds = array<i64: 4, 8, 128>}, {transform_indices = @transform_10, window_bounds = array<i64: 8, 128>}, {transform_indices = @transform_11, window_bounds = array<i64: 8, 128>}]} {
    %c0_i32 = arith.constant 0 : i32
    %0 = arith.cmpi eq, %arg1, %c0_i32 : i32
    %1 = arith.extui %0 : i1 to i32
    %c0_i32_0 = arith.constant 0 : i32
    %2 = arith.cmpi ne, %1, %c0_i32_0 : i32
    scf.if %2 {
      %c0_152 = arith.constant 0 : index
      %c0_153 = arith.constant 0 : index
      %295 = vector.load %arg3[%c0_152, %c0_153] : memref<8x128xf32, #tpu.memory_space<vmem>>, vector<8x128xf32>
      %c0_154 = arith.constant 0 : index
      %c0_155 = arith.constant 0 : index
      %296 = vector.load %arg14[%c0_154, %c0_155] : memref<8x128xf32, #tpu.memory_space<vmem>>, vector<8x128xf32>
      tpu.vector_store %arg14[%c0_154, %c0_155], %295 {strides = array<i32>} : memref<8x128xf32, #tpu.memory_space<vmem>>, vector<8x128xf32>,
      %c0_156 = arith.constant 0 : index
      %c0_157 = arith.constant 0 : index
      %297 = vector.load %arg4[%c0_156, %c0_157] : memref<8x128xf32, #tpu.memory_space<vmem>>, vector<8x128xf32>
      %c0_158 = arith.constant 0 : index
      %c0_159 = arith.constant 0 : index
      %298 = vector.load %arg15[%c0_158, %c0_159] : memref<8x128xf32, #tpu.memory_space<vmem>>, vector<8x128xf32>
      tpu.vector_store %arg15[%c0_158, %c0_159], %297 {strides = array<i32>} : memref<8x128xf32, #tpu.memory_space<vmem>>, vector<8x128xf32>,
    } else {
    }
    %c0 = arith.constant 0 : index
    %c0_1 = arith.constant 0 : index
    %c0_2 = arith.constant 0 : index
    %3 = vector.load %arg2[%c0, %c0_1, %c0_2] : memref<4x8x128xf32, #tpu.memory_space<vmem>>, vector<4x8x128xf32>
    %4 = vector.shape_cast %3 : vector<4x8x128xf32> to vector<32x128xf32>
    %c0_3 = arith.constant 0 : index
    %c0_4 = arith.constant 0 : index
    %5 = vector.load %arg7[%c0_3, %c0_4] : memref<128x512xf32, #tpu.memory_space<vmem>>, vector<128x512xf32>
    %cst = arith.constant dense<0.000000e+00> : vector<32x512xf32>
    %6 = tpu.matmul %4, %5, %cst {dimension_numbers = #tpu.dot_dimension_numbers<[1], [0], [0], [1], [0, 0, 1, 1], [], []>} : vector<32x128xf32>, vector<128x512xf32>, vector<32x512xf32> -> vector<32x512xf32>
    %c0_5 = arith.constant 0 : index
    %c0_6 = arith.constant 0 : index
    %7 = vector.load %arg9[%c0_5, %c0_6] : memref<1x512xf32, #tpu.memory_space<vmem>>, vector<1x512xf32>
    %8 = vector.broadcast %7 : vector<1x512xf32> to vector<32x512xf32>
    %9 = arith.addf %6, %8 : vector<32x512xf32>
    %10 = vector.shape_cast %9 : vector<32x512xf32> to vector<4x8x512xf32>
    %c0_7 = arith.constant 0 : index
    %c0_8 = arith.constant 0 : index
    %c0_9 = arith.constant 0 : index
    %11 = vector.load %arg16[%c0_7, %c0_8, %c0_9] : memref<4x8x512xf32, #tpu.memory_space<vmem>>, vector<4x8x512xf32>
    tpu.vector_store %arg16[%c0_7, %c0_8, %c0_9], %10 {strides = array<i32>} : memref<4x8x512xf32, #tpu.memory_space<vmem>>, vector<4x8x512xf32>,
    %c0_10 = arith.constant 0 : index
    %c0_11 = arith.constant 0 : index
    %12 = vector.load %arg14[%c0_10, %c0_11] : memref<8x128xf32, #tpu.memory_space<vmem>>, vector<8x128xf32>
    %c0_12 = arith.constant 0 : index
    %c0_13 = arith.constant 0 : index
    %13 = vector.load %arg15[%c0_12, %c0_13] : memref<8x128xf32, #tpu.memory_space<vmem>>, vector<8x128xf32>
    %c0_14 = arith.constant 0 : index
    %c0_15 = arith.constant 0 : index
    %c0_16 = arith.constant 0 : index
    %14 = vector.load %arg16[%c0_14, %c0_15, %c0_16] : memref<4x8x512xf32, #tpu.memory_space<vmem>>, vector<1x8x512xf32>
    %15 = vector.shape_cast %14 : vector<1x8x512xf32> to vector<8x512xf32>
    %c0_17 = arith.constant 0 : index
    %c0_18 = arith.constant 0 : index
    %16 = vector.load %arg8[%c0_17, %c0_18] : memref<128x512xf32, #tpu.memory_space<vmem>>, vector<128x512xf32>
    %cst_19 = arith.constant dense<0.000000e+00> : vector<8x512xf32>
    %17 = tpu.matmul %12, %16, %cst_19 {dimension_numbers = #tpu.dot_dimension_numbers<[1], [0], [0], [1], [0, 0, 1, 1], [], []>} : vector<8x128xf32>, vector<128x512xf32>, vector<8x512xf32> -> vector<8x512xf32>
    %18 = arith.addf %15, %17 : vector<8x512xf32>
    %19 = vector.extract_strided_slice %18 {offsets = [0, 0], sizes = [8, 128], strides = [1, 1]} : vector<8x512xf32> to vector<8x128xf32>
    %20 = arith.negf %19 : vector<8x128xf32>
    %21 = math.exp %20 : vector<8x128xf32>
    %cst_20 = arith.constant 1.000000e+00 : f32
    %22 = vector.broadcast %cst_20 : f32 to vector<8x128xf32>
    %23 = arith.addf %22, %21 : vector<8x128xf32>
    %24 = arith.divf %22, %23 : vector<8x128xf32>
    %25 = vector.extract_strided_slice %18 {offsets = [0, 128], sizes = [8, 128], strides = [1, 1]} : vector<8x512xf32> to vector<8x128xf32>
    %26 = arith.negf %25 : vector<8x128xf32>
    %27 = math.exp %26 : vector<8x128xf32>
    %cst_21 = arith.constant 1.000000e+00 : f32
    %28 = vector.broadcast %cst_21 : f32 to vector<8x128xf32>
    %29 = arith.addf %28, %27 : vector<8x128xf32>
    %30 = arith.divf %28, %29 : vector<8x128xf32>
    %31 = vector.extract_strided_slice %18 {offsets = [0, 256], sizes = [8, 128], strides = [1, 1]} : vector<8x512xf32> to vector<8x128xf32>
    %32 = math.tanh %31 : vector<8x128xf32>
    %33 = vector.extract_strided_slice %18 {offsets = [0, 384], sizes = [8, 128], strides = [1, 1]} : vector<8x512xf32> to vector<8x128xf32>
    %34 = arith.negf %33 : vector<8x128xf32>
    %35 = math.exp %34 : vector<8x128xf32>
    %cst_22 = arith.constant 1.000000e+00 : f32
    %36 = vector.broadcast %cst_22 : f32 to vector<8x128xf32>
    %37 = arith.addf %36, %35 : vector<8x128xf32>
    %38 = arith.divf %36, %37 : vector<8x128xf32>
    %39 = arith.mulf %30, %13 : vector<8x128xf32>
    %40 = arith.mulf %24, %32 : vector<8x128xf32>
    %41 = arith.addf %39, %40 : vector<8x128xf32>
    %42 = math.tanh %41 : vector<8x128xf32>
    %43 = arith.mulf %38, %42 : vector<8x128xf32>
    %44 = vector.shape_cast %43 : vector<8x128xf32> to vector<8x1x128xf32>
    %c0_23 = arith.constant 0 : index
    %c0_24 = arith.constant 0 : index
    %c0_25 = arith.constant 0 : index
    %45 = vector.load %arg5[%c0_23, %c0_24, %c0_25] : memref<8x8x128xf32, #tpu.memory_space<vmem>>, vector<8x8x128xf32>
    %46 = vector.broadcast %44 : vector<8x1x128xf32> to vector<8x8x128xf32>
    %47 = arith.mulf %46, %45 : vector<8x8x128xf32>
    %cst_26 = arith.constant dense<0.000000e+00> : vector<8x8xf32>
    %48 = vector.multi_reduction <add>, %47, %cst_26 [2] : vector<8x8x128xf32> to vector<8x8xf32>
    %cst_27 = arith.constant dense<0xFF800000> : vector<8xf32>
    %49 = vector.multi_reduction <maximumf>, %48, %cst_27 [1] : vector<8x8xf32> to vector<8xf32>
    %50 = vector.shape_cast %49 : vector<8xf32> to vector<8x1xf32>
    %51 = vector.broadcast %50 : vector<8x1xf32> to vector<8x8xf32>
    %52 = arith.subf %48, %51 : vector<8x8xf32>
    %53 = math.exp %52 : vector<8x8xf32>
    %cst_28 = arith.constant dense<0.000000e+00> : vector<8xf32>
    %54 = vector.multi_reduction <add>, %53, %cst_28 [1] : vector<8x8xf32> to vector<8xf32>
    %55 = vector.shape_cast %54 : vector<8xf32> to vector<8x1xf32>
    %56 = tpu.reciprocal %55 {approx = true} : vector<8x1xf32> -> vector<8x1xf32>
    %57 = arith.mulf %55, %56 : vector<8x1xf32>
    %cst_29 = arith.constant 2.000000e+00 : f32
    %58 = vector.broadcast %cst_29 : f32 to vector<8x1xf32>
    %59 = arith.subf %58, %57 : vector<8x1xf32>
    %60 = arith.mulf %56, %59 : vector<8x1xf32>
    %61 = vector.broadcast %60 : vector<8x1xf32> to vector<8x8xf32>
    %62 = arith.mulf %53, %61 : vector<8x8xf32>
    %63 = vector.shape_cast %62 : vector<8x8xf32> to vector<8x8x1xf32>
    %c0_30 = arith.constant 0 : index
    %c0_31 = arith.constant 0 : index
    %c0_32 = arith.constant 0 : index
    %64 = vector.load %arg6[%c0_30, %c0_31, %c0_32] : memref<8x8x128xf32, #tpu.memory_space<vmem>>, vector<8x8x128xf32>
    %65 = vector.broadcast %63 : vector<8x8x1xf32> to vector<8x8x128xf32>
    %66 = arith.mulf %65, %64 : vector<8x8x128xf32>
    %cst_33 = arith.constant dense<0.000000e+00> : vector<8x128xf32>
    %67 = vector.multi_reduction <add>, %66, %cst_33 [1] : vector<8x8x128xf32> to vector<8x128xf32>
    %c0_34 = arith.constant 0 : index
    %c0_35 = arith.constant 0 : index
    %68 = vector.load %arg10[%c0_34, %c0_35] : memref<128x128xf32, #tpu.memory_space<vmem>>, vector<128x128xf32>
    %cst_36 = arith.constant dense<0.000000e+00> : vector<8x128xf32>
    %69 = tpu.matmul %43, %68, %cst_36 {dimension_numbers = #tpu.dot_dimension_numbers<[1], [0], [0], [1], [0, 0, 1, 1], [], []>} : vector<8x128xf32>, vector<128x128xf32>, vector<8x128xf32> -> vector<8x128xf32>
    %70 = arith.addf %67, %69 : vector<8x128xf32>
    %71 = math.tanh %70 : vector<8x128xf32>
    %c0_37 = arith.constant 0 : index
    %c0_38 = arith.constant 0 : index
    %c0_39 = arith.constant 0 : index
    %72 = vector.load %arg11[%c0_37, %c0_38, %c0_39] : memref<4x8x128xf32, #tpu.memory_space<vmem>>, vector<1x8x128xf32>
    %73 = vector.shape_cast %72 : vector<1x8x128xf32> to vector<8x128xf32>
    %74 = vector.shape_cast %71 : vector<8x128xf32> to vector<1x8x128xf32>
    tpu.vector_store %arg11[%c0_37, %c0_38, %c0_39], %74 {strides = array<i32>} : memref<4x8x128xf32, #tpu.memory_space<vmem>>, vector<1x8x128xf32>,
    %c4_i32 = arith.constant 4 : i32
    %75 = arith.muli %arg1, %c4_i32 : i32
    %c0_i32_40 = arith.constant 0 : i32
    %76 = arith.addi %75, %c0_i32_40 : i32
    %c6_i32 = arith.constant 6 : i32
    %77 = arith.cmpi slt, %76, %c6_i32 : i32
    %78 = arith.select %77, %71, %12 : vector<8x128xf32>
    %c0_41 = arith.constant 0 : index
    %c0_42 = arith.constant 0 : index
    %79 = vector.load %arg14[%c0_41, %c0_42] : memref<8x128xf32, #tpu.memory_space<vmem>>, vector<8x128xf32>
    tpu.vector_store %arg14[%c0_41, %c0_42], %78 {strides = array<i32>} : memref<8x128xf32, #tpu.memory_space<vmem>>, vector<8x128xf32>,
    %80 = arith.select %77, %41, %13 : vector<8x128xf32>
    %c0_43 = arith.constant 0 : index
    %c0_44 = arith.constant 0 : index
    %81 = vector.load %arg15[%c0_43, %c0_44] : memref<8x128xf32, #tpu.memory_space<vmem>>, vector<8x128xf32>
    tpu.vector_store %arg15[%c0_43, %c0_44], %80 {strides = array<i32>} : memref<8x128xf32, #tpu.memory_space<vmem>>, vector<8x128xf32>,
    %c0_45 = arith.constant 0 : index
    %c0_46 = arith.constant 0 : index
    %82 = vector.load %arg14[%c0_45, %c0_46] : memref<8x128xf32, #tpu.memory_space<vmem>>, vector<8x128xf32>
    %c0_47 = arith.constant 0 : index
    %c0_48 = arith.constant 0 : index
    %83 = vector.load %arg15[%c0_47, %c0_48] : memref<8x128xf32, #tpu.memory_space<vmem>>, vector<8x128xf32>
    %c1 = arith.constant 1 : index
    %c0_49 = arith.constant 0 : index
    %c0_50 = arith.constant 0 : index
    %84 = vector.load %arg16[%c1, %c0_49, %c0_50] : memref<4x8x512xf32, #tpu.memory_space<vmem>>, vector<1x8x512xf32>
    %85 = vector.shape_cast %84 : vector<1x8x512xf32> to vector<8x512xf32>
    %c0_51 = arith.constant 0 : index
    %c0_52 = arith.constant 0 : index
    %86 = vector.load %arg8[%c0_51, %c0_52] : memref<128x512xf32, #tpu.memory_space<vmem>>, vector<128x512xf32>
    %cst_53 = arith.constant dense<0.000000e+00> : vector<8x512xf32>
    %87 = tpu.matmul %82, %86, %cst_53 {dimension_numbers = #tpu.dot_dimension_numbers<[1], [0], [0], [1], [0, 0, 1, 1], [], []>} : vector<8x128xf32>, vector<128x512xf32>, vector<8x512xf32> -> vector<8x512xf32>
    %88 = arith.addf %85, %87 : vector<8x512xf32>
    %89 = vector.extract_strided_slice %88 {offsets = [0, 0], sizes = [8, 128], strides = [1, 1]} : vector<8x512xf32> to vector<8x128xf32>
    %90 = arith.negf %89 : vector<8x128xf32>
    %91 = math.exp %90 : vector<8x128xf32>
    %cst_54 = arith.constant 1.000000e+00 : f32
    %92 = vector.broadcast %cst_54 : f32 to vector<8x128xf32>
    %93 = arith.addf %92, %91 : vector<8x128xf32>
    %94 = arith.divf %92, %93 : vector<8x128xf32>
    %95 = vector.extract_strided_slice %88 {offsets = [0, 128], sizes = [8, 128], strides = [1, 1]} : vector<8x512xf32> to vector<8x128xf32>
    %96 = arith.negf %95 : vector<8x128xf32>
    %97 = math.exp %96 : vector<8x128xf32>
    %cst_55 = arith.constant 1.000000e+00 : f32
    %98 = vector.broadcast %cst_55 : f32 to vector<8x128xf32>
    %99 = arith.addf %98, %97 : vector<8x128xf32>
    %100 = arith.divf %98, %99 : vector<8x128xf32>
    %101 = vector.extract_strided_slice %88 {offsets = [0, 256], sizes = [8, 128], strides = [1, 1]} : vector<8x512xf32> to vector<8x128xf32>
    %102 = math.tanh %101 : vector<8x128xf32>
    %103 = vector.extract_strided_slice %88 {offsets = [0, 384], sizes = [8, 128], strides = [1, 1]} : vector<8x512xf32> to vector<8x128xf32>
    %104 = arith.negf %103 : vector<8x128xf32>
    %105 = math.exp %104 : vector<8x128xf32>
    %cst_56 = arith.constant 1.000000e+00 : f32
    %106 = vector.broadcast %cst_56 : f32 to vector<8x128xf32>
    %107 = arith.addf %106, %105 : vector<8x128xf32>
    %108 = arith.divf %106, %107 : vector<8x128xf32>
    %109 = arith.mulf %100, %83 : vector<8x128xf32>
    %110 = arith.mulf %94, %102 : vector<8x128xf32>
    %111 = arith.addf %109, %110 : vector<8x128xf32>
    %112 = math.tanh %111 : vector<8x128xf32>
    %113 = arith.mulf %108, %112 : vector<8x128xf32>
    %114 = vector.shape_cast %113 : vector<8x128xf32> to vector<8x1x128xf32>
    %c0_57 = arith.constant 0 : index
    %c0_58 = arith.constant 0 : index
    %c0_59 = arith.constant 0 : index
    %115 = vector.load %arg5[%c0_57, %c0_58, %c0_59] : memref<8x8x128xf32, #tpu.memory_space<vmem>>, vector<8x8x128xf32>
    %116 = vector.broadcast %114 : vector<8x1x128xf32> to vector<8x8x128xf32>
    %117 = arith.mulf %116, %115 : vector<8x8x128xf32>
    %cst_60 = arith.constant dense<0.000000e+00> : vector<8x8xf32>
    %118 = vector.multi_reduction <add>, %117, %cst_60 [2] : vector<8x8x128xf32> to vector<8x8xf32>
    %cst_61 = arith.constant dense<0xFF800000> : vector<8xf32>
    %119 = vector.multi_reduction <maximumf>, %118, %cst_61 [1] : vector<8x8xf32> to vector<8xf32>
    %120 = vector.shape_cast %119 : vector<8xf32> to vector<8x1xf32>
    %121 = vector.broadcast %120 : vector<8x1xf32> to vector<8x8xf32>
    %122 = arith.subf %118, %121 : vector<8x8xf32>
    %123 = math.exp %122 : vector<8x8xf32>
    %cst_62 = arith.constant dense<0.000000e+00> : vector<8xf32>
    %124 = vector.multi_reduction <add>, %123, %cst_62 [1] : vector<8x8xf32> to vector<8xf32>
    %125 = vector.shape_cast %124 : vector<8xf32> to vector<8x1xf32>
    %126 = tpu.reciprocal %125 {approx = true} : vector<8x1xf32> -> vector<8x1xf32>
    %127 = arith.mulf %125, %126 : vector<8x1xf32>
    %cst_63 = arith.constant 2.000000e+00 : f32
    %128 = vector.broadcast %cst_63 : f32 to vector<8x1xf32>
    %129 = arith.subf %128, %127 : vector<8x1xf32>
    %130 = arith.mulf %126, %129 : vector<8x1xf32>
    %131 = vector.broadcast %130 : vector<8x1xf32> to vector<8x8xf32>
    %132 = arith.mulf %123, %131 : vector<8x8xf32>
    %133 = vector.shape_cast %132 : vector<8x8xf32> to vector<8x8x1xf32>
    %c0_64 = arith.constant 0 : index
    %c0_65 = arith.constant 0 : index
    %c0_66 = arith.constant 0 : index
    %134 = vector.load %arg6[%c0_64, %c0_65, %c0_66] : memref<8x8x128xf32, #tpu.memory_space<vmem>>, vector<8x8x128xf32>
    %135 = vector.broadcast %133 : vector<8x8x1xf32> to vector<8x8x128xf32>
    %136 = arith.mulf %135, %134 : vector<8x8x128xf32>
    %cst_67 = arith.constant dense<0.000000e+00> : vector<8x128xf32>
    %137 = vector.multi_reduction <add>, %136, %cst_67 [1] : vector<8x8x128xf32> to vector<8x128xf32>
    %c0_68 = arith.constant 0 : index
    %c0_69 = arith.constant 0 : index
    %138 = vector.load %arg10[%c0_68, %c0_69] : memref<128x128xf32, #tpu.memory_space<vmem>>, vector<128x128xf32>
    %cst_70 = arith.constant dense<0.000000e+00> : vector<8x128xf32>
    %139 = tpu.matmul %113, %138, %cst_70 {dimension_numbers = #tpu.dot_dimension_numbers<[1], [0], [0], [1], [0, 0, 1, 1], [], []>} : vector<8x128xf32>, vector<128x128xf32>, vector<8x128xf32> -> vector<8x128xf32>
    %140 = arith.addf %137, %139 : vector<8x128xf32>
    %141 = math.tanh %140 : vector<8x128xf32>
    %c1_71 = arith.constant 1 : index
    %c0_72 = arith.constant 0 : index
    %c0_73 = arith.constant 0 : index
    %142 = vector.load %arg11[%c1_71, %c0_72, %c0_73] : memref<4x8x128xf32, #tpu.memory_space<vmem>>, vector<1x8x128xf32>
    %143 = vector.shape_cast %142 : vector<1x8x128xf32> to vector<8x128xf32>
    %144 = vector.shape_cast %141 : vector<8x128xf32> to vector<1x8x128xf32>
    tpu.vector_store %arg11[%c1_71, %c0_72, %c0_73], %144 {strides = array<i32>} : memref<4x8x128xf32, #tpu.memory_space<vmem>>, vector<1x8x128xf32>,
    %c4_i32_74 = arith.constant 4 : i32
    %145 = arith.muli %arg1, %c4_i32_74 : i32
    %c1_i32 = arith.constant 1 : i32
    %146 = arith.addi %145, %c1_i32 : i32
    %c6_i32_75 = arith.constant 6 : i32
    %147 = arith.cmpi slt, %146, %c6_i32_75 : i32
    %148 = arith.select %147, %141, %82 : vector<8x128xf32>
    %c0_76 = arith.constant 0 : index
    %c0_77 = arith.constant 0 : index
    %149 = vector.load %arg14[%c0_76, %c0_77] : memref<8x128xf32, #tpu.memory_space<vmem>>, vector<8x128xf32>
    tpu.vector_store %arg14[%c0_76, %c0_77], %148 {strides = array<i32>} : memref<8x128xf32, #tpu.memory_space<vmem>>, vector<8x128xf32>,
    %150 = arith.select %147, %111, %83 : vector<8x128xf32>
    %c0_78 = arith.constant 0 : index
    %c0_79 = arith.constant 0 : index
    %151 = vector.load %arg15[%c0_78, %c0_79] : memref<8x128xf32, #tpu.memory_space<vmem>>, vector<8x128xf32>
    tpu.vector_store %arg15[%c0_78, %c0_79], %150 {strides = array<i32>} : memref<8x128xf32, #tpu.memory_space<vmem>>, vector<8x128xf32>,
    %c0_80 = arith.constant 0 : index
    %c0_81 = arith.constant 0 : index
    %152 = vector.load %arg14[%c0_80, %c0_81] : memref<8x128xf32, #tpu.memory_space<vmem>>, vector<8x128xf32>
    %c0_82 = arith.constant 0 : index
    %c0_83 = arith.constant 0 : index
    %153 = vector.load %arg15[%c0_82, %c0_83] : memref<8x128xf32, #tpu.memory_space<vmem>>, vector<8x128xf32>
    %c2 = arith.constant 2 : index
    %c0_84 = arith.constant 0 : index
    %c0_85 = arith.constant 0 : index
    %154 = vector.load %arg16[%c2, %c0_84, %c0_85] : memref<4x8x512xf32, #tpu.memory_space<vmem>>, vector<1x8x512xf32>
    %155 = vector.shape_cast %154 : vector<1x8x512xf32> to vector<8x512xf32>
    %c0_86 = arith.constant 0 : index
    %c0_87 = arith.constant 0 : index
    %156 = vector.load %arg8[%c0_86, %c0_87] : memref<128x512xf32, #tpu.memory_space<vmem>>, vector<128x512xf32>
    %cst_88 = arith.constant dense<0.000000e+00> : vector<8x512xf32>
    %157 = tpu.matmul %152, %156, %cst_88 {dimension_numbers = #tpu.dot_dimension_numbers<[1], [0], [0], [1], [0, 0, 1, 1], [], []>} : vector<8x128xf32>, vector<128x512xf32>, vector<8x512xf32> -> vector<8x512xf32>
    %158 = arith.addf %155, %157 : vector<8x512xf32>
    %159 = vector.extract_strided_slice %158 {offsets = [0, 0], sizes = [8, 128], strides = [1, 1]} : vector<8x512xf32> to vector<8x128xf32>
    %160 = arith.negf %159 : vector<8x128xf32>
    %161 = math.exp %160 : vector<8x128xf32>
    %cst_89 = arith.constant 1.000000e+00 : f32
    %162 = vector.broadcast %cst_89 : f32 to vector<8x128xf32>
    %163 = arith.addf %162, %161 : vector<8x128xf32>
    %164 = arith.divf %162, %163 : vector<8x128xf32>
    %165 = vector.extract_strided_slice %158 {offsets = [0, 128], sizes = [8, 128], strides = [1, 1]} : vector<8x512xf32> to vector<8x128xf32>
    %166 = arith.negf %165 : vector<8x128xf32>
    %167 = math.exp %166 : vector<8x128xf32>
    %cst_90 = arith.constant 1.000000e+00 : f32
    %168 = vector.broadcast %cst_90 : f32 to vector<8x128xf32>
    %169 = arith.addf %168, %167 : vector<8x128xf32>
    %170 = arith.divf %168, %169 : vector<8x128xf32>
    %171 = vector.extract_strided_slice %158 {offsets = [0, 256], sizes = [8, 128], strides = [1, 1]} : vector<8x512xf32> to vector<8x128xf32>
    %172 = math.tanh %171 : vector<8x128xf32>
    %173 = vector.extract_strided_slice %158 {offsets = [0, 384], sizes = [8, 128], strides = [1, 1]} : vector<8x512xf32> to vector<8x128xf32>
    %174 = arith.negf %173 : vector<8x128xf32>
    %175 = math.exp %174 : vector<8x128xf32>
    %cst_91 = arith.constant 1.000000e+00 : f32
    %176 = vector.broadcast %cst_91 : f32 to vector<8x128xf32>
    %177 = arith.addf %176, %175 : vector<8x128xf32>
    %178 = arith.divf %176, %177 : vector<8x128xf32>
    %179 = arith.mulf %170, %153 : vector<8x128xf32>
    %180 = arith.mulf %164, %172 : vector<8x128xf32>
    %181 = arith.addf %179, %180 : vector<8x128xf32>
    %182 = math.tanh %181 : vector<8x128xf32>
    %183 = arith.mulf %178, %182 : vector<8x128xf32>
    %184 = vector.shape_cast %183 : vector<8x128xf32> to vector<8x1x128xf32>
    %c0_92 = arith.constant 0 : index
    %c0_93 = arith.constant 0 : index
    %c0_94 = arith.constant 0 : index
    %185 = vector.load %arg5[%c0_92, %c0_93, %c0_94] : memref<8x8x128xf32, #tpu.memory_space<vmem>>, vector<8x8x128xf32>
    %186 = vector.broadcast %184 : vector<8x1x128xf32> to vector<8x8x128xf32>
    %187 = arith.mulf %186, %185 : vector<8x8x128xf32>
    %cst_95 = arith.constant dense<0.000000e+00> : vector<8x8xf32>
    %188 = vector.multi_reduction <add>, %187, %cst_95 [2] : vector<8x8x128xf32> to vector<8x8xf32>
    %cst_96 = arith.constant dense<0xFF800000> : vector<8xf32>
    %189 = vector.multi_reduction <maximumf>, %188, %cst_96 [1] : vector<8x8xf32> to vector<8xf32>
    %190 = vector.shape_cast %189 : vector<8xf32> to vector<8x1xf32>
    %191 = vector.broadcast %190 : vector<8x1xf32> to vector<8x8xf32>
    %192 = arith.subf %188, %191 : vector<8x8xf32>
    %193 = math.exp %192 : vector<8x8xf32>
    %cst_97 = arith.constant dense<0.000000e+00> : vector<8xf32>
    %194 = vector.multi_reduction <add>, %193, %cst_97 [1] : vector<8x8xf32> to vector<8xf32>
    %195 = vector.shape_cast %194 : vector<8xf32> to vector<8x1xf32>
    %196 = tpu.reciprocal %195 {approx = true} : vector<8x1xf32> -> vector<8x1xf32>
    %197 = arith.mulf %195, %196 : vector<8x1xf32>
    %cst_98 = arith.constant 2.000000e+00 : f32
    %198 = vector.broadcast %cst_98 : f32 to vector<8x1xf32>
    %199 = arith.subf %198, %197 : vector<8x1xf32>
    %200 = arith.mulf %196, %199 : vector<8x1xf32>
    %201 = vector.broadcast %200 : vector<8x1xf32> to vector<8x8xf32>
    %202 = arith.mulf %193, %201 : vector<8x8xf32>
    %203 = vector.shape_cast %202 : vector<8x8xf32> to vector<8x8x1xf32>
    %c0_99 = arith.constant 0 : index
    %c0_100 = arith.constant 0 : index
    %c0_101 = arith.constant 0 : index
    %204 = vector.load %arg6[%c0_99, %c0_100, %c0_101] : memref<8x8x128xf32, #tpu.memory_space<vmem>>, vector<8x8x128xf32>
    %205 = vector.broadcast %203 : vector<8x8x1xf32> to vector<8x8x128xf32>
    %206 = arith.mulf %205, %204 : vector<8x8x128xf32>
    %cst_102 = arith.constant dense<0.000000e+00> : vector<8x128xf32>
    %207 = vector.multi_reduction <add>, %206, %cst_102 [1] : vector<8x8x128xf32> to vector<8x128xf32>
    %c0_103 = arith.constant 0 : index
    %c0_104 = arith.constant 0 : index
    %208 = vector.load %arg10[%c0_103, %c0_104] : memref<128x128xf32, #tpu.memory_space<vmem>>, vector<128x128xf32>
    %cst_105 = arith.constant dense<0.000000e+00> : vector<8x128xf32>
    %209 = tpu.matmul %183, %208, %cst_105 {dimension_numbers = #tpu.dot_dimension_numbers<[1], [0], [0], [1], [0, 0, 1, 1], [], []>} : vector<8x128xf32>, vector<128x128xf32>, vector<8x128xf32> -> vector<8x128xf32>
    %210 = arith.addf %207, %209 : vector<8x128xf32>
    %211 = math.tanh %210 : vector<8x128xf32>
    %c2_106 = arith.constant 2 : index
    %c0_107 = arith.constant 0 : index
    %c0_108 = arith.constant 0 : index
    %212 = vector.load %arg11[%c2_106, %c0_107, %c0_108] : memref<4x8x128xf32, #tpu.memory_space<vmem>>, vector<1x8x128xf32>
    %213 = vector.shape_cast %212 : vector<1x8x128xf32> to vector<8x128xf32>
    %214 = vector.shape_cast %211 : vector<8x128xf32> to vector<1x8x128xf32>
    tpu.vector_store %arg11[%c2_106, %c0_107, %c0_108], %214 {strides = array<i32>} : memref<4x8x128xf32, #tpu.memory_space<vmem>>, vector<1x8x128xf32>,
    %c4_i32_109 = arith.constant 4 : i32
    %215 = arith.muli %arg1, %c4_i32_109 : i32
    %c2_i32 = arith.constant 2 : i32
    %216 = arith.addi %215, %c2_i32 : i32
    %c6_i32_110 = arith.constant 6 : i32
    %217 = arith.cmpi slt, %216, %c6_i32_110 : i32
    %218 = arith.select %217, %211, %152 : vector<8x128xf32>
    %c0_111 = arith.constant 0 : index
    %c0_112 = arith.constant 0 : index
    %219 = vector.load %arg14[%c0_111, %c0_112] : memref<8x128xf32, #tpu.memory_space<vmem>>, vector<8x128xf32>
    tpu.vector_store %arg14[%c0_111, %c0_112], %218 {strides = array<i32>} : memref<8x128xf32, #tpu.memory_space<vmem>>, vector<8x128xf32>,
    %220 = arith.select %217, %181, %153 : vector<8x128xf32>
    %c0_113 = arith.constant 0 : index
    %c0_114 = arith.constant 0 : index
    %221 = vector.load %arg15[%c0_113, %c0_114] : memref<8x128xf32, #tpu.memory_space<vmem>>, vector<8x128xf32>
    tpu.vector_store %arg15[%c0_113, %c0_114], %220 {strides = array<i32>} : memref<8x128xf32, #tpu.memory_space<vmem>>, vector<8x128xf32>,
    %c0_115 = arith.constant 0 : index
    %c0_116 = arith.constant 0 : index
    %222 = vector.load %arg14[%c0_115, %c0_116] : memref<8x128xf32, #tpu.memory_space<vmem>>, vector<8x128xf32>
    %c0_117 = arith.constant 0 : index
    %c0_118 = arith.constant 0 : index
    %223 = vector.load %arg15[%c0_117, %c0_118] : memref<8x128xf32, #tpu.memory_space<vmem>>, vector<8x128xf32>
    %c3 = arith.constant 3 : index
    %c0_119 = arith.constant 0 : index
    %c0_120 = arith.constant 0 : index
    %224 = vector.load %arg16[%c3, %c0_119, %c0_120] : memref<4x8x512xf32, #tpu.memory_space<vmem>>, vector<1x8x512xf32>
    %225 = vector.shape_cast %224 : vector<1x8x512xf32> to vector<8x512xf32>
    %c0_121 = arith.constant 0 : index
    %c0_122 = arith.constant 0 : index
    %226 = vector.load %arg8[%c0_121, %c0_122] : memref<128x512xf32, #tpu.memory_space<vmem>>, vector<128x512xf32>
    %cst_123 = arith.constant dense<0.000000e+00> : vector<8x512xf32>
    %227 = tpu.matmul %222, %226, %cst_123 {dimension_numbers = #tpu.dot_dimension_numbers<[1], [0], [0], [1], [0, 0, 1, 1], [], []>} : vector<8x128xf32>, vector<128x512xf32>, vector<8x512xf32> -> vector<8x512xf32>
    %228 = arith.addf %225, %227 : vector<8x512xf32>
    %229 = vector.extract_strided_slice %228 {offsets = [0, 0], sizes = [8, 128], strides = [1, 1]} : vector<8x512xf32> to vector<8x128xf32>
    %230 = arith.negf %229 : vector<8x128xf32>
    %231 = math.exp %230 : vector<8x128xf32>
    %cst_124 = arith.constant 1.000000e+00 : f32
    %232 = vector.broadcast %cst_124 : f32 to vector<8x128xf32>
    %233 = arith.addf %232, %231 : vector<8x128xf32>
    %234 = arith.divf %232, %233 : vector<8x128xf32>
    %235 = vector.extract_strided_slice %228 {offsets = [0, 128], sizes = [8, 128], strides = [1, 1]} : vector<8x512xf32> to vector<8x128xf32>
    %236 = arith.negf %235 : vector<8x128xf32>
    %237 = math.exp %236 : vector<8x128xf32>
    %cst_125 = arith.constant 1.000000e+00 : f32
    %238 = vector.broadcast %cst_125 : f32 to vector<8x128xf32>
    %239 = arith.addf %238, %237 : vector<8x128xf32>
    %240 = arith.divf %238, %239 : vector<8x128xf32>
    %241 = vector.extract_strided_slice %228 {offsets = [0, 256], sizes = [8, 128], strides = [1, 1]} : vector<8x512xf32> to vector<8x128xf32>
    %242 = math.tanh %241 : vector<8x128xf32>
    %243 = vector.extract_strided_slice %228 {offsets = [0, 384], sizes = [8, 128], strides = [1, 1]} : vector<8x512xf32> to vector<8x128xf32>
    %244 = arith.negf %243 : vector<8x128xf32>
    %245 = math.exp %244 : vector<8x128xf32>
    %cst_126 = arith.constant 1.000000e+00 : f32
    %246 = vector.broadcast %cst_126 : f32 to vector<8x128xf32>
    %247 = arith.addf %246, %245 : vector<8x128xf32>
    %248 = arith.divf %246, %247 : vector<8x128xf32>
    %249 = arith.mulf %240, %223 : vector<8x128xf32>
    %250 = arith.mulf %234, %242 : vector<8x128xf32>
    %251 = arith.addf %249, %250 : vector<8x128xf32>
    %252 = math.tanh %251 : vector<8x128xf32>
    %253 = arith.mulf %248, %252 : vector<8x128xf32>
    %254 = vector.shape_cast %253 : vector<8x128xf32> to vector<8x1x128xf32>
    %c0_127 = arith.constant 0 : index
    %c0_128 = arith.constant 0 : index
    %c0_129 = arith.constant 0 : index
    %255 = vector.load %arg5[%c0_127, %c0_128, %c0_129] : memref<8x8x128xf32, #tpu.memory_space<vmem>>, vector<8x8x128xf32>
    %256 = vector.broadcast %254 : vector<8x1x128xf32> to vector<8x8x128xf32>
    %257 = arith.mulf %256, %255 : vector<8x8x128xf32>
    %cst_130 = arith.constant dense<0.000000e+00> : vector<8x8xf32>
    %258 = vector.multi_reduction <add>, %257, %cst_130 [2] : vector<8x8x128xf32> to vector<8x8xf32>
    %cst_131 = arith.constant dense<0xFF800000> : vector<8xf32>
    %259 = vector.multi_reduction <maximumf>, %258, %cst_131 [1] : vector<8x8xf32> to vector<8xf32>
    %260 = vector.shape_cast %259 : vector<8xf32> to vector<8x1xf32>
    %261 = vector.broadcast %260 : vector<8x1xf32> to vector<8x8xf32>
    %262 = arith.subf %258, %261 : vector<8x8xf32>
    %263 = math.exp %262 : vector<8x8xf32>
    %cst_132 = arith.constant dense<0.000000e+00> : vector<8xf32>
    %264 = vector.multi_reduction <add>, %263, %cst_132 [1] : vector<8x8xf32> to vector<8xf32>
    %265 = vector.shape_cast %264 : vector<8xf32> to vector<8x1xf32>
    %266 = tpu.reciprocal %265 {approx = true} : vector<8x1xf32> -> vector<8x1xf32>
    %267 = arith.mulf %265, %266 : vector<8x1xf32>
    %cst_133 = arith.constant 2.000000e+00 : f32
    %268 = vector.broadcast %cst_133 : f32 to vector<8x1xf32>
    %269 = arith.subf %268, %267 : vector<8x1xf32>
    %270 = arith.mulf %266, %269 : vector<8x1xf32>
    %271 = vector.broadcast %270 : vector<8x1xf32> to vector<8x8xf32>
    %272 = arith.mulf %263, %271 : vector<8x8xf32>
    %273 = vector.shape_cast %272 : vector<8x8xf32> to vector<8x8x1xf32>
    %c0_134 = arith.constant 0 : index
    %c0_135 = arith.constant 0 : index
    %c0_136 = arith.constant 0 : index
    %274 = vector.load %arg6[%c0_134, %c0_135, %c0_136] : memref<8x8x128xf32, #tpu.memory_space<vmem>>, vector<8x8x128xf32>
    %275 = vector.broadcast %273 : vector<8x8x1xf32> to vector<8x8x128xf32>
    %276 = arith.mulf %275, %274 : vector<8x8x128xf32>
    %cst_137 = arith.constant dense<0.000000e+00> : vector<8x128xf32>
    %277 = vector.multi_reduction <add>, %276, %cst_137 [1] : vector<8x8x128xf32> to vector<8x128xf32>
    %c0_138 = arith.constant 0 : index
    %c0_139 = arith.constant 0 : index
    %278 = vector.load %arg10[%c0_138, %c0_139] : memref<128x128xf32, #tpu.memory_space<vmem>>, vector<128x128xf32>
    %cst_140 = arith.constant dense<0.000000e+00> : vector<8x128xf32>
    %279 = tpu.matmul %253, %278, %cst_140 {dimension_numbers = #tpu.dot_dimension_numbers<[1], [0], [0], [1], [0, 0, 1, 1], [], []>} : vector<8x128xf32>, vector<128x128xf32>, vector<8x128xf32> -> vector<8x128xf32>
    %280 = arith.addf %277, %279 : vector<8x128xf32>
    %281 = math.tanh %280 : vector<8x128xf32>
    %c3_141 = arith.constant 3 : index
    %c0_142 = arith.constant 0 : index
    %c0_143 = arith.constant 0 : index
    %282 = vector.load %arg11[%c3_141, %c0_142, %c0_143] : memref<4x8x128xf32, #tpu.memory_space<vmem>>, vector<1x8x128xf32>
    %283 = vector.shape_cast %282 : vector<1x8x128xf32> to vector<8x128xf32>
    %284 = vector.shape_cast %281 : vector<8x128xf32> to vector<1x8x128xf32>
    tpu.vector_store %arg11[%c3_141, %c0_142, %c0_143], %284 {strides = array<i32>} : memref<4x8x128xf32, #tpu.memory_space<vmem>>, vector<1x8x128xf32>,
    %c4_i32_144 = arith.constant 4 : i32
    %285 = arith.muli %arg1, %c4_i32_144 : i32
    %c3_i32 = arith.constant 3 : i32
    %286 = arith.addi %285, %c3_i32 : i32
    %c6_i32_145 = arith.constant 6 : i32
    %287 = arith.cmpi slt, %286, %c6_i32_145 : i32
    %288 = arith.select %287, %281, %222 : vector<8x128xf32>
    %c0_146 = arith.constant 0 : index
    %c0_147 = arith.constant 0 : index
    %289 = vector.load %arg14[%c0_146, %c0_147] : memref<8x128xf32, #tpu.memory_space<vmem>>, vector<8x128xf32>
    tpu.vector_store %arg14[%c0_146, %c0_147], %288 {strides = array<i32>} : memref<8x128xf32, #tpu.memory_space<vmem>>, vector<8x128xf32>,
    %290 = arith.select %287, %251, %223 : vector<8x128xf32>
    %c0_148 = arith.constant 0 : index
    %c0_149 = arith.constant 0 : index
    %291 = vector.load %arg15[%c0_148, %c0_149] : memref<8x128xf32, #tpu.memory_space<vmem>>, vector<8x128xf32>
    tpu.vector_store %arg15[%c0_148, %c0_149], %290 {strides = array<i32>} : memref<8x128xf32, #tpu.memory_space<vmem>>, vector<8x128xf32>,
    %c1_i32_150 = arith.constant 1 : i32
    %292 = arith.cmpi eq, %arg1, %c1_i32_150 : i32
    %293 = arith.extui %292 : i1 to i32
    %c0_i32_151 = arith.constant 0 : i32
    %294 = arith.cmpi ne, %293, %c0_i32_151 : i32
    scf.if %294 {
      %c0_152 = arith.constant 0 : index
      %c0_153 = arith.constant 0 : index
      %295 = vector.load %arg14[%c0_152, %c0_153] : memref<8x128xf32, #tpu.memory_space<vmem>>, vector<8x128xf32>
      %c0_154 = arith.constant 0 : index
      %c0_155 = arith.constant 0 : index
      %296 = vector.load %arg12[%c0_154, %c0_155] : memref<8x128xf32, #tpu.memory_space<vmem>>, vector<8x128xf32>
      tpu.vector_store %arg12[%c0_154, %c0_155], %295 {strides = array<i32>} : memref<8x128xf32, #tpu.memory_space<vmem>>, vector<8x128xf32>,
      %c0_156 = arith.constant 0 : index
      %c0_157 = arith.constant 0 : index
      %297 = vector.load %arg15[%c0_156, %c0_157] : memref<8x128xf32, #tpu.memory_space<vmem>>, vector<8x128xf32>
      %c0_158 = arith.constant 0 : index
      %c0_159 = arith.constant 0 : index
      %298 = vector.load %arg13[%c0_158, %c0_159] : memref<8x128xf32, #tpu.memory_space<vmem>>, vector<8x128xf32>
      tpu.vector_store %arg13[%c0_158, %c0_159], %297 {strides = array<i32>} : memref<8x128xf32, #tpu.memory_space<vmem>>, vector<8x128xf32>,
    } else {
    }
    return
  }
  func.func @transform_0(%arg0: i32, %arg1: i32) -> (i32, i32, i32) {
    %c0_i32 = arith.constant 0 : i32
    %c0_i32_0 = arith.constant 0 : i32
    return %arg1, %arg0, %c0_i32 : i32, i32, i32
  }
  func.func @transform_1(%arg0: i32, %arg1: i32) -> (i32, i32) {
    %c0_i32 = arith.constant 0 : i32
    %c0_i32_0 = arith.constant 0 : i32
    return %arg0, %c0_i32 : i32, i32
  }
  func.func @transform_2(%arg0: i32, %arg1: i32) -> (i32, i32) {
    %c0_i32 = arith.constant 0 : i32
    %c0_i32_0 = arith.constant 0 : i32
    return %arg0, %c0_i32 : i32, i32
  }
  func.func @transform_3(%arg0: i32, %arg1: i32) -> (i32, i32, i32) {
    %c0_i32 = arith.constant 0 : i32
    %c0_i32_0 = arith.constant 0 : i32
    %c0_i32_1 = arith.constant 0 : i32
    return %arg0, %c0_i32, %c0_i32_0 : i32, i32, i32
  }
  func.func @transform_4(%arg0: i32, %arg1: i32) -> (i32, i32, i32) {
    %c0_i32 = arith.constant 0 : i32
    %c0_i32_0 = arith.constant 0 : i32
    %c0_i32_1 = arith.constant 0 : i32
    return %arg0, %c0_i32, %c0_i32_0 : i32, i32, i32
  }
  func.func @transform_5(%arg0: i32, %arg1: i32) -> (i32, i32) {
    %c0_i32 = arith.constant 0 : i32
    %c0_i32_0 = arith.constant 0 : i32
    %c0_i32_1 = arith.constant 0 : i32
    return %c0_i32, %c0_i32_0 : i32, i32
  }
  func.func @transform_6(%arg0: i32, %arg1: i32) -> (i32, i32) {
    %c0_i32 = arith.constant 0 : i32
    %c0_i32_0 = arith.constant 0 : i32
    %c0_i32_1 = arith.constant 0 : i32
    return %c0_i32, %c0_i32_0 : i32, i32
  }
  func.func @transform_7(%arg0: i32, %arg1: i32) -> (i32, i32) {
    %c0_i32 = arith.constant 0 : i32
    %c0_i32_0 = arith.constant 0 : i32
    %c0_i32_1 = arith.constant 0 : i32
    return %c0_i32, %c0_i32_0 : i32, i32
  }
  func.func @transform_8(%arg0: i32, %arg1: i32) -> (i32, i32) {
    %c0_i32 = arith.constant 0 : i32
    %c0_i32_0 = arith.constant 0 : i32
    %c0_i32_1 = arith.constant 0 : i32
    return %c0_i32, %c0_i32_0 : i32, i32
  }
  func.func @transform_9(%arg0: i32, %arg1: i32) -> (i32, i32, i32) {
    %c0_i32 = arith.constant 0 : i32
    %c0_i32_0 = arith.constant 0 : i32
    return %arg1, %arg0, %c0_i32 : i32, i32, i32
  }
  func.func @transform_10(%arg0: i32, %arg1: i32) -> (i32, i32) {
    %c0_i32 = arith.constant 0 : i32
    %c0_i32_0 = arith.constant 0 : i32
    return %arg0, %c0_i32 : i32, i32
  }
  func.func @transform_11(%arg0: i32, %arg1: i32) -> (i32, i32) {
    %c0_i32 = arith.constant 0 : i32
    %c0_i32_0 = arith.constant 0 : i32
    return %arg0, %c0_i32 : i32, i32
  }
}

</mosaic_0001>

<bundles_post_ra>
// kernel: tpu_custom_call.1
= control target key start
LH: loop header
LB: loop body
LE: loop exit
PB: predicated region body
PF: predicated region fallthrough
CT: control target
= control target key end

     0   :  { %s7310_s0 = inlined_call_operand.hbm [shape: f32[8,8,128], index: 0, kind: input, shape index: {}]   ;;  %s7311_s1 = inlined_call_operand.hbm [shape: f32[8,128], index: 1, kind: input, shape index: {}]   ;;  %s7312_s2 = inlined_call_operand.hbm [shape: f32[8,128], index: 2, kind: input, shape index: {}]   ;;  %s7313_s3 = inlined_call_operand.hbm [shape: f32[8,8,128], index: 3, kind: input, shape index: {}]   ;;  %s7314_s4 = inlined_call_operand.hbm [shape: f32[8,8,128], index: 4, kind: input, shape index: {}]   ;;  %s7315_s5 = inlined_call_operand.hbm [shape: f32[128,512], index: 5, kind: input, shape index: {}]   ;;  %s7316_s6 = inlined_call_operand.hbm [shape: f32[128,512], index: 6, kind: input, shape index: {}]   ;;  %s7317_s7 = inlined_call_operand.vmem [shape: f32[1,512], index: 7, kind: input, shape index: {}]   ;;  %s7318_s8 = inlined_call_operand.hbm [shape: f32[128,128], index: 8, kind: input, shape index: {}]   ;;  %s7319_s9 = inlined_call_operand.hbm [shape: f32[8,8,128], index: 9, kind: output, shape index: {0}]   ;;  %s7320_s10 = inlined_call_operand.hbm [shape: f32[8,128], index: 10, kind: output, shape index: {1}]   ;;  %s7321_s11 = inlined_call_operand.hbm [shape: f32[8,128], index: 11, kind: output, shape index: {2}]  }
   0x1   :  { %7338 = sst [smem:[#allocation31_spill]] %s7311_s1 }
   0x2   :  { %7339 = sst [smem:[#allocation32_spill]] %s7312_s2 }
   0x3   :  { %7340 = sst [smem:[#allocation33_spill]] %s7313_s3 }
   0x4   :  { %7341 = sst [smem:[#allocation34_spill]] %s7317_s7 }
   0x5   :  { %7342 = sst [smem:[#allocation35_spill]] %s7319_s9 }
   0x6   :  { %7343 = sst [smem:[#allocation36_spill]] %s7320_s10 }
   0x7   :  { %7344 = sst [smem:[#allocation37_spill]] %s7321_s11 }
   0x8   :  { %17 = vsyncpa [#allocation6], 0 }
   0x9   :  { %19 = vsyncpa [#allocation6 + $0x1], 0 }
   0xa   :  { %20 = vsyncpa [#allocation9], 0 }
   0xb   :  { %21 = vsyncpa [#allocation12], 0 }
   0xc   :  { %22 = vsyncpa [#allocation15], 0 }
   0xd   :  { %23 = vsyncpa [#allocation18], 0 }
   0xe   :  { %24 = vsyncpa [#allocation7], 0 }
   0xf   :  { %26 = vsyncpa [#allocation7 + $0x1], 0 }
  0x10   :  { %27 = vsyncpa [#allocation21], 0  ;;  %s6265_s17 = smov 0   ;;  %s6267_s18 = smov 0  }
  0x11   :  { %s6269_s19 = smov 0   ;;  %s6271_s20 = smov 0  }
  0x12   :  { %s6273_s21 = smov 0   ;;  %s6275_s22 = smov 0  }
  0x13 LB: > { %7345 = sst [smem:[#allocation30_spill]] %s6173_s20  ;;  %s7322_s23 = sadd.s32 4294967295, %s6181_s22   ;;  %s6181_s22 = sphi %s6275_s22, %s33_s22   ;;  %s6177_s21 = sphi %s6273_s21, %s7384_s21   ;;  %s6173_s20 = sphi %s6271_s20, %s7383_s20   ;;  %s6169_s19 = sphi %s6269_s19, %s7382_s19   ;;  %s6165_s18 = sphi %s6267_s18, %s7381_s18   ;;  %s6161_s17 = sphi %s6265_s17, %s7380_s17  }
  0x14   : > { %p4732_p0 = scmp.ge.s32.totalorder %s6181_s22, 1  ;;  %p6299_p1 = scmp.eq.s32.totalorder %s7322_s23, 0 }
  0x15   : > { %p346_p2 = scmp.lt.s32.totalorder %s6181_s22, 3  ;;  %s6183_s26 = smov [#allocation8]  }
  0x16   : > { %s7346_s24 = scalar_select %p6299_p1, 1, 0 }
  0x17   : > { %p6304_p3 = pnand %p4732_p0, %p346_p2  ;;  %s361_s27 = sshll.u32 %s6183_s26, 4  ;;  %s362_s27 = int_to_ptr.vmem [resolvable:$true] %s361_s27 }
  0x18   : > { %s6184_s28 = smov [#allocation11]   ;;  %s6185_s12 = smov [#allocation14]  }
  0x19   : > { %s7347_s25 = scalar_select %p6304_p3, 1, 0 }
  0x1a   : > { %p5479_p5 = pneg %p6304_p3  ;;  %s387_s29 = sshll.u32 %s6184_s28, 4  ;;  %s6317_s29 = int_to_ptr.vmem [resolvable:$true] %s387_s29 }
  0x1b   : > { %s6319_s13 = sshll.u32 %s6185_s12, 4  ;;  %s7349_s1 = sld [smem:[#allocation31_spill]]  ;;  %s417_s13 = int_to_ptr.vmem [resolvable:$true] %s6319_s13 }
  0x1c   : > { %p6313_p6 = pnand %p5479_p5, %p6299_p1 }
  0x1e   : > { %p6329_p8 = pneg %p6313_p6 }
  0x21   : > { %s5801_s16 = scalar_lea.hbm %s7349_s1, 128 }
  0x22   : > { %p5802_p7 = scmp.ne.s32.totalorder %s7349_s1, %s5801_s16  ;;  %p5808_p11 = scmp.lt.u32.totalorder %s5801_s16, %s7349_s1 }
  0x24   : > { %p5804_p9 = pnand %p6329_p8, %p5802_p7 }
  0x26   : > { %p5805_p10 = pneg %p5804_p9 }
  0x28   : > { %p5810_p12 = pnand %p5808_p11, %p5805_p10 }
  0x2a   : > { %5813 = shalt.err (!%p5810_p12)
}
  0x2b   : > { %s5814_s14 = scalar_lea.vmem %s362_s27, 128  ;;  %p5822_p5 = scmp.lt.s32.totalorder %s362_s27, %s362_s27 }
  0x2c   : > { %p5815_p13 = scmp.ne.s32.totalorder %s362_s27, %s5814_s14  ;;  %p5823_p4 = scmp.lt.s32.totalorder %s5814_s14, %s5814_s14 }
  0x2e   : > { %p5817_p0 = pnand %p5815_p13, %p6329_p8  ;;  %p5824_p3 = por %p5823_p4, %p5822_p5 }
  0x30   : > { %p5818_p2 = pneg %p5817_p0 }
  0x32   : > { %p5825_p1 = pnand %p5824_p3, %p5818_p2 }
  0x34   : > { %5828 = shalt.err (!%p5825_p1)
}
  0x35   : > { %5482 = dma.hbm_to_vmem [thread:$0]  (!%p6313_p6), %s7349_s1, 128, %s362_s27, [#allocation9]  }
  0x36   : > { %s7351_s3 = sld [smem:[#allocation33_spill]] }
  0x3c   : > { %s5829_s26 = scalar_lea.hbm %s7351_s3, 1024 }
  0x3d   : > { %p5830_p7 = scmp.ne.s32.totalorder %s7351_s3, %s5829_s26  ;;  %p5836_p1 = scmp.lt.u32.totalorder %s5829_s26, %s7351_s3 }
  0x3f   : > { %p5832_p9 = pnand %p5830_p7, %p6329_p8 }
  0x41   : > { %p5833_p4 = pneg %p5832_p9 }
  0x43   : > { %p5838_p3 = pnand %p5836_p1, %p5833_p4 }
  0x45   : > { %5841 = shalt.err (!%p5838_p3)
}
  0x46   : > { %s5842_s27 = scalar_lea.vmem %s6317_s29, 1024  ;;  %p5850_p13 = scmp.lt.s32.totalorder %s6317_s29, %s6317_s29 }
  0x47   : > { %p5843_p10 = scmp.ne.s32.totalorder %s6317_s29, %s5842_s27  ;;  %p5851_p0 = scmp.lt.s32.totalorder %s5842_s27, %s5842_s27 }
  0x49   : > { %p5845_p11 = pnand %p5843_p10, %p6329_p8  ;;  %p5852_p2 = por %p5851_p0, %p5850_p13 }
  0x4b   : > { %p5846_p12 = pneg %p5845_p11 }
  0x4d   : > { %p5853_p5 = pnand %p5852_p2, %p5846_p12 }
  0x4f   : > { %5856 = shalt.err (!%p5853_p5)
}
  0x50   : > { %s7329_s9 = smov 128   ;;  %s7331_s10 = smov 8  }
  0x51   : > { %5488 = dma.hbm_to_vmem [thread:$0]  (!%p6313_p6), %s7351_s3, 1024, %s6317_s29, [#allocation12], %s7329_s9, %s7329_s9, %s7331_s10  }
  0x52   : > { %s5857_s26 = scalar_lea.hbm %s7315_s5, 8192 }
  0x53   : > { %p5858_p7 = scmp.ne.s32.totalorder %s7315_s5, %s5857_s26  ;;  %p5864_p1 = scmp.lt.u32.totalorder %s5857_s26, %s7315_s5 }
  0x55   : > { %p5860_p9 = pnand %p5858_p7, %p6329_p8 }
  0x57   : > { %p5861_p4 = pneg %p5860_p9 }
  0x59   : > { %p5866_p3 = pnand %p5864_p1, %p5861_p4 }
  0x5b   : > { %5869 = shalt.err (!%p5866_p3)
}
  0x5c   : > { %s5870_s23 = scalar_lea.vmem %s417_s13, 8192  ;;  %p5878_p13 = scmp.lt.s32.totalorder %s417_s13, %s417_s13 }
  0x5d   : > { %p5871_p10 = scmp.ne.s32.totalorder %s417_s13, %s5870_s23  ;;  %p5879_p0 = scmp.lt.s32.totalorder %s5870_s23, %s5870_s23 }
  0x5f   : > { %p5873_p11 = pnand %p5871_p10, %p6329_p8  ;;  %p5880_p2 = por %p5879_p0, %p5878_p13 }
  0x61   : > { %p5874_p12 = pneg %p5873_p11 }
  0x63   : > { %p5881_p5 = pnand %p5880_p2, %p5874_p12 }
  0x65   : > { %5884 = shalt.err (!%p5881_p5)
}
  0x66   : > { %s7334_s29 = smov 512   ;;  %s6189_s15 = smov 32  }
  0x67   : > { %5494 = dma.hbm_to_vmem [thread:$0]  (!%p6313_p6), %s7315_s5, 8192, %s417_s13, [#allocation15], %s7334_s29, %s7334_s29, %s6189_s15  }
  0x68   : > { %s6190_s16 = smov [#allocation10]   ;;  %s6191_s12 = smov [#allocation13]  }
  0x69   : > { %s374_s26 = sshll.u32 %s6190_s16, 4  ;;  %s403_s14 = sshll.u32 %s6191_s12, 4  ;;  %s375_s26 = int_to_ptr.vmem [resolvable:$true] %s374_s26  ;;  %s404_s14 = int_to_ptr.vmem [resolvable:$true] %s403_s14 }
  0x6a   : > { %s7352_s2 = sld [smem:[#allocation32_spill]] }
  0x70   : > { %s5885_s9 = scalar_lea.hbm %s7352_s2, 128 }
  0x71   : > { %p5886_p7 = scmp.ne.s32.totalorder %s7352_s2, %s5885_s9  ;;  %p5892_p1 = scmp.lt.u32.totalorder %s5885_s9, %s7352_s2 }
  0x73   : > { %p5888_p9 = pnand %p5886_p7, %p6329_p8 }
  0x75   : > { %p5889_p4 = pneg %p5888_p9 }
  0x77   : > { %p5894_p3 = pnand %p5892_p1, %p5889_p4 }
  0x79   : > { %5897 = shalt.err (!%p5894_p3)
}
  0x7a   : > { %s5898_s13 = scalar_lea.vmem %s375_s26, 128  ;;  %p5906_p13 = scmp.lt.s32.totalorder %s375_s26, %s375_s26 }
  0x7b   : > { %p5899_p10 = scmp.ne.s32.totalorder %s375_s26, %s5898_s13  ;;  %p5907_p0 = scmp.lt.s32.totalorder %s5898_s13, %s5898_s13 }
  0x7d   : > { %p5901_p11 = pnand %p5899_p10, %p6329_p8  ;;  %p5908_p2 = por %p5907_p0, %p5906_p13 }
  0x7f   : > { %p5902_p12 = pneg %p5901_p11 }
  0x81   : > { %p5909_p5 = pnand %p5908_p2, %p5902_p12 }
  0x83   : > { %5912 = shalt.err (!%p5909_p5)
}
  0x84   : > { %5485 = dma.hbm_to_vmem [thread:$0]  (!%p6313_p6), %s7352_s2, 128, %s375_s26, [#allocation9]  }
  0x85   : > { %s5913_s9 = scalar_lea.hbm %s7314_s4, 1024 }
  0x86   : > { %p5914_p7 = scmp.ne.s32.totalorder %s7314_s4, %s5913_s9  ;;  %p5920_p1 = scmp.lt.u32.totalorder %s5913_s9, %s7314_s4 }
  0x88   : > { %p5916_p9 = pnand %p5914_p7, %p6329_p8 }
  0x8a   : > { %p5917_p4 = pneg %p5916_p9 }
  0x8c   : > { %p5922_p3 = pnand %p5920_p1, %p5917_p4 }
  0x8e   : > { %5925 = shalt.err (!%p5922_p3)
}
  0x8f   : > { %s5926_s27 = scalar_lea.vmem %s404_s14, 1024  ;;  %p5934_p13 = scmp.lt.s32.totalorder %s404_s14, %s404_s14 }
  0x90   : > { %p5927_p10 = scmp.ne.s32.totalorder %s404_s14, %s5926_s27  ;;  %p5935_p0 = scmp.lt.s32.totalorder %s5926_s27, %s5926_s27 }
  0x92   : > { %p5929_p11 = pnand %p5927_p10, %p6329_p8  ;;  %p5936_p2 = por %p5935_p0, %p5934_p13 }
  0x94   : > { %p5930_p12 = pneg %p5929_p11 }
  0x96   : > { %p5937_p5 = pnand %p5936_p2, %p5930_p12 }
  0x98   : > { %5940 = shalt.err (!%p5937_p5)
}
  0x99   : > { %s7353_s26 = smov 8   ;;  %s7354_s23 = smov 128  }
  0x9a   : > { %5491 = dma.hbm_to_vmem [thread:$0]  (!%p6313_p6), %s7314_s4, 1024, %s404_s14, [#allocation12], %s7354_s23, %s7354_s23, %s7353_s26  }
  0x9b   : > { %s6192_s10 = smov [#allocation16]   ;;  %s6193_s20 = smov [#allocation17]  }
  0x9c   : > { %s429_s7 = sshll.u32 %s6192_s10, 4  ;;  %s445_s9 = sshll.u32 %s6193_s20, 4  ;;  %s430_s7 = int_to_ptr.vmem [resolvable:$true] %s429_s7  ;;  %s446_s9 = int_to_ptr.vmem [resolvable:$true] %s445_s9 }
  0x9d   : > { %s5941_s16 = scalar_lea.hbm %s7316_s6, 8192 }
  0x9e   : > { %p5942_p7 = scmp.ne.s32.totalorder %s7316_s6, %s5941_s16  ;;  %p5948_p1 = scmp.lt.u32.totalorder %s5941_s16, %s7316_s6 }
  0xa0   : > { %p5944_p9 = pnand %p5942_p7, %p6329_p8 }
  0xa2   : > { %p5945_p4 = pneg %p5944_p9 }
  0xa4   : > { %p5950_p3 = pnand %p5948_p1, %p5945_p4 }
  0xa6   : > { %5953 = shalt.err (!%p5950_p3)
}
  0xa7   : > { %s5954_s14 = scalar_lea.vmem %s430_s7, 8192  ;;  %p5962_p13 = scmp.lt.s32.totalorder %s430_s7, %s430_s7 }
  0xa8   : > { %p5955_p10 = scmp.ne.s32.totalorder %s430_s7, %s5954_s14  ;;  %p5963_p0 = scmp.lt.s32.totalorder %s5954_s14, %s5954_s14 }
  0xaa   : > { %p5957_p11 = pnand %p5955_p10, %p6329_p8  ;;  %p5964_p2 = por %p5963_p0, %p5962_p13 }
  0xac   : > { %p5958_p12 = pneg %p5957_p11 }
  0xae   : > { %p5965_p5 = pnand %p5964_p2, %p5958_p12 }
  0xb0   : > { %5968 = shalt.err (!%p5965_p5)
}
  0xb1   : > { %s7355_s3 = smov 512   ;;  %s5969_s11 = scalar_lea.hbm %s7318_s8, 2048 }
  0xb2   : > { %5497 = dma.hbm_to_vmem [thread:$0]  (!%p6313_p6), %s7316_s6, 8192, %s430_s7, [#allocation15], %s7355_s3, %s7355_s3, %s6189_s15  }
  0xb3   : > { %p5970_p7 = scmp.ne.s32.totalorder %s7318_s8, %s5969_s11  ;;  %p5976_p1 = scmp.lt.u32.totalorder %s5969_s11, %s7318_s8 }
  0xb5   : > { %p5972_p9 = pnand %p5970_p7, %p6329_p8 }
  0xb7   : > { %p5973_p4 = pneg %p5972_p9 }
  0xb9   : > { %p5978_p3 = pnand %p5976_p1, %p5973_p4 }
  0xbb   : > { %5981 = shalt.err (!%p5978_p3)
}
  0xbc   : > { %s5982_s14 = scalar_lea.vmem %s446_s9, 2048  ;;  %p5990_p13 = scmp.lt.s32.totalorder %s446_s9, %s446_s9 }
  0xbd   : > { %p5983_p10 = scmp.ne.s32.totalorder %s446_s9, %s5982_s14  ;;  %p5991_p0 = scmp.lt.s32.totalorder %s5982_s14, %s5982_s14 }
  0xbf   : > { %p5985_p11 = pnand %p5983_p10, %p6329_p8  ;;  %p5992_p2 = por %p5991_p0, %p5990_p13 }
  0xc1   : > { %p5986_p12 = pneg %p5985_p11 }
  0xc3   : > { %p5993_p5 = pnand %p5992_p2, %p5986_p12 }
  0xc5   : > { %5996 = shalt.err (!%p5993_p5)
}
  0xc6   : > { %5500 = dma.hbm_to_vmem [thread:$0]  (!%p6313_p6), %s7318_s8, 2048, %s446_s9, [#allocation18], %s7354_s23, %s7354_s23, %s7353_s26  }
  0xc7   : > { %s4731_s30 = sadd.s32 4294967294, %s6181_s22   ;;  %s42_s28 = sadd.s32 1, %s6177_s21 }
  0xc8   : > { %s54_s3 = sadd.s32 1, %s6169_s19  ;;  %p43_p8 = scmp.ge.s32.totalorder %s42_s28, 2 }
  0xc9   : > { %p61_p7 = scmp.ne.s32.totalorder %s6169_s19, %s6165_s18  ;;  %p62_p9 = scmp.eq.s32.totalorder %s6181_s22, 0 }
  0xca   : > { %p67_p4 = scmp.ne.s32.totalorder %s6165_s18, %s6161_s17  ;;  %s7386_s28 = smov (%p43_p8, %s42_s28), 0 }
  0xcb   : > { %p6484_p1 = por %p62_p9, %p61_p7  ;;  %p7357_p3 = scmp.ne.s32.totalorder %s7346_s24, 0 }
  0xcc   : > { %s49_s10 = ssub.s32 %s6177_s21, %s7386_s28  ;;  %s7359_s20 = sadd.s32 4294967295, %s6181_s22  }
  0xcd   : > { %p6490_p6 = por %p7357_p3, %p67_p4  ;;  %p6498_p10 = scmp.eq.s32.totalorder %s7359_s20, 1 }
  0xce   : > { %p52_p11 = scmp.eq.s32.totalorder %s49_s10, 0  ;;  %p287_p12 = scmp.eq.s32.totalorder %s4731_s30, 1 }
  0xcf   : > { %s7360_s1 = scalar_select %p6498_p10, 1, 0 }
  0xd0   : > { %p6504_p13 = por %p6498_p10, %p61_p7  ;;  %p5516_p0 = scmp.lt.s32.totalorder %s6181_s22, 2 }
  0xd1   : > { %s6510_s16 = scalar_select %p52_p11, %s6169_s19, %s54_s3  }
  0xd2   : > { %s7361_s11 = scalar_select %p6504_p13, 1, 0 }
  0xd3   : > { %p6512_p2 = por %p287_p12, %p67_p4  ;;  %s459_s27 = sand.u32 1, %s6169_s19  }
  0xd4   : > { %s4741_s13 = sshll.u32 %s459_s27, 5  ;;  %s4781_s14 = sshll.u32 %s6177_s21, 9 }
  0xd5   : > { %s7362_s12 = scalar_select %p6512_p2, 1, 0 }
  0xd6   : > { %s6521_s10 = scalar_lea.hbm %s7310_s0, %s4781_s14  ;;  %s463_s30 = scalar_lea.vmem [#allocation5], %s4741_s13 }
  0xd7   : > { %s471_s20 = sshll.u32 %s463_s30, 4  ;;  %p6527_p5 = pnand %p5516_p0, %p6484_p1  ;;  %s6523_s20 = int_to_ptr.vmem [resolvable:$true] %s471_s20 }
  0xd8   : > { %s6531_s2 = scalar_lea.sflag [#allocation6], %s459_s27  ;;  %s5997_s15 = scalar_lea.hbm %s6521_s10, 512 }
  0xd9   : > { %p5998_p8 = scmp.ne.s32.totalorder %s6521_s10, %s5997_s15  ;;  %p5999_p7 = pneg %p6527_p5 }
  0xda   : > { %s6002_s29 = scalar_lea.hbm %s7310_s0, 1024  ;;  %p6003_p1 = scmp.lt.u32.totalorder %s6521_s10, %s7310_s0 }
  0xdb   : > { %p6000_p9 = pnand %p5999_p7, %p5998_p8  ;;  %p6004_p3 = scmp.lt.u32.totalorder %s6002_s29, %s5997_s15 }
  0xdc   : > { %p6006_p12 = scmp.lt.u32.totalorder %s5997_s15, %s6521_s10 }
  0xdd   : > { %p6001_p4 = pneg %p6000_p9  ;;  %p6005_p11 = por %p6004_p3, %p6003_p1 }
  0xdf   : > { %p6007_p0 = por %p6006_p12, %p6005_p11 }
  0xe1   : > { %p6008_p2 = pnand %p6007_p0, %p6001_p4 }
  0xe3   : > { %6011 = shalt.err (!%p6008_p2)
}
  0xe4   : > { %s6012_s27 = scalar_lea.vmem %s6523_s20, 512  ;;  %s6194_s13 = smov [#allocation5]  }
  0xe5   : > { %p6013_p8 = scmp.ne.s32.totalorder %s6523_s20, %s6012_s27  ;;  %s6017_s14 = sshll.u32 %s6194_s13, 4  ;;  %s6018_s14 = int_to_ptr.vmem [resolvable:$false] %s6017_s14 }
  0xe6   : > { %s6019_s7 = scalar_lea.vmem %s6018_s14, 1024  ;;  %p6020_p10 = scmp.lt.s32.totalorder %s6523_s20, %s6018_s14 }
  0xe7   : > { %p6015_p9 = pnand %p6013_p8, %p5999_p7  ;;  %p6021_p1 = scmp.lt.s32.totalorder %s6019_s7, %s6012_s27 }
  0xe9   : > { %p6016_p13 = pneg %p6015_p9  ;;  %p6022_p3 = por %p6021_p1, %p6020_p10 }
  0xeb   : > { %p6023_p11 = pnand %p6022_p3, %p6016_p13 }
  0xed   : > { %6026 = shalt.err (!%p6023_p11)
}
  0xee   : > { %5504 = dma.hbm_to_vmem [thread:$0]  (!%p6527_p5), %s6521_s10, 512, %s6523_s20, %s6531_s2, %s7354_s23, %s7354_s23, %s7353_s26  }
  0xef   : > { %p7364_p2 = scmp.ne.s32.totalorder %s7347_s25, 0 }
  0xf0   : > { %s6565_s15 = sand.u32 (!%p7364_p2), 1, %s6165_s18  }
  0xf1   : > { %483 = sbr.rel (%p7364_p2) target bundleno = 4801 (0x12c1), region = 56  ;;  %s4745_s29 = sshll.u32 (!%p7364_p2), %s6565_s15, 5 }
  0xf2   : > { %s486_s30 = scalar_lea.sflag (!%p7364_p2), [#allocation6], %s6565_s15  ;;  %s6569_s27 = scalar_lea.vmem (!%p7364_p2), [#allocation5], %s4745_s29 }
  0xf8   : > { %6132 = dma.done.wait (%p6490_p6), %s486_s30, 512  }
  0xf9   : > { %6134 = vsyncadd (%p6490_p6), %s486_s30, 4294966784  ;;  %p7365_p10 = scmp.ne.s32.totalorder %s7346_s24, 0 }
  0xfb   : > { %6136 = dma.done.wait (%p7365_p10), [#allocation9], 256  }
  0xfc   : > { %6138 = vsyncadd (%p7365_p10), [#allocation9], 4294967040 }
  0xfd   : > { %6140 = dma.done.wait (%p7365_p10), [#allocation12], 2048  }
  0xfe   : > { %6142 = vsyncadd (%p7365_p10), [#allocation12], 4294965248 }
  0xff   : > { %6144 = dma.done.wait (%p7365_p10), [#allocation15], 16384  }
 0x100   : > { %6146 = vsyncadd (%p7365_p10), [#allocation15], 4294950912 }
 0x101   : > { %6148 = dma.done.wait (%p7365_p10), [#allocation18], 2048  }
 0x102   : > { %6150 = vsyncadd (%p7365_p10), [#allocation18], 4294965248  ;;  %s6591_s2 = scalar_lea.vmem [#allocation19], %s4745_s29  ;;  %s7366_s25 = sld [smem:[#allocation30_spill]] }
 0x108   : > { %p4754_p6 = scmp.ne.s32.totalorder %s7366_s25, 0 }
 0x109   : > { %v564_v0 = vld [vmem:[#allocation8] sm:$0xff] (!%p4754_p6)  ;;  %v566_v1 = vld [vmem:[#allocation10] sm:$0xff] (!%p4754_p6) }
 0x10a   : > { %563 = sbr.rel (%p4754_p6) target bundleno = 273 (0x111), region = 92  ;;  %565 = vst [vmem:[#allocation2] sm:$0xff] (!%p4754_p6), %v564_v0  ;;  %567 = vst [vmem:[#allocation3] sm:$0xff] (!%p4754_p6), %v566_v1 }
 0x111 PF: > { %v573_v2 = vld [vmem:[#allocation14 + $0x8] sm:$0xff]  ;;  %v575_v4 = vld [vmem:[#allocation14 + $0x18] sm:$0xff]  ;;  %v572_v7 = vld [vmem:[#allocation14] sm:$0xff]  ;;  %v6195_v9 = vmov 0.0   ;;  %vm6197_vm0 = vmmov 0   ;;  %s7367_s23 = sld [smem:[#allocation34_spill]] }
 0x112   : > { %v577_v3 = vld [vmem:[#allocation14 + $0x28] sm:$0xff]  ;;  %v579_v6 = vld [vmem:[#allocation14 + $0x38] sm:$0xff]  ;;  %v576_v8 = vld [vmem:[#allocation14 + $0x20] sm:$0xff]  ;;  %722 = vmatprep.mubr.f32.mxu0 %v6195_v9  ;;  %811 = vmatprep.mubr.f32.mxu1 %v6195_v9  ;;  %s7368_s9 = sld [smem:[#allocation30_spill]]  ;;  %vm1256_vm2 = vcmask 1041409   ;;  %vm1258_vm3 = vcmask 1042434  }
 0x113   : > { %v4991_v5 = vpack.c.bf16 %v577_v3, %v573_v2  ;;  %v5023_v10 = vpack.c.bf16 %v579_v6, %v575_v4  ;;  %v4993_v11 = vpack.c.bf16 %v576_v8, %v572_v7  ;;  %v574_v12 = vld [vmem:[#allocation14 + $0x10] sm:$0xff]  ;;  %v581_v14 = vld [vmem:[#allocation14 + $0x48] sm:$0xff]  ;;  %v583_v17 = vld [vmem:[#allocation14 + $0x58] sm:$0xff]  ;;  %vm1260_vm4 = vcmask 1043459  }
 0x114   : > { %v578_v13 = vld [vmem:[#allocation14 + $0x30] sm:$0xff]  ;;  %v585_v16 = vld [vmem:[#allocation14 + $0x68] sm:$0xff]  ;;  %v587_v18 = vld [vmem:[#allocation14 + $0x78] sm:$0xff]  ;;  %vm1262_vm5 = vcmask 1044484   ;;  %vm1264_vm6 = vcmask 1045509   ;;  %vm1266_vm7 = vcmask 1046534  }
 0x115   : > { %4992 = vmatprep.subr.bf16.mxu0 %v4991_v5  ;;  %v5025_v15 = vpack.c.bf16 %v578_v13, %v574_v12  ;;  %5024 = vmatprep.subr.bf16.mxu1 %v5023_v10  ;;  %v4995_v19 = vpack.c.bf16 %v585_v16, %v581_v14  ;;  %v5027_v20 = vpack.c.bf16 %v587_v18, %v583_v17  ;;  %v580_v21 = vld [vmem:[#allocation14 + $0x40] sm:$0xff]  ;;  %v582_v23 = vld [vmem:[#allocation14 + $0x50] sm:$0xff]  ;;  %v589_v26 = vld [vmem:[#allocation14 + $0x88] sm:$0xff]  ;;  %vm1268_vm8 = vcmask 1047559  }
 0x116   : > { %4994 = vmatpush1.bf16.msra.mxu0 %v4993_v11  ;;  %v584_v22 = vld [vmem:[#allocation14 + $0x60] sm:$0xff]  ;;  %v586_v25 = vld [vmem:[#allocation14 + $0x70] sm:$0xff]  ;;  %v593_v27 = vld [vmem:[#allocation14 + $0xa8] sm:$0xff]  ;;  %vm1271_vm9 = vcmask 64512  }
 0x117   : > { %5026 = vmatpush1.bf16.msra.mxu1 %v5025_v15  ;;  %v4997_v24 = vpack.c.bf16 %v584_v22, %v580_v21  ;;  %4996 = vmatprep.subr.bf16.mxu0 %v4995_v19  ;;  %v5029_v28 = vpack.c.bf16 %v586_v25, %v582_v23  ;;  %v4999_v29 = vpack.c.bf16 %v593_v27, %v589_v26  ;;  %v591_v30 = vld [vmem:[#allocation14 + $0x98] sm:$0xff]  ;;  %v588_v32 = vld [vmem:[#allocation14 + $0x80] sm:$0xff]  ;;  %v590_v35 = vld [vmem:[#allocation14 + $0x90] sm:$0xff] }
 0x118   : > { %5028 = vmatprep.subr.bf16.mxu1 %v5027_v20  ;;  %v595_v31 = vld [vmem:[#allocation14 + $0xb8] sm:$0xff]  ;;  %v592_v34 = vld [vmem:[#allocation14 + $0xa0] sm:$0xff]  ;;  %v594_v36 = vld [vmem:[#allocation14 + $0xb0] sm:$0xff]  ;;  %s6654_s10 = sshll.u32 %s7368_s9, 2  ;;  %p4771_p12 = scmp.ne.s32.totalorder %s7368_s9, 1 }
 0x119   : > { %v5031_v33 = vpack.c.bf16 %v595_v31, %v591_v30  ;;  %v5001_v37 = vpack.c.bf16 %v592_v34, %v588_v32  ;;  %v597_v38 = vld [vmem:[#allocation14 + $0xc8] sm:$0xff]  ;;  %v599_v40 = vld [vmem:[#allocation14 + $0xd8] sm:$0xff]  ;;  %v5033_v41 = vpack.c.bf16 %v594_v36, %v590_v35  ;;  %v596_v44 = vld [vmem:[#allocation14 + $0xc0] sm:$0xff]  ;;  %p1715_p13 = scmp.lt.s32.totalorder %s6654_s10, 6  ;;  %s2623_s3 = sadd.s32 1, %s6654_s10 }
 0x11a   : > { %4998 = vmatpush1.bf16.msra.mxu0 %v4997_v24  ;;  %v601_v39 = vld [vmem:[#allocation14 + $0xe8] sm:$0xff]  ;;  %v603_v43 = vld [vmem:[#allocation14 + $0xf8] sm:$0xff]  ;;  %v600_v45 = vld [vmem:[#allocation14 + $0xe0] sm:$0xff]  ;;  %p6885_p5 = scmp.lt.s32.totalorder %s2623_s3, 6  ;;  %s3532_s7 = sadd.s32 2, %s6654_s10 }
 0x11b   : > { %5030 = vmatpush1.bf16.msra.mxu1 %v5029_v28  ;;  %5000 = vmatprep.subr.bf16.mxu0 %v4999_v29  ;;  %v5003_v42 = vpack.c.bf16 %v601_v39, %v597_v38  ;;  %v5035_v46 = vpack.c.bf16 %v603_v43, %v599_v40  ;;  %v598_v47 = vld [vmem:[#allocation14 + $0xd0] sm:$0xff]  ;;  %v605_v49 = vld [vmem:[#allocation14 + $0x108] sm:$0xff]  ;;  %v607_v51 = vld [vmem:[#allocation14 + $0x118] sm:$0xff]  ;;  %v5005_v53 = vpack.c.bf16 %v600_v45, %v596_v44  ;;  %s1716_s20 = scalar_select %p1715_p13, 1, 0 }
 0x11c   : > { %5032 = vmatprep.subr.bf16.mxu1 %v5031_v33  ;;  %v602_v48 = vld [vmem:[#allocation14 + $0xf0] sm:$0xff]  ;;  %v609_v50 = vld [vmem:[#allocation14 + $0x128] sm:$0xff]  ;;  %v611_v52 = vld [vmem:[#allocation14 + $0x138] sm:$0xff]  ;;  %s2625_s14 = scalar_select %p6885_p5, 1, 0 }
 0x11d   : > { %v5037_v54 = vpack.c.bf16 %v602_v48, %v598_v47  ;;  %v5007_v55 = vpack.c.bf16 %v609_v50, %v605_v49  ;;  %v604_v56 = vld [vmem:[#allocation14 + $0x100] sm:$0xff]  ;;  %v606_v58 = vld [vmem:[#allocation14 + $0x110] sm:$0xff]  ;;  %v5039_v59 = vpack.c.bf16 %v611_v52, %v607_v51  ;;  %v613_v61 = vld [vmem:[#allocation14 + $0x148] sm:$0xff]  ;;  %p3533_p7 = scmp.lt.s32.totalorder %s3532_s7, 6  ;;  %s4441_s30 = sadd.s32 3, %s6654_s10 }
 0x11e   : > { %5002 = vmatpush1.bf16.msra.mxu0 %v5001_v37  ;;  %v608_v57 = vld [vmem:[#allocation14 + $0x120] sm:$0xff]  ;;  %v610_v60 = vld [vmem:[#allocation14 + $0x130] sm:$0xff]  ;;  %v617_v62 = vld [vmem:[#allocation14 + $0x168] sm:$0xff]  ;;  %p4442_p4 = scmp.lt.s32.totalorder %s4441_s30, 6 }
 0x11f   : > { %5034 = vmatpush1.bf16.msra.mxu1 %v5033_v41  ;;  %5004 = vmatprep.subr.bf16.mxu0 %v5003_v42  ;;  %v615_v63 = vld [vmem:[#allocation14 + $0x158] sm:$0xff]  ;;  %v5009_v1 = vpack.c.bf16 %v608_v57, %v604_v56  ;;  %v5041_v2 = vpack.c.bf16 %v610_v60, %v606_v58  ;;  %v5011_v3 = vpack.c.bf16 %v617_v62, %v613_v61  ;;  %v612_v4 = vld [vmem:[#allocation14 + $0x140] sm:$0xff]  ;;  %v614_v6 = vld [vmem:[#allocation14 + $0x150] sm:$0xff]  ;;  %s3534_s29 = scalar_select %p3533_p7, 1, 0 }
 0x120   : > { %5036 = vmatprep.subr.bf16.mxu1 %v5035_v46  ;;  %v619_v0 = vld [vmem:[#allocation14 + $0x178] sm:$0xff]  ;;  %v616_v5 = vld [vmem:[#allocation14 + $0x160] sm:$0xff]  ;;  %v618_v8 = vld [vmem:[#allocation14 + $0x170] sm:$0xff] }
 0x121   : > { %v5043_v7 = vpack.c.bf16 %v619_v0, %v615_v63  ;;  %v621_v10 = vld [vmem:[#allocation14 + $0x188] sm:$0xff]  ;;  %v623_v12 = vld [vmem:[#allocation14 + $0x198] sm:$0xff]  ;;  %v5013_v14 = vpack.c.bf16 %v616_v5, %v612_v4  ;;  %v5045_v15 = vpack.c.bf16 %v618_v8, %v614_v6  ;;  %v620_v17 = vld [vmem:[#allocation14 + $0x180] sm:$0xff] }
 0x122   : > { %5006 = vmatpush1.bf16.msra.mxu0 %v5005_v53  ;;  %v625_v11 = vld [vmem:[#allocation14 + $0x1a8] sm:$0xff]  ;;  %v627_v13 = vld [vmem:[#allocation14 + $0x1b8] sm:$0xff]  ;;  %v624_v18 = vld [vmem:[#allocation14 + $0x1a0] sm:$0xff] }
 0x123   : > { %5038 = vmatpush1.bf16.msra.mxu1 %v5037_v54  ;;  %5008 = vmatprep.subr.bf16.mxu0 %v5007_v55  ;;  %v5015_v16 = vpack.c.bf16 %v625_v11, %v621_v10  ;;  %v622_v19 = vld [vmem:[#allocation14 + $0x190] sm:$0xff]  ;;  %v5047_v20 = vpack.c.bf16 %v627_v13, %v623_v12  ;;  %v629_v22 = vld [vmem:[#allocation14 + $0x1c8] sm:$0xff]  ;;  %v631_v24 = vld [vmem:[#allocation14 + $0x1d8] sm:$0xff]  ;;  %v5017_v26 = vpack.c.bf16 %v624_v18, %v620_v17 }
 0x124   : > { %5040 = vmatprep.subr.bf16.mxu1 %v5039_v59  ;;  %v626_v21 = vld [vmem:[#allocation14 + $0x1b0] sm:$0xff]  ;;  %v633_v23 = vld [vmem:[#allocation14 + $0x1e8] sm:$0xff]  ;;  %v635_v25 = vld [vmem:[#allocation14 + $0x1f8] sm:$0xff] }
 0x125   : > { %v5049_v27 = vpack.c.bf16 %v626_v21, %v622_v19  ;;  %v5019_v28 = vpack.c.bf16 %v633_v23, %v629_v22  ;;  %v628_v29 = vld [vmem:[#allocation14 + $0x1c0] sm:$0xff]  ;;  %v630_v31 = vld [vmem:[#allocation14 + $0x1d0] sm:$0xff]  ;;  %v5051_v32 = vpack.c.bf16 %v635_v25, %v631_v24  ;;  %v859_v34 = vld [vmem:[#allocation16 + $0x8] sm:$0xff] }
 0x126   : > { %5010 = vmatpush1.bf16.msra.mxu0 %v5009_v1  ;;  %v632_v30 = vld [vmem:[#allocation14 + $0x1e0] sm:$0xff]  ;;  %v634_v33 = vld [vmem:[#allocation14 + $0x1f0] sm:$0xff]  ;;  %v863_v35 = vld [vmem:[#allocation16 + $0x28] sm:$0xff] }
 0x127   : > { %5042 = vmatpush1.bf16.msra.mxu1 %v5041_v2  ;;  %5012 = vmatprep.subr.bf16.mxu0 %v5011_v3  ;;  %v861_v36 = vld [vmem:[#allocation16 + $0x18] sm:$0xff]  ;;  %v5021_v38 = vpack.c.bf16 %v632_v30, %v628_v29  ;;  %v5053_v39 = vpack.c.bf16 %v634_v33, %v630_v31  ;;  %v5055_v40 = vpack.c.bf16 %v863_v35, %v859_v34  ;;  %v858_v41 = vld [vmem:[#allocation16] sm:$0xff]  ;;  %v860_v43 = vld [vmem:[#allocation16 + $0x10] sm:$0xff] }
 0x128   : > { %5044 = vmatprep.subr.bf16.mxu1 %v5043_v7  ;;  %v865_v37 = vld [vmem:[#allocation16 + $0x38] sm:$0xff]  ;;  %v862_v42 = vld [vmem:[#allocation16 + $0x20] sm:$0xff]  ;;  %v864_v45 = vld [vmem:[#allocation16 + $0x30] sm:$0xff] }
 0x129   : > { %v5087_v44 = vpack.c.bf16 %v865_v37, %v861_v36  ;;  %v867_v46 = vld [vmem:[#allocation16 + $0x48] sm:$0xff]  ;;  %v869_v48 = vld [vmem:[#allocation16 + $0x58] sm:$0xff]  ;;  %v568_v50 = vld [vmem:[%s6569_s27] sm:$0xff]  ;;  %v5057_v51 = vpack.c.bf16 %v862_v42, %v858_v41  ;;  %v5089_v52 = vpack.c.bf16 %v864_v45, %v860_v43 }
 0x12a   : > { %5014 = vmatpush1.bf16.msra.mxu0 %v5013_v14  ;;  %v871_v47 = vld [vmem:[#allocation16 + $0x68] sm:$0xff]  ;;  %v873_v49 = vld [vmem:[#allocation16 + $0x78] sm:$0xff]  ;;  %v866_v54 = vld [vmem:[#allocation16 + $0x40] sm:$0xff] }
 0x12b   : > { %5046 = vmatpush1.bf16.msra.mxu1 %v5045_v15  ;;  %5016 = vmatprep.subr.bf16.mxu0 %v5015_v16  ;;  %v5059_v53 = vpack.c.bf16 %v871_v47, %v867_v46  ;;  %v870_v55 = vld [vmem:[#allocation16 + $0x60] sm:$0xff]  ;;  %v868_v56 = vld [vmem:[#allocation16 + $0x50] sm:$0xff]  ;;  %v5091_v57 = vpack.c.bf16 %v873_v49, %v869_v48  ;;  %v875_v59 = vld [vmem:[#allocation16 + $0x88] sm:$0xff] }
 0x12c   : > { %5048 = vmatprep.subr.bf16.mxu1 %v5047_v20  ;;  %v872_v58 = vld [vmem:[#allocation16 + $0x70] sm:$0xff]  ;;  %v879_v60 = vld [vmem:[#allocation16 + $0xa8] sm:$0xff]  ;;  %v877_v61 = vld [vmem:[#allocation16 + $0x98] sm:$0xff]  ;;  %v5061_v63 = vpack.c.bf16 %v870_v55, %v866_v54 }
 0x12d   : > { %v881_v62 = vld [vmem:[#allocation16 + $0xb8] sm:$0xff]  ;;  %v5093_v1 = vpack.c.bf16 %v872_v58, %v868_v56  ;;  %v5063_v2 = vpack.c.bf16 %v879_v60, %v875_v59  ;;  %v874_v3 = vld [vmem:[#allocation16 + $0x80] sm:$0xff]  ;;  %v876_v5 = vld [vmem:[#allocation16 + $0x90] sm:$0xff] }
 0x12e   : > { %5018 = vmatpush1.bf16.msra.mxu0 %v5017_v26  ;;  %v569_v0 = vld [vmem:[%s6569_s27 + $0x8] sm:$0xff]  ;;  %v878_v4 = vld [vmem:[#allocation16 + $0xa0] sm:$0xff]  ;;  %v5095_v6 = vpack.c.bf16 %v881_v62, %v877_v61  ;;  %v880_v7 = vld [vmem:[#allocation16 + $0xb0] sm:$0xff] }
 0x12f   : > { %5050 = vmatpush1.bf16.msra.mxu1 %v5049_v27  ;;  %5020 = vmatprep.subr.bf16.mxu0 %v5019_v28  ;;  %v883_v8 = vld [vmem:[#allocation16 + $0xc8] sm:$0xff]  ;;  %v885_v11 = vld [vmem:[#allocation16 + $0xd8] sm:$0xff]  ;;  %v5065_v13 = vpack.c.bf16 %v878_v4, %v874_v3  ;;  %v570_v14 = vld [vmem:[%s6569_s27 + $0x10] sm:$0xff]  ;;  %v5097_v15 = vpack.c.bf16 %v880_v7, %v876_v5 }
 0x130   : > { %5052 = vmatprep.subr.bf16.mxu1 %v5051_v32  ;;  %v887_v10 = vld [vmem:[#allocation16 + $0xe8] sm:$0xff]  ;;  %v889_v12 = vld [vmem:[#allocation16 + $0xf8] sm:$0xff]  ;;  %v882_v17 = vld [vmem:[#allocation16 + $0xc0] sm:$0xff] }
 0x131   : > { %v5067_v16 = vpack.c.bf16 %v887_v10, %v883_v8  ;;  %v886_v18 = vld [vmem:[#allocation16 + $0xe0] sm:$0xff]  ;;  %v884_v19 = vld [vmem:[#allocation16 + $0xd0] sm:$0xff]  ;;  %v5099_v20 = vpack.c.bf16 %v889_v12, %v885_v11  ;;  %v891_v22 = vld [vmem:[#allocation16 + $0x108] sm:$0xff] }
 0x132   : > { %5022 = vmatpush1.bf16.msra.mxu0 %v5021_v38  ;;  %v888_v21 = vld [vmem:[#allocation16 + $0xf0] sm:$0xff]  ;;  %v895_v23 = vld [vmem:[#allocation16 + $0x128] sm:$0xff]  ;;  %v893_v24 = vld [vmem:[#allocation16 + $0x118] sm:$0xff]  ;;  %v5069_v26 = vpack.c.bf16 %v886_v18, %v882_v17 }
 0x133   : > { %5054 = vmatpush1.bf16.msra.mxu1 %v5053_v39  ;;  %5056 = vmatprep.subr.bf16.mxu0 %v5055_v40  ;;  %v897_v25 = vld [vmem:[#allocation16 + $0x138] sm:$0xff]  ;;  %v571_v27 = vld [vmem:[%s6569_s27 + $0x18] sm:$0xff]  ;;  %v5101_v28 = vpack.c.bf16 %v888_v21, %v884_v19  ;;  %v5071_v29 = vpack.c.bf16 %v895_v23, %v891_v22  ;;  %v890_v30 = vld [vmem:[#allocation16 + $0x100] sm:$0xff]  ;;  %s4443_s27 = scalar_select %p4442_p4, 1, 0 }
 0x134   : > { %5088 = vmatprep.subr.bf16.mxu1 %v5087_v44  ;;  %v894_v31 = vld [vmem:[#allocation16 + $0x120] sm:$0xff]  ;;  %v892_v32 = vld [vmem:[#allocation16 + $0x110] sm:$0xff]  ;;  %v5103_v33 = vpack.c.bf16 %v897_v25, %v893_v24  ;;  %v899_v35 = vld [vmem:[#allocation16 + $0x148] sm:$0xff] }
 0x135   : > { %723 = vmatmul.mubr.f32.vlgmr.msra.gmra.mrb[0].mxu0 %v568_v50  ;;  %v896_v34 = vld [vmem:[#allocation16 + $0x130] sm:$0xff]  ;;  %v903_v36 = vld [vmem:[#allocation16 + $0x168] sm:$0xff]  ;;  %v901_v37 = vld [vmem:[#allocation16 + $0x158] sm:$0xff]  ;;  %v5073_v39 = vpack.c.bf16 %v894_v31, %v890_v30 }
 0x136   : > { %812 = vmatmul.mubr.f32.vlgmr.msra.gmra.mrb[0].mxu1 %v568_v50  ;;  %5058 = vmatpush1.bf16.msra.mxu0 %v5057_v51  ;;  %v905_v38 = vld [vmem:[#allocation16 + $0x178] sm:$0xff]  ;;  %v5105_v40 = vpack.c.bf16 %v896_v34, %v892_v32  ;;  %v5075_v41 = vpack.c.bf16 %v903_v36, %v899_v35  ;;  %v898_v42 = vld [vmem:[#allocation16 + $0x140] sm:$0xff]  ;;  %v900_v44 = vld [vmem:[#allocation16 + $0x150] sm:$0xff]  ;;  %v638_v36 = vlaneseq }
 0x137   : > { %5090 = vmatpush1.bf16.msra.mxu1 %v5089_v52  ;;  %5060 = vmatprep.subr.bf16.mxu0 %v5059_v53  ;;  %v902_v43 = vld [vmem:[#allocation16 + $0x160] sm:$0xff]  ;;  %v5107_v45 = vpack.c.bf16 %v905_v38, %v901_v37  ;;  %v904_v46 = vld [vmem:[#allocation16 + $0x170] sm:$0xff]  ;;  %v907_v47 = vld [vmem:[#allocation16 + $0x188] sm:$0xff] }
 0x138   : > { %5092 = vmatprep.subr.bf16.mxu1 %v5091_v57  ;;  %728 = vmatprep.mubr.f32.mxu0 %v6195_v9  ;;  %v911_v48 = vld [vmem:[#allocation16 + $0x1a8] sm:$0xff]  ;;  %v909_v49 = vld [vmem:[#allocation16 + $0x198] sm:$0xff]  ;;  %v5077_v51 = vpack.c.bf16 %v902_v43, %v898_v42  ;;  %v5109_v52 = vpack.c.bf16 %v904_v46, %v900_v44  ;;  %v906_v54 = vld [vmem:[#allocation16 + $0x180] sm:$0xff]  ;;  %v6620_v37 = vshrl.u32 %v638_v36, 7 }
 0x139   : > { %817 = vmatprep.mubr.f32.mxu1 %v6195_v9  ;;  %729 = vmatmul.mubr.f32.gmra.mrb[2].mxu0 %v569_v0  ;;  %v913_v50 = vld [vmem:[#allocation16 + $0x1b8] sm:$0xff]  ;;  %v5079_v53 = vpack.c.bf16 %v911_v48, %v907_v47  ;;  %v910_v55 = vld [vmem:[#allocation16 + $0x1a0] sm:$0xff]  ;;  %v908_v56 = vld [vmem:[#allocation16 + $0x190] sm:$0xff] }
 0x13a   : > { %5062 = vmatpush1.bf16.msra.mxu0 %v5061_v63  ;;  %818 = vmatmul.mubr.f32.gmra.mrb[2].mxu1 %v569_v0  ;;  %v5111_v57 = vpack.c.bf16 %v913_v50, %v909_v49  ;;  %v912_v58 = vld [vmem:[#allocation16 + $0x1b0] sm:$0xff]  ;;  %v915_v59 = vld [vmem:[#allocation16 + $0x1c8] sm:$0xff]  ;;  %v917_v61 = vld [vmem:[#allocation16 + $0x1d8] sm:$0xff]  ;;  %v5081_v63 = vpack.c.bf16 %v910_v55, %v906_v54  ;;  %v6623_v38 = vsub.s32 0, %v6620_v37  ;;  %v6638_v44 = vsub.s32 3, %v6620_v37 }
 0x13b   : > { %5094 = vmatpush1.bf16.msra.mxu1 %v5093_v1  ;;  %5064 = vmatprep.subr.bf16.mxu0 %v5063_v2  ;;  %v919_v60 = vld [vmem:[#allocation16 + $0x1e8] sm:$0xff]  ;;  %v921_v62 = vld [vmem:[#allocation16 + $0x1f8] sm:$0xff]  ;;  %v5113_v0 = vpack.c.bf16 %v912_v58, %v908_v56  ;;  %v914_v2 = vld [vmem:[#allocation16 + $0x1c0] sm:$0xff] }
 0x13c   : > { %5096 = vmatprep.subr.bf16.mxu1 %v5095_v6  ;;  %734 = vmatprep.mubr.f32.mxu0 %v6195_v9  ;;  %v5083_v1 = vpack.c.bf16 %v919_v60, %v915_v59  ;;  %v918_v3 = vld [vmem:[#allocation16 + $0x1e0] sm:$0xff]  ;;  %v5115_v4 = vpack.c.bf16 %v921_v62, %v917_v61  ;;  %v916_v5 = vld [vmem:[#allocation16 + $0x1d0] sm:$0xff]  ;;  %v1573_v12 = vld [vmem:[#allocation17 + $0x8] sm:$0xff] }
 0x13d   : > { %823 = vmatprep.mubr.f32.mxu1 %v6195_v9  ;;  %735 = vmatmul.mubr.f32.gmra.mrb[4].mxu0 %v570_v14  ;;  %v920_v6 = vld [vmem:[#allocation16 + $0x1f0] sm:$0xff]  ;;  %v5085_v7 = vpack.c.bf16 %v918_v3, %v914_v2  ;;  %v852_v10 = vld [vmem:[#allocation2] sm:$0xff]  ;;  %v1577_v19 = vld [vmem:[#allocation17 + $0x28] sm:$0xff]  ;;  %v1717_v2 = vstv %s1716_s20 }
 0x13e   : > { %5066 = vmatpush1.bf16.msra.mxu0 %v5065_v13  ;;  %824 = vmatmul.mubr.f32.gmra.mrb[4].mxu1 %v570_v14  ;;  %v5117_v8 = vpack.c.bf16 %v920_v6, %v916_v5  ;;  %v1572_v11 = vld [vmem:[#allocation17] sm:$0xff]  ;;  %v6196_v14 = vmov 0.0|0.0   ;;  %v1578_v21 = vld [vmem:[#allocation17 + $0x30] sm:$0xff]  ;;  %v1579_v22 = vld [vmem:[#allocation17 + $0x38] sm:$0xff]  ;;  %vm6657_vm1 = vcmp.eq.s32.totalorder %v1717_v2, 1  ;;  %v1223_v2 = vand.u32 127, %v638_v36 }
 0x13f   : > { %5098 = vmatpush1.bf16.msra.mxu1 %v5097_v15  ;;  %5068 = vmatprep.subr.bf16.mxu0 %v5067_v16  ;;  %v5120_v13 = vpack.c.bf16 %v1573_v12, %v1572_v11  ;;  %v1574_v15 = vld [vmem:[#allocation17 + $0x10] sm:$0xff]  ;;  %v1575_v16 = vld [vmem:[#allocation17 + $0x18] sm:$0xff]  ;;  %v1576_v18 = vld [vmem:[#allocation17 + $0x20] sm:$0xff]  ;;  %v5129_v23 = vpack.c.bf16 %v1579_v22, %v1578_v21  ;;  %v6198_v11 = vmov 1966171168  }
 0x140   : > { %5100 = vmatprep.subr.bf16.mxu1 %v5099_v20  ;;  %740 = vmatprep.mubr.f32.mxu0 %v6195_v9  ;;  %v5123_v17 = vpack.c.bf16 %v1575_v16, %v1574_v15  ;;  %v5126_v20 = vpack.c.bf16 %v1577_v19, %v1576_v18  ;;  %v1580_v24 = vld [vmem:[#allocation17 + $0x40] sm:$0xff]  ;;  %v1581_v25 = vld [vmem:[#allocation17 + $0x48] sm:$0xff]  ;;  %v1587_v34 = vld [vmem:[#allocation17 + $0x78] sm:$0xff]  ;;  %v1095_v12 = vunpack.c.l.s4 %v6198_v11 }
 0x141   : > { %829 = vmatprep.mubr.f32.mxu1 %v6195_v9  ;;  %741 = vmatmul.mubr.f32.gmra.mrb[6].mxu0 %v571_v27  ;;  %v1584_v30 = vld [vmem:[#allocation17 + $0x60] sm:$0xff]  ;;  %v1585_v31 = vld [vmem:[#allocation17 + $0x68] sm:$0xff] }
 0x142   : > { %5070 = vmatpush1.bf16.msra.mxu0 %v5069_v26  ;;  %830 = vmatmul.mubr.f32.gmra.mrb[6].mxu1 %v571_v27  ;;  %v5132_v26 = vpack.c.bf16 %v1581_v25, %v1580_v24  ;;  %v1582_v27 = vld [vmem:[#allocation17 + $0x50] sm:$0xff]  ;;  %v5138_v32 = vpack.c.bf16 %v1585_v31, %v1584_v30  ;;  %v1142_v24 = vld [vmem:[#allocation11] sm:$0xff] }
 0x143   : > { %5102 = vmatpush1.bf16.msra.mxu1 %v5101_v28  ;;  %5072 = vmatprep.subr.bf16.mxu0 %v5071_v29  ;;  %v1583_v28 = vld [vmem:[#allocation17 + $0x58] sm:$0xff] }
 0x144   : > { %5104 = vmatprep.subr.bf16.mxu1 %v5103_v33  ;;  %986 = vmatprep.mubr.f32.mxu0 %v6195_v9  ;;  %v5135_v29 = vpack.c.bf16 %v1583_v28, %v1582_v27  ;;  %v1586_v33 = vld [vmem:[#allocation17 + $0x70] sm:$0xff] }
 0x145   : > { %1057 = vmatprep.mubr.f32.mxu1 %v6195_v9  ;;  %v5141_v35 = vpack.c.bf16 %v1587_v34, %v1586_v33  ;;  %v1144_v28 = vld [vmem:[#allocation11 + $0x10] sm:$0xff] }
 0x146   : > { %5074 = vmatpush1.bf16.msra.mxu0 %v5073_v39  ;;  %v636_v39 = vld [vmem:[%s7367_s23] sm:$0xf] }
 0x147   : > { %5106 = vmatpush1.bf16.msra.mxu1 %v5105_v40  ;;  %5076 = vmatprep.subr.bf16.mxu0 %v5075_v41  ;;  %v6629_v40 = vsub.s32 1, %v6620_v37  ;;  %v6632_v41 = vrot.slane %v636_v39, %v6623_v38 }
 0x148   : > { %5108 = vmatprep.subr.bf16.mxu1 %v5107_v45 }
 0x149   : > { %v6635_v42 = vrot.slane %v636_v39, %v6629_v40 }
 0x14a   : > { %5078 = vmatpush1.bf16.msra.mxu0 %v5077_v51 }
 0x14b   : > { %5110 = vmatpush1.bf16.msra.mxu1 %v5109_v52  ;;  %5080 = vmatprep.subr.bf16.mxu0 %v5079_v53  ;;  %v6643_v52 = vrot.slane %v636_v39, %v6638_v44  ;;  %v6646_v53 = vsub.s32 2, %v6620_v37 }
 0x14c   : > { %5112 = vmatprep.subr.bf16.mxu1 %v5111_v57 }
 0x14d   : > { %v6650_v55 = vrot.slane %v636_v39, %v6646_v53 }
 0x14e   : > { %5082 = vmatpush1.bf16.msra.mxu0 %v5081_v63 }
 0x14f   : > { %5114 = vmatpush1.bf16.msra.mxu1 %v5113_v0  ;;  %5084 = vmatprep.subr.bf16.mxu0 %v5083_v1  ;;  %v853_v0 = vld [vmem:[#allocation3] sm:$0xff] }
 0x150   : > { %5116 = vmatprep.subr.bf16.mxu1 %v5115_v4 }
 0x152   : > { %5086 = vmatpush1.bf16.msra.mxu0 %v5085_v7  ;;  %v2480_v7 = vld [vmem:[#allocation17] sm:$0xff] }
 0x153   : > { %5118 = vmatpush1.bf16.msra.mxu1 %v5117_v8  ;;  %5119 = vmatprep.subr.bf16.mxu0 %v6196_v14 }
 0x155   : > { %987 = vmatmul.mubr.f32.vlgmr.msra.gmra.mrb[0].mxu0 %v852_v10 }
 0x156   : > { %1058 = vmatmul.mubr.f32.vlgmr.msra.gmra.mrb[0].mxu1 %v852_v10  ;;  %5121 = vmatpush3.bf16.msra.mxu0 %v5120_v13  ;;  %v1096_v13 = vunpack.c.0.s8 %v1095_v12 }
 0x157   : > { %1975 = vmatprep.mubr.f32.mxu1 %v6195_v9  ;;  %5122 = vmatprep.subr.bf16.mxu0 %v6196_v14 }
 0x158   : > { %4883 = vmatprep.mubr.msk.f32.mxu0 %vm6197_vm0, %v6195_v9  ;;  %v6664_v16 = vsub.s32 %v1096_v13, %v6620_v37 }
 0x15a   : > { %5124 = vmatpush3.bf16.msra.mxu0 %v5123_v17 }
 0x15b   : > { %5125 = vmatprep.subr.bf16.mxu0 %v6196_v14 }
 0x15e   : > { %5127 = vmatpush3.bf16.msra.mxu0 %v5126_v20 }
 0x15f   : > { %5128 = vmatprep.subr.bf16.mxu0 %v6196_v14 }
 0x162   : > { %5130 = vmatpush3.bf16.msra.mxu0 %v5129_v23 }
 0x163   : > { %5131 = vmatprep.subr.bf16.mxu0 %v6196_v14 }
 0x166   : > { %5133 = vmatpush3.bf16.msra.mxu0 %v5132_v26 }
 0x167   : > { %5134 = vmatprep.subr.bf16.mxu0 %v6196_v14 }
 0x16a   : > { %5136 = vmatpush3.bf16.msra.mxu0 %v5135_v29 }
 0x16b   : > { %5137 = vmatprep.subr.bf16.mxu0 %v6196_v14 }
 0x16e   : > { %5139 = vmatpush3.bf16.msra.mxu0 %v5138_v32 }
 0x16f   : > { %5140 = vmatprep.subr.bf16.mxu0 %v6196_v14 }
 0x172   : > { %5142 = vmatpush3.bf16.msra.mxu0 %v5141_v35  ;;  %v1143_v35 = vld [vmem:[#allocation11 + $0x8] sm:$0xff] }
 0x228   : > { %v988_v43 = vpop.f32.mrb[0].mxu0 }
 0x229   : > { %v5407_v45 = vadd.f32 %v988_v43, %v6632_v41  ;;  %v1059_v46 = vpop.f32.mrb[0].mxu1  ;;  %v990_v47 = vpop.f32.mrb[1].mxu0 }
 0x22a   : > { %v5408_v48 = vadd.f32 %v990_v47, %v6635_v42  ;;  %v1061_v49 = vpop.f32.mrb[1].mxu1  ;;  %v5415_v57 = vadd.f32 %v1059_v46, %v6650_v55  ;;  %v1145_v46 = vld [vmem:[#allocation11 + $0x18] sm:$0xff] }
 0x22b   : > { %v4755_v50 = vmul.f32 -1.442695, %v5407_v45  ;;  %v5416_v54 = vadd.f32 %v1061_v49, %v6643_v52 }
 0x22c   : > { %v4756_v51 = vmul.f32 -1.442695, %v5408_v48 }
 0x22d   : > { %5599 = vpow2.f32 %v4755_v50  ;;  %v4757_v56 = vmul.f32 -1.442695, %v5416_v54  ;;  %v1146_v50 = vld [vmem:[#allocation11 + $0x20] sm:$0xff] }
 0x22e   : > { %5601 = vpow2.f32 %v4756_v51 }
 0x22f   : > { %5603 = vpow2.f32 %v4757_v56 }
 0x230   : > { %5605 = vtanh.f32 %v5415_v57  ;;  %v1147_v57 = vld [vmem:[#allocation11 + $0x28] sm:$0xff] }
 0x237   : > { %v5600_v58 = vpop.eup %5599 }
 0x238   : > { %v5602_v59 = vpop.eup %5601  ;;  %v1071_v60 = vadd.f32 1.0, %v5600_v58 }
 0x239   : > { %v1077_v61 = vadd.f32 1.0, %v5602_v59  ;;  %v5604_v62 = vpop.eup %5603 }
 0x23a   : > { %5607 = vrcp.f32 %v1071_v60  ;;  %v5606_v63 = vpop.eup %5605  ;;  %v1084_v5 = vadd.f32 1.0, %v5604_v62  ;;  %v1148_v60 = vld [vmem:[#allocation11 + $0x30] sm:$0xff] }
 0x23b   : > { %5609 = vrcp.f32 %v1077_v61 }
 0x23c   : > { %5611 = vrcp.f32 %v1084_v5 }
 0x244   : > { %v5608_v1 = vpop.eup %5607 }
 0x245   : > { %v5610_v3 = vpop.eup %5609  ;;  %v1088_v4 = vmul.f32 %v5608_v1, %v5606_v63  ;;  %v1149_v63 = vld [vmem:[#allocation11 + $0x38] sm:$0xff] }
 0x246   : > { %v1087_v6 = vmul.f32 %v5610_v3, %v853_v0  ;;  %v5612_v15 = vpop.eup %5611 }
 0x248   : > { %v1089_v8 = vadd.f32 %v1088_v4, %v1087_v6  ;;  %v6683_v4 = vsub.s32 %v1223_v2, %v6620_v37 }
 0x24a   : > { %v1767_v10 = vsel %vm6657_vm1, %v1089_v8, %v853_v0  ;;  %5613 = vtanh.f32 %v1089_v8 }
 0x24b   : > { %1768 = vst [vmem:[#allocation3] sm:$0xff] %v1767_v10 }
 0x254   : > { %v5614_v17 = vpop.eup %5613 }
 0x255   : > { %v1091_v18 = vmul.f32 %v5614_v17, %v5612_v15 }
 0x257   : > { %4884 = vmatmul.mubr.f32.vlgmr.msra.gmra.mrb[8].mxu0 %v1091_v18  ;;  %v1100_v19 = vrot.slane %v1091_v18, %v6664_v16  ;;  %v1093_v20 = vcombine.high %v1091_v18, %v1091_v18 }
 0x258   : > { %1904 = vmatprep.mubr.f32.mxu0 %v6195_v9 }
 0x259   : > { %v1116_v21 = vrot.slane %v1100_v19, %v6664_v16  ;;  %v1108_v22 = vcombine.high %v1100_v19, %v1100_v19  ;;  %v1107_v23 = vrot.slane %v1093_v20, %v6664_v16 }
 0x25b   : > { %v1153_v25 = vrot.slane %v1116_v21, %v6623_v38  ;;  %v1138_v26 = vcombine.high %v1116_v21, %v1116_v21  ;;  %v1130_v27 = vrot.slane %v1108_v22, %v6664_v16  ;;  %v1123_v29 = vrot.slane %v1107_v23, %v6664_v16 }
 0x25c   : > { %v1109_v30 = vcombine.high %v1107_v23, %v1107_v23 }
 0x25d   : > { %v1190_v31 = vmul.f32 %v1153_v25, %v1142_v24  ;;  %v1161_v32 = vrot.slane %v1138_v26, %v6623_v38  ;;  %v1157_v33 = vrot.slane %v1130_v27, %v6623_v38  ;;  %v1140_v34 = vcombine.high %v1130_v27, %v1130_v27 }
 0x25e   : > { %v1137_v45 = vrot.slane %v1109_v30, %v6664_v16  ;;  %v1169_v48 = vrot.slane %v1123_v29, %v6623_v38  ;;  %v1139_v49 = vcombine.high %v1123_v29, %v1123_v29 }
 0x25f   : > { %1198 = vadd.xlane.f32.xlu0 %v1190_v31  ;;  %v1192_v39 = vmul.f32 %v1161_v32, %v1144_v28  ;;  %v1165_v43 = vrot.slane %v1140_v34, %v6623_v38  ;;  %v1191_v47 = vmul.f32 %v1157_v33, %v1143_v35  ;;  %v6199_v31 = vmov 0  }
 0x260   : > { %v1173_v54 = vrot.slane %v1137_v45, %v6623_v38  ;;  %v1141_v56 = vcombine.high %v1137_v45, %v1137_v45  ;;  %v1194_v58 = vmul.f32 %v1169_v48, %v1146_v50  ;;  %v1177_v59 = vrot.slane %v1139_v49, %v6623_v38  ;;  %5598 = vset.pattern.permute.xlu0 %v6199_v31 }
 0x261   : > { %1202 = vadd.xlane.f32.xlu1 %v1192_v39  ;;  %v1193_v51 = vmul.f32 %v1165_v43, %v1145_v46  ;;  %v6707_v45 = vsub.s32 4, %v6620_v37 }
 0x262   : > { %v1195_v61 = vmul.f32 %v1173_v54, %v1147_v57  ;;  %v1181_v62 = vrot.slane %v1141_v56, %v6623_v38  ;;  %v1196_v0 = vmul.f32 %v1177_v59, %v1148_v60  ;;  %5597 = vset.pattern.permute.xlu1 %v6199_v31  ;;  %v6711_v54 = vsub.s32 5, %v6620_v37 }
 0x263   : > { %1200 = vadd.xlane.f32.xlu0 %v1191_v47  ;;  %v6715_v59 = vsub.s32 6, %v6620_v37 }
 0x264   : > { %v1197_v1 = vmul.f32 %v1181_v62, %v1149_v63  ;;  %v6719_v63 = vsub.s32 7, %v6620_v37 }
 0x265   : > { %1204 = vadd.xlane.f32.xlu1 %v1193_v51 }
 0x267   : > { %1206 = vadd.xlane.f32.xlu0 %v1194_v58 }
 0x269   : > { %1208 = vadd.xlane.f32.xlu1 %v1195_v61 }
 0x26b   : > { %1210 = vadd.xlane.f32.xlu0 %v1196_v0 }
 0x26d   : > { %1212 = vadd.xlane.f32.xlu1 %v1197_v1 }
 0x2ec   : > { %v1199_v3 = vpop.xlane.xlu0 %1198 }
 0x2ed   : > { %v1227_v8 = vrot.slane %v1199_v3, %v6683_v4 }
 0x2ee   : > { %v1203_v5 = vpop.xlane.xlu1 %1202 }
 0x2ef   : > { %v1235_v11 = vrot.slane %v1203_v5, %v6683_v4 }
 0x2f0   : > { %v1201_v6 = vpop.xlane.xlu0 %1200 }
 0x2f1   : > { %v1231_v10 = vrot.slane %v1201_v6, %v6683_v4 }
 0x2f2   : > { %v1205_v12 = vpop.xlane.xlu1 %1204 }
 0x2f3   : > { %v1257_v13 = vsel %vm1256_vm2, %v1231_v10, %v1227_v8  ;;  %v1239_v36 = vrot.slane %v1205_v12, %v6683_v4 }
 0x2f4   : > { %v1259_v15 = vsel %vm1258_vm3, %v1235_v11, %v1257_v13  ;;  %v1207_v17 = vpop.xlane.xlu0 %1206 }
 0x2f5   : > { %v1261_v18 = vsel %vm1260_vm4, %v1239_v36, %v1259_v15  ;;  %v1243_v19 = vrot.slane %v1207_v17, %v6683_v4 }
 0x2f6   : > { %v1209_v20 = vpop.xlane.xlu1 %1208 }
 0x2f7   : > { %v1263_v21 = vsel %vm1262_vm5, %v1243_v19, %v1261_v18  ;;  %v1247_v22 = vrot.slane %v1209_v20, %v6683_v4 }
 0x2f8   : > { %v1211_v23 = vpop.xlane.xlu0 %1210 }
 0x2f9   : > { %v1251_v24 = vrot.slane %v1211_v23, %v6683_v4  ;;  %v1265_v25 = vsel %vm1264_vm6, %v1247_v22, %v1263_v21 }
 0x2fa   : > { %v1213_v26 = vpop.xlane.xlu1 %1212 }
 0x2fb   : > { %v1255_v27 = vrot.slane %v1213_v26, %v6683_v4  ;;  %v1267_v28 = vsel %vm1266_vm7, %v1251_v24, %v1265_v25 }
 0x2fd   : > { %v1269_v29 = vsel %vm1268_vm8, %v1255_v27, %v1267_v28 }
 0x2fe   : > { %v1272_v30 = vsel %vm1271_vm9, %v1269_v29, -inf }
 0x2ff   : > { %1273 = vmax.xlane.f32.xlu0 %v1272_v30 }
 0x32a   : > { %v6701_v32 = vpop.f32.mrb[8].mxu0 }
 0x32b   : > { %v4885_v33 = vpop.f32.mrb[9].mxu0 }
 0x38c   : > { %v1274_v34 = vpop.xlane.xlu0 %1273 }
 0x38d   : > { %v1279_v35 = vrot.slane %v1274_v34, %v6623_v38  ;;  %v1283_v39 = vrot.slane %v1274_v34, %v6629_v40  ;;  %v1287_v43 = vrot.slane %v1274_v34, %v6646_v53  ;;  %v1291_v46 = vrot.slane %v1274_v34, %v6638_v44 }
 0x38e   : > { %v1295_v56 = vrot.slane %v1274_v34, %v6707_v45  ;;  %v1299_v60 = vrot.slane %v1274_v34, %v6711_v54  ;;  %v1303_v0 = vrot.slane %v1274_v34, %v6715_v59 }
 0x38f   : > { %v1316_v47 = vsub.f32 %v1199_v3, %v1279_v35  ;;  %v1317_v48 = vsub.f32 %v1201_v6, %v1283_v39  ;;  %v1318_v49 = vsub.f32 %v1203_v5, %v1287_v43  ;;  %v1319_v57 = vsub.f32 %v1205_v12, %v1291_v46 }
 0x390   : > { %v1320_v61 = vsub.f32 %v1207_v17, %v1295_v56  ;;  %v1321_v1 = vsub.f32 %v1209_v20, %v1299_v60  ;;  %v1307_v6 = vrot.slane %v1274_v34, %v6719_v63  ;;  %v1322_v8 = vsub.f32 %v1211_v23, %v1303_v0 }
 0x391   : > { %v1324_v50 = vmul.f32 1.442695, %v1316_v47  ;;  %v1326_v51 = vmul.f32 1.442695, %v1317_v48  ;;  %v1328_v58 = vmul.f32 1.442695, %v1318_v49 }
 0x392   : > { %v1330_v62 = vmul.f32 1.442695, %v1319_v57  ;;  %v1332_v2 = vmul.f32 1.442695, %v1320_v61  ;;  %v1334_v10 = vmul.f32 1.442695, %v1321_v1  ;;  %v1323_v37 = vsub.f32 %v1213_v26, %v1307_v6 }
 0x393   : > { %5615 = vpow2.f32 %v1324_v50  ;;  %v1336_v12 = vmul.f32 1.442695, %v1322_v8 }
 0x394   : > { %5617 = vpow2.f32 %v1326_v51  ;;  %v1338_v36 = vmul.f32 1.442695, %v1323_v37 }
 0x395   : > { %5619 = vpow2.f32 %v1328_v58 }
 0x396   : > { %5621 = vpow2.f32 %v1330_v62 }
 0x397   : > { %5623 = vpow2.f32 %v1332_v2 }
 0x398   : > { %5625 = vpow2.f32 %v1334_v10 }
 0x399   : > { %5627 = vpow2.f32 %v1336_v12 }
 0x39a   : > { %5629 = vpow2.f32 %v1338_v36 }
 0x39d   : > { %v6722_v3 = vpop.eup %5615 }
 0x39e   : > { %v5618_v5 = vpop.eup %5617  ;;  %1349 = vperm.xlu1 %5597, %v6722_v3  }
 0x39f   : > { %1352 = vperm.xlu0 %5598, %v5618_v5   ;;  %v5620_v11 = vpop.eup %5619 }
 0x3a0   : > { %v5622_v13 = vpop.eup %5621 }
 0x3a1   : > { %v5624_v15 = vpop.eup %5623 }
 0x3a2   : > { %1355 = vperm.xlu1 %5597, %v5620_v11   ;;  %v5626_v17 = vpop.eup %5625 }
 0x3a3   : > { %v5628_v18 = vpop.eup %5627 }
 0x3a4   : > { %v5630_v19 = vpop.eup %5629 }
 0x3a6   : > { %1358 = vperm.xlu1 %5597, %v5622_v13  }
 0x3aa   : > { %1361 = vperm.xlu1 %5597, %v5624_v15  }
 0x3ae   : > { %1364 = vperm.xlu1 %5597, %v5626_v17  }
 0x3b2   : > { %1367 = vperm.xlu1 %5597, %v5628_v18  }
 0x3b6   : > { %1370 = vperm.xlu1 %5597, %v5630_v19  }
 0x41d   : > { %v1350_v20 = vpop.permute.xlu1 %1349 }
 0x41e   : > { %v1353_v24 = vpop.permute.xlu0 %1352  ;;  %v1375_v27 = vrot.slane %v1350_v20, %v6683_v4 }
 0x41f   : > { %v1379_v26 = vrot.slane %v1353_v24, %v6683_v4  ;;  %v1777_v24 = vld [vmem:[#allocation16 + $0x8] sm:$0xff] }
 0x421   : > { %v1356_v21 = vpop.permute.xlu1 %1355  ;;  %v1404_v33 = vsel %vm1256_vm2, %v1379_v26, %v1375_v27  ;;  %v1783_v27 = vld [vmem:[#allocation16 + $0x38] sm:$0xff] }
 0x422   : > { %v1383_v28 = vrot.slane %v1356_v21, %v6683_v4 }
 0x424   : > { %v1405_v35 = vsel %vm1258_vm3, %v1383_v28, %v1404_v33  ;;  %v1776_v28 = vld [vmem:[#allocation16] sm:$0xff] }
 0x425   : > { %v1359_v22 = vpop.permute.xlu1 %1358 }
 0x426   : > { %v1387_v29 = vrot.slane %v1359_v22, %v6683_v4 }
 0x428   : > { %v1406_v43 = vsel %vm1260_vm4, %v1387_v29, %v1405_v35  ;;  %v1787_v35 = vld [vmem:[#allocation16 + $0x58] sm:$0xff] }
 0x429   : > { %v1362_v23 = vpop.permute.xlu1 %1361 }
 0x42a   : > { %v1391_v30 = vrot.slane %v1362_v23, %v6683_v4 }
 0x42c   : > { %v1407_v46 = vsel %vm1262_vm5, %v1391_v30, %v1406_v43  ;;  %v1784_v43 = vld [vmem:[#allocation16 + $0x40] sm:$0xff] }
 0x42d   : > { %v1365_v25 = vpop.permute.xlu1 %1364 }
 0x42e   : > { %v1395_v34 = vrot.slane %v1365_v25, %v6683_v4  ;;  %v1781_v25 = vld [vmem:[#allocation16 + $0x28] sm:$0xff] }
 0x42f   : > { %v5143_v26 = vpack.c.bf16 %v1781_v25, %v1777_v24  ;;  %v1806_v24 = vld [vmem:[#allocation16 + $0xf0] sm:$0xff] }
 0x430   : > { %v1408_v49 = vsel %vm1264_vm6, %v1395_v34, %v1407_v46  ;;  %v1789_v34 = vld [vmem:[#allocation16 + $0x68] sm:$0xff]  ;;  %v1788_v46 = vld [vmem:[#allocation16 + $0x60] sm:$0xff] }
 0x431   : > { %v1368_v31 = vpop.permute.xlu1 %1367  ;;  %5144 = vmatprep.subr.bf16.mxu0 %v5143_v26  ;;  %v1813_v26 = vld [vmem:[#allocation16 + $0x128] sm:$0xff] }
 0x432   : > { %v1399_v39 = vrot.slane %v1368_v31, %v6683_v4  ;;  %v1778_v31 = vld [vmem:[#allocation16 + $0x10] sm:$0xff] }
 0x434   : > { %v1409_v50 = vsel %vm1266_vm7, %v1399_v39, %v1408_v49  ;;  %v1791_v39 = vld [vmem:[#allocation16 + $0x78] sm:$0xff]  ;;  %v1786_v49 = vld [vmem:[#allocation16 + $0x50] sm:$0xff] }
 0x435   : > { %v1371_v47 = vpop.permute.xlu1 %1370 }
 0x436   : > { %v1403_v48 = vrot.slane %v1371_v47, %v6683_v4  ;;  %v5179_v47 = vpack.c.bf16 %v1791_v39, %v1787_v35  ;;  %v1817_v35 = vld [vmem:[#allocation16 + $0x148] sm:$0xff]  ;;  %v1819_v39 = vld [vmem:[#allocation16 + $0x158] sm:$0xff] }
 0x438   : > { %v1410_v51 = vsel %vm1268_vm8, %v1403_v48, %v1409_v50  ;;  %v5149_v48 = vpack.c.bf16 %v1788_v46, %v1784_v43  ;;  %v1790_v50 = vld [vmem:[#allocation16 + $0x70] sm:$0xff]  ;;  %v1823_v46 = vld [vmem:[#allocation16 + $0x178] sm:$0xff] }
 0x439   : > { %v1412_v56 = vsel %vm1271_vm9, %v1410_v51, 0.0  ;;  %v5181_v51 = vpack.c.bf16 %v1790_v50, %v1786_v49  ;;  %v5195_v49 = vpack.c.bf16 %v1823_v46, %v1819_v39 }
 0x43a   : > { %1413 = vadd.xlane.f32.xlu1 %v1412_v56  ;;  %v1793_v56 = vld [vmem:[#allocation16 + $0x88] sm:$0xff] }
 0x4c7   : > { %v1414_v57 = vpop.xlane.xlu1 %1413 }
 0x4c8   : > { %5631 = vrcp.f32 %v1414_v57 }
 0x4d2   : > { %v5632_v58 = vpop.eup %5631 }
 0x4d3   : > { %v1416_v60 = vmul.f32 %v5632_v58, %v1414_v57  ;;  %v1797_v57 = vld [vmem:[#allocation16 + $0xa8] sm:$0xff] }
 0x4d5   : > { %v1417_v61 = vsub.f32 2.0, %v1416_v60  ;;  %v5151_v60 = vpack.c.bf16 %v1797_v57, %v1793_v56  ;;  %v1822_v56 = vld [vmem:[#allocation16 + $0x170] sm:$0xff] }
 0x4d7   : > { %v1418_v62 = vmul.f32 %v5632_v58, %v1417_v61  ;;  %v1795_v58 = vld [vmem:[#allocation16 + $0x98] sm:$0xff] }
 0x4d8   : > { %v1799_v61 = vld [vmem:[#allocation16 + $0xb8] sm:$0xff] }
 0x4d9   : > { %v1427_v0 = vrot.slane %v1418_v62, %v6629_v40  ;;  %v1431_v2 = vrot.slane %v1418_v62, %v6646_v53  ;;  %v1423_v8 = vrot.slane %v1418_v62, %v6623_v38  ;;  %v1435_v37 = vrot.slane %v1418_v62, %v6638_v44 }
 0x4da   : > { %v1439_v36 = vrot.slane %v1418_v62, %v6707_v45  ;;  %v1443_v21 = vrot.slane %v1418_v62, %v6711_v54  ;;  %v1447_v22 = vrot.slane %v1418_v62, %v6715_v59  ;;  %v1451_v23 = vrot.slane %v1418_v62, %v6719_v63  ;;  %v1792_v62 = vld [vmem:[#allocation16 + $0x80] sm:$0xff] }
 0x4db   : > { %v1461_v1 = vmul.f32 %v5618_v5, %v1427_v0  ;;  %v1462_v6 = vmul.f32 %v5620_v11, %v1431_v2  ;;  %v1460_v10 = vmul.f32 %v6722_v3, %v1423_v8  ;;  %v1463_v12 = vmul.f32 %v5622_v13, %v1435_v37  ;;  %v1779_v13 = vld [vmem:[#allocation16 + $0x18] sm:$0xff]  ;;  %v1796_v0 = vld [vmem:[#allocation16 + $0xa0] sm:$0xff]  ;;  %v1798_v8 = vld [vmem:[#allocation16 + $0xb0] sm:$0xff] }
 0x4dc   : > { %v1464_v20 = vmul.f32 %v5624_v15, %v1439_v36  ;;  %v1465_v5 = vmul.f32 %v5626_v17, %v1443_v21  ;;  %v1466_v11 = vmul.f32 %v5628_v18, %v1447_v22  ;;  %v1467_v3 = vmul.f32 %v5630_v19, %v1451_v23  ;;  %v1780_v15 = vld [vmem:[#allocation16 + $0x20] sm:$0xff]  ;;  %v1782_v17 = vld [vmem:[#allocation16 + $0x30] sm:$0xff]  ;;  %v1785_v18 = vld [vmem:[#allocation16 + $0x48] sm:$0xff] }
 0x4dd   : > { %1483 = vperm.xlu0 %5598, %v1461_v1   ;;  %v5175_v29 = vpack.c.bf16 %v1783_v27, %v1779_v13  ;;  %v5145_v30 = vpack.c.bf16 %v1780_v15, %v1776_v28  ;;  %v5177_v33 = vpack.c.bf16 %v1782_v17, %v1778_v31  ;;  %v5147_v19 = vpack.c.bf16 %v1789_v34, %v1785_v18  ;;  %v1801_v37 = vld [vmem:[#allocation16 + $0xc8] sm:$0xff]  ;;  %v1803_v36 = vld [vmem:[#allocation16 + $0xd8] sm:$0xff]  ;;  %v1804_v22 = vld [vmem:[#allocation16 + $0xe0] sm:$0xff] }
 0x4de   : > { %v5183_v1 = vpack.c.bf16 %v1799_v61, %v1795_v58  ;;  %v5153_v2 = vpack.c.bf16 %v1796_v0, %v1792_v62  ;;  %v1807_v21 = vld [vmem:[#allocation16 + $0xf8] sm:$0xff]  ;;  %v1809_v13 = vld [vmem:[#allocation16 + $0x108] sm:$0xff]  ;;  %v1814_v18 = vld [vmem:[#allocation16 + $0x130] sm:$0xff] }
 0x4df   : > { %5176 = vmatprep.subr.bf16.mxu1 %v5175_v29  ;;  %5146 = vmatpush1.bf16.msra.mxu0 %v5145_v30  ;;  %v1811_v27 = vld [vmem:[#allocation16 + $0x118] sm:$0xff]  ;;  %v5159_v28 = vpack.c.bf16 %v1813_v26, %v1809_v13  ;;  %v1808_v29 = vld [vmem:[#allocation16 + $0x100] sm:$0xff]  ;;  %v1825_v58 = vld [vmem:[#allocation16 + $0x188] sm:$0xff] }
 0x4e0   : > { %5178 = vmatpush1.bf16.msra.mxu1 %v5177_v33  ;;  %5148 = vmatprep.subr.bf16.mxu0 %v5147_v19  ;;  %v1815_v15 = vld [vmem:[#allocation16 + $0x138] sm:$0xff]  ;;  %v1812_v30 = vld [vmem:[#allocation16 + $0x120] sm:$0xff]  ;;  %v1810_v33 = vld [vmem:[#allocation16 + $0x110] sm:$0xff] }
 0x4e1   : > { %1488 = vperm.xlu0 %5598, %v1462_v6   ;;  %5180 = vmatprep.subr.bf16.mxu1 %v5179_v47  ;;  %v1794_v6 = vld [vmem:[#allocation16 + $0x90] sm:$0xff]  ;;  %v5191_v31 = vpack.c.bf16 %v1815_v15, %v1811_v27  ;;  %v5161_v17 = vpack.c.bf16 %v1812_v30, %v1808_v29  ;;  %v5193_v34 = vpack.c.bf16 %v1814_v18, %v1810_v33  ;;  %v1821_v19 = vld [vmem:[#allocation16 + $0x168] sm:$0xff]  ;;  %v1816_v47 = vld [vmem:[#allocation16 + $0x140] sm:$0xff] }
 0x4e2   : > { %v5163_v43 = vpack.c.bf16 %v1821_v19, %v1817_v35  ;;  %v1827_v61 = vld [vmem:[#allocation16 + $0x198] sm:$0xff]  ;;  %v1838_v13 = vld [vmem:[#allocation16 + $0x1f0] sm:$0xff]  ;;  %v1469_v27 = vld [vmem:[#allocation13 + $0x8] sm:$0xff] }
 0x4e3   : > { %5150 = vmatpush1.bf16.msra.mxu0 %v5149_v48  ;;  %v1820_v48 = vld [vmem:[#allocation16 + $0x160] sm:$0xff]  ;;  %v1831_v0 = vld [vmem:[#allocation16 + $0x1b8] sm:$0xff]  ;;  %v1470_v29 = vld [vmem:[#allocation13 + $0x10] sm:$0xff] }
 0x4e4   : > { %5182 = vmatpush1.bf16.msra.mxu1 %v5181_v51  ;;  %5152 = vmatprep.subr.bf16.mxu0 %v5151_v60  ;;  %v5165_v50 = vpack.c.bf16 %v1820_v48, %v1816_v47  ;;  %v1818_v51 = vld [vmem:[#allocation16 + $0x150] sm:$0xff]  ;;  %v1829_v60 = vld [vmem:[#allocation16 + $0x1a8] sm:$0xff]  ;;  %v1468_v33 = vld [vmem:[#allocation13] sm:$0xff] }
 0x4e5   : > { %1478 = vperm.xlu0 %5598, %v1460_v10   ;;  %v5185_v10 = vpack.c.bf16 %v1798_v8, %v1794_v6  ;;  %5184 = vmatprep.subr.bf16.mxu1 %v5183_v1  ;;  %v5197_v57 = vpack.c.bf16 %v1822_v56, %v1818_v51  ;;  %v5167_v62 = vpack.c.bf16 %v1829_v60, %v1825_v58  ;;  %v1824_v1 = vld [vmem:[#allocation16 + $0x180] sm:$0xff] }
 0x4e6   : > { %v5199_v6 = vpack.c.bf16 %v1831_v0, %v1827_v61  ;;  %v1472_v58 = vld [vmem:[#allocation13 + $0x20] sm:$0xff] }
 0x4e7   : > { %5154 = vmatpush1.bf16.msra.mxu0 %v5153_v2  ;;  %v1828_v2 = vld [vmem:[#allocation16 + $0x1a0] sm:$0xff] }
 0x4e8   : > { %5186 = vmatpush1.bf16.msra.mxu1 %v5185_v10  ;;  %v5169_v8 = vpack.c.bf16 %v1828_v2, %v1824_v1  ;;  %v1826_v10 = vld [vmem:[#allocation16 + $0x190] sm:$0xff]  ;;  %v1473_v2 = vld [vmem:[#allocation13 + $0x28] sm:$0xff] }
 0x4e9   : > { %1493 = vperm.xlu0 %5598, %v1463_v12   ;;  %v1805_v12 = vld [vmem:[#allocation16 + $0xe8] sm:$0xff] }
 0x4ed   : > { %1498 = vperm.xlu0 %5598, %v1464_v20   ;;  %v5155_v20 = vpack.c.bf16 %v1805_v12, %v1801_v37  ;;  %v1830_v37 = vld [vmem:[#allocation16 + $0x1b0] sm:$0xff] }
 0x4ee   : > { %v5201_v12 = vpack.c.bf16 %v1830_v37, %v1826_v10 }
 0x4ef   : > { %5156 = vmatprep.subr.bf16.mxu0 %v5155_v20  ;;  %v1837_v20 = vld [vmem:[#allocation16 + $0x1e8] sm:$0xff] }
 0x4f1   : > { %1503 = vperm.xlu0 %5598, %v1465_v5   ;;  %v1800_v5 = vld [vmem:[#allocation16 + $0xc0] sm:$0xff] }
 0x4f2   : > { %v5157_v23 = vpack.c.bf16 %v1804_v22, %v1800_v5  ;;  %v1839_v22 = vld [vmem:[#allocation16 + $0x1f8] sm:$0xff] }
 0x4f4   : > { %5158 = vmatpush1.bf16.msra.mxu0 %v5157_v23  ;;  %v1836_v23 = vld [vmem:[#allocation16 + $0x1e0] sm:$0xff] }
 0x4f5   : > { %1508 = vperm.xlu0 %5598, %v1466_v11   ;;  %v5187_v11 = vpack.c.bf16 %v1807_v21, %v1803_v36  ;;  %5160 = vmatprep.subr.bf16.mxu0 %v5159_v28  ;;  %v1833_v36 = vld [vmem:[#allocation16 + $0x1c8] sm:$0xff]  ;;  %v1835_v21 = vld [vmem:[#allocation16 + $0x1d8] sm:$0xff] }
 0x4f6   : > { %v5171_v5 = vpack.c.bf16 %v1837_v20, %v1833_v36 }
 0x4f7   : > { %5188 = vmatprep.subr.bf16.mxu1 %v5187_v11  ;;  %v1832_v11 = vld [vmem:[#allocation16 + $0x1c0] sm:$0xff] }
 0x4f8   : > { %5162 = vmatpush1.bf16.msra.mxu0 %v5161_v17 }
 0x4f9   : > { %1513 = vperm.xlu0 %5598, %v1467_v3   ;;  %v1802_v3 = vld [vmem:[#allocation16 + $0xd0] sm:$0xff]  ;;  %5164 = vmatprep.subr.bf16.mxu0 %v5163_v43  ;;  %v1471_v43 = vld [vmem:[#allocation13 + $0x18] sm:$0xff] }
 0x4fa   : > { %v5189_v25 = vpack.c.bf16 %v1806_v24, %v1802_v3  ;;  %v5203_v3 = vpack.c.bf16 %v1839_v22, %v1835_v21  ;;  %v5173_v24 = vpack.c.bf16 %v1836_v23, %v1832_v11  ;;  %v1474_v22 = vld [vmem:[#allocation13 + $0x30] sm:$0xff] }
 0x4fc   : > { %5190 = vmatpush1.bf16.msra.mxu1 %v5189_v25  ;;  %5166 = vmatpush1.bf16.msra.mxu0 %v5165_v50  ;;  %v1834_v25 = vld [vmem:[#allocation16 + $0x1d0] sm:$0xff] }
 0x4fd   : > { %5192 = vmatprep.subr.bf16.mxu1 %v5191_v31  ;;  %5168 = vmatprep.subr.bf16.mxu0 %v5167_v62  ;;  %v5205_v26 = vpack.c.bf16 %v1838_v13, %v1834_v25 }
 0x500   : > { %5194 = vmatpush1.bf16.msra.mxu1 %v5193_v34  ;;  %5170 = vmatpush1.bf16.msra.mxu0 %v5169_v8 }
 0x501   : > { %5196 = vmatprep.subr.bf16.mxu1 %v5195_v49  ;;  %5172 = vmatprep.subr.bf16.mxu0 %v5171_v5 }
 0x504   : > { %5198 = vmatpush1.bf16.msra.mxu1 %v5197_v57  ;;  %5174 = vmatpush1.bf16.msra.mxu0 %v5173_v24 }
 0x505   : > { %5200 = vmatprep.subr.bf16.mxu1 %v5199_v6 }
 0x508   : > { %5202 = vmatpush1.bf16.msra.mxu1 %v5201_v12 }
 0x509   : > { %5204 = vmatprep.subr.bf16.mxu1 %v5203_v3 }
 0x50c   : > { %5206 = vmatpush1.bf16.msra.mxu1 %v5205_v26 }
 0x50d   : > { %5207 = vmatprep.subr.bf16.mxu1 %v6196_v14 }
 0x55c   : > { %v1484_v28 = vpop.permute.xlu0 %1483 }
 0x55d   : > { %v1517_v15 = vmul.f32 %v1484_v28, %v1469_v27 }
 0x55f   : > { %v1530_v31 = vrot.slane %v1517_v15, 4 }
 0x560   : > { %v1489_v30 = vpop.permute.xlu0 %1488 }
 0x561   : > { %v1518_v17 = vmul.f32 %v1489_v30, %v1470_v29  ;;  %v1531_v35 = vadd.f32 %v1530_v31, %v1517_v15  ;;  %v1659_v29 = vrot.slane %v6701_v32, 1 }
 0x563   : > { %v1536_v18 = vrot.slane %v1518_v17, 4  ;;  %v1532_v48 = vrot.slane %v1531_v35, 2 }
 0x564   : > { %v1479_v34 = vpop.permute.xlu0 %1478 }
 0x565   : > { %v1516_v19 = vmul.f32 %v1479_v34, %v1468_v33  ;;  %v1537_v39 = vadd.f32 %v1536_v18, %v1518_v17  ;;  %v1533_v61 = vadd.f32 %v1532_v48, %v1531_v35  ;;  %v1475_v33 = vld [vmem:[#allocation13 + $0x38] sm:$0xff]  ;;  %v1660_v18 = vrot.slane %v6701_v32, 2 }
 0x566   : > { %v1661_v48 = vrot.slane %v6701_v32, 3 }
 0x567   : > { %v1524_v46 = vrot.slane %v1516_v19, 4  ;;  %v1538_v51 = vrot.slane %v1537_v39, 2  ;;  %v1534_v12 = vrot.slane %v1533_v61, 1 }
 0x568   : > { %v1494_v47 = vpop.permute.xlu0 %1493 }
 0x569   : > { %v1525_v49 = vadd.f32 %v1524_v46, %v1516_v19  ;;  %v1519_v50 = vmul.f32 %v1494_v47, %v1471_v43  ;;  %v1539_v0 = vadd.f32 %v1538_v51, %v1537_v39  ;;  %v1535_v13 = vadd.f32 %v1534_v12, %v1533_v61 }
 0x56a   : > { %v1663_v61 = vrot.slane %v6701_v32, 5  ;;  %v1664_v12 = vrot.slane %v6701_v32, 6 }
 0x56b   : > { %v1526_v56 = vrot.slane %v1525_v49, 2  ;;  %v1542_v57 = vrot.slane %v1519_v50, 4  ;;  %v1540_v21 = vrot.slane %v1539_v0, 1  ;;  %v1675_v39 = vadd.f32 %v1659_v29, %v1535_v13 }
 0x56c   : > { %v1499_v60 = vpop.permute.xlu0 %1498 }
 0x56d   : > { %v1543_v62 = vadd.f32 %v1542_v57, %v1519_v50  ;;  %v1520_v1 = vmul.f32 %v1499_v60, %v1472_v58  ;;  %v1527_v6 = vadd.f32 %v1526_v56, %v1525_v49  ;;  %v1541_v28 = vadd.f32 %v1540_v21, %v1539_v0 }
 0x56e   : > { %v1662_v56 = vrot.slane %v6701_v32, 4  ;;  %5633 = vtanh.f32 %v1675_v39 }
 0x56f   : > { %v1544_v8 = vrot.slane %v1543_v62, 2  ;;  %v1548_v10 = vrot.slane %v1520_v1, 4  ;;  %v1528_v11 = vrot.slane %v1527_v6, 1  ;;  %v1676_v47 = vadd.f32 %v1660_v18, %v1541_v28 }
 0x570   : > { %v1504_v37 = vpop.permute.xlu0 %1503 }
 0x571   : > { %v1545_v36 = vadd.f32 %v1544_v8, %v1543_v62  ;;  %v1521_v20 = vmul.f32 %v1504_v37, %v1473_v2  ;;  %v1549_v5 = vadd.f32 %v1548_v10, %v1520_v1  ;;  %v1529_v30 = vadd.f32 %v1528_v11, %v1527_v6 }
 0x572   : > { %5635 = vtanh.f32 %v1676_v47 }
 0x573   : > { %v1554_v23 = vrot.slane %v1521_v20, 4  ;;  %v1546_v3 = vrot.slane %v1545_v36, 1  ;;  %v1550_v24 = vrot.slane %v1549_v5, 2  ;;  %v1674_v51 = vadd.f32 %v6701_v32, %v1529_v30 }
 0x574   : > { %v1509_v25 = vpop.permute.xlu0 %1508 }
 0x575   : > { %v1555_v26 = vadd.f32 %v1554_v23, %v1521_v20  ;;  %v1522_v27 = vmul.f32 %v1509_v25, %v1474_v22  ;;  %v1551_v15 = vadd.f32 %v1550_v24, %v1549_v5  ;;  %v1547_v34 = vadd.f32 %v1546_v3, %v1545_v36  ;;  %v5799_v3 = vld [vmem:[#allocation2] sm:$0xff] }
 0x576   : > { %5637 = vtanh.f32 %v1674_v51  ;;  %v1665_v22 = vrot.slane %v6701_v32, 7  ;;  %v1720_v24 = vrot.slane %v5799_v3, 1  ;;  %v1723_v29 = vrot.slane %v5799_v3, 4 }
 0x577   : > { %v1556_v31 = vrot.slane %v1555_v26, 2  ;;  %v1560_v17 = vrot.slane %v1522_v27, 4  ;;  %v1552_v35 = vrot.slane %v1551_v15, 1  ;;  %v1677_v60 = vadd.f32 %v1661_v48, %v1547_v34 }
 0x578   : > { %v1514_v19 = vpop.permute.xlu0 %1513  ;;  %v5634_v23 = vpop.eup %5633  ;;  %v1725_v18 = vrot.slane %v5799_v3, 6 }
 0x579   : > { %v1557_v43 = vadd.f32 %v1556_v31, %v1555_v26  ;;  %v1561_v46 = vadd.f32 %v1560_v17, %v1522_v27  ;;  %v1553_v49 = vadd.f32 %v1552_v35, %v1551_v15  ;;  %v1523_v50 = vmul.f32 %v1514_v19, %v1475_v33 }
 0x57a   : > { %5639 = vtanh.f32 %v1677_v60  ;;  %v1722_v27 = vrot.slane %v5799_v3, 3  ;;  %v1721_v15 = vrot.slane %v5799_v3, 2  ;;  %v1736_v31 = vsel %vm6657_vm1, %v5634_v23, %v1720_v24 }
 0x57b   : > { %v1558_v57 = vrot.slane %v1557_v43, 1  ;;  %v1562_v58 = vrot.slane %v1561_v46, 2  ;;  %v1566_v62 = vrot.slane %v1523_v50, 4  ;;  %v1678_v0 = vadd.f32 %v1662_v56, %v1553_v49 }
 0x57c   : > { %v5636_v25 = vpop.eup %5635  ;;  %v1724_v17 = vrot.slane %v5799_v3, 5  ;;  %v1698_v32 = vrot.slane %v5634_v23, 7  ;;  %v1751_v19 = vrot.slane %v1736_v31, 7  ;;  %v2484_v31 = vld [vmem:[#allocation17 + $0x20] sm:$0xff] }
 0x57d   : > { %v1559_v1 = vadd.f32 %v1558_v57, %v1557_v43  ;;  %v1563_v2 = vadd.f32 %v1562_v58, %v1561_v46  ;;  %v1567_v6 = vadd.f32 %v1566_v62, %v1523_v50  ;;  %5641 = vtanh.f32 %v1678_v0 }
 0x57e   : > { %v1737_v39 = vsel %vm6657_vm1, %v5636_v25, %v1721_v15  ;;  %v1700_v47 = vrot.slane %v5636_v25, 6  ;;  %v1726_v0 = vrot.slane %v5799_v3, 7  ;;  %v2482_v15 = vld [vmem:[#allocation17 + $0x10] sm:$0xff] }
 0x57f   : > { %v1679_v8 = vadd.f32 %v1663_v61, %v1559_v1  ;;  %v1564_v10 = vrot.slane %v1563_v2, 1  ;;  %v1568_v37 = vrot.slane %v1567_v6, 2  ;;  %v1753_v60 = vrot.slane %v1737_v39, 6 }
 0x580   : > { %v5638_v26 = vpop.eup %5637 }
 0x581   : > { %v1565_v36 = vadd.f32 %v1564_v10, %v1563_v2  ;;  %5643 = vtanh.f32 %v1679_v8  ;;  %v1569_v20 = vadd.f32 %v1568_v37, %v1567_v6  ;;  %v1735_v34 = vsel %vm6657_vm1, %v5638_v26, %v5799_v3 }
 0x582   : > { %v1699_v48 = vsel %vm1256_vm2, %v1698_v32, %v5638_v26  ;;  %v1752_v51 = vsel %vm1256_vm2, %v1751_v19, %v1735_v34  ;;  %v2487_v32 = vld [vmem:[#allocation17 + $0x38] sm:$0xff]  ;;  %v2489_v19 = vld [vmem:[#allocation17 + $0x48] sm:$0xff] }
 0x583   : > { %v1680_v21 = vadd.f32 %v1664_v12, %v1565_v36  ;;  %v1570_v5 = vrot.slane %v1569_v20, 1  ;;  %v1701_v1 = vsel %vm1258_vm3, %v1700_v47, %v1699_v48  ;;  %v1754_v8 = vsel %vm1258_vm3, %v1753_v60, %v1752_v51  ;;  %v2492_v48 = vld [vmem:[#allocation17 + $0x60] sm:$0xff]  ;;  %v2494_v51 = vld [vmem:[#allocation17 + $0x70] sm:$0xff] }
 0x584   : > { %v5640_v28 = vpop.eup %5639 }
 0x585   : > { %5645 = vtanh.f32 %v1680_v21  ;;  %v1571_v11 = vadd.f32 %v1570_v5, %v1569_v20  ;;  %v1738_v35 = vsel %vm6657_vm1, %v5640_v28, %v1722_v27  ;;  %v1702_v49 = vrot.slane %v5640_v28, 5  ;;  %v2481_v27 = vld [vmem:[#allocation17 + $0x8] sm:$0xff] }
 0x586   : > { %v1755_v56 = vrot.slane %v1738_v35, 5  ;;  %v5208_v28 = vpack.c.bf16 %v2481_v27, %v2480_v7  ;;  %v2488_v35 = vld [vmem:[#allocation17 + $0x40] sm:$0xff] }
 0x587   : > { %v1681_v13 = vadd.f32 %v1665_v22, %v1571_v11  ;;  %v5642_v30 = vpop.eup %5641  ;;  %v1703_v10 = vsel %vm1260_vm4, %v1702_v49, %v1701_v1  ;;  %v5220_v39 = vpack.c.bf16 %v2489_v19, %v2488_v35  ;;  %v2493_v49 = vld [vmem:[#allocation17 + $0x68] sm:$0xff] }
 0x588   : > { %v1739_v43 = vsel %vm6657_vm1, %v5642_v30, %v1723_v29  ;;  %v1704_v57 = vrot.slane %v5642_v30, 4  ;;  %v1756_v36 = vsel %vm1260_vm4, %v1755_v56, %v1754_v8  ;;  %v2483_v29 = vld [vmem:[#allocation17 + $0x18] sm:$0xff]  ;;  %v2061_v19 = vld [vmem:[#allocation11 + $0x8] sm:$0xff] }
 0x589   : > { %5647 = vtanh.f32 %v1681_v13  ;;  %v1757_v61 = vrot.slane %v1739_v43, 4  ;;  %v5211_v30 = vpack.c.bf16 %v2483_v29, %v2482_v15  ;;  %v2490_v43 = vld [vmem:[#allocation17 + $0x50] sm:$0xff]  ;;  %v2495_v56 = vld [vmem:[#allocation17 + $0x78] sm:$0xff] }
 0x58a   : > { %v1705_v20 = vsel %vm1262_vm5, %v1704_v57, %v1703_v10  ;;  %v5229_v57 = vpack.c.bf16 %v2495_v56, %v2494_v51 }
 0x58b   : > { %v5644_v33 = vpop.eup %5643  ;;  %v1758_v21 = vsel %vm1262_vm5, %v1757_v61, %v1756_v36 }
 0x58c   : > { %v1740_v50 = vsel %vm6657_vm1, %v5644_v33, %v1724_v17  ;;  %v1706_v62 = vrot.slane %v5644_v33, 3  ;;  %v2485_v17 = vld [vmem:[#allocation17 + $0x28] sm:$0xff] }
 0x58d   : > { %v1759_v2 = vrot.slane %v1740_v50, 3  ;;  %v5214_v33 = vpack.c.bf16 %v2485_v17, %v2484_v31  ;;  %v5226_v50 = vpack.c.bf16 %v2493_v49, %v2492_v48  ;;  %v2062_v48 = vld [vmem:[#allocation11 + $0x10] sm:$0xff] }
 0x58e   : > { %v1707_v5 = vsel %vm1264_vm6, %v1706_v62, %v1705_v20 }
 0x58f   : > { %v5646_v46 = vpop.eup %5645  ;;  %v1760_v23 = vsel %vm1264_vm6, %v1759_v2, %v1758_v21 }
 0x590   : > { %v1741_v58 = vsel %vm6657_vm1, %v5646_v46, %v1725_v18  ;;  %v1708_v6 = vrot.slane %v5646_v46, 2  ;;  %v2486_v18 = vld [vmem:[#allocation17 + $0x30] sm:$0xff]  ;;  %v2491_v46 = vld [vmem:[#allocation17 + $0x58] sm:$0xff] }
 0x591   : > { %v1761_v37 = vrot.slane %v1741_v58, 2  ;;  %v5217_v34 = vpack.c.bf16 %v2487_v32, %v2486_v18  ;;  %v5223_v47 = vpack.c.bf16 %v2491_v46, %v2490_v43  ;;  %v2060_v18 = vld [vmem:[#allocation11] sm:$0xff] }
 0x592   : > { %v1709_v3 = vsel %vm1266_vm7, %v1708_v6, %v1707_v5 }
 0x593   : > { %v5648_v12 = vpop.eup %5647  ;;  %v1762_v25 = vsel %vm1266_vm7, %v1761_v37, %v1760_v23 }
 0x594   : > { %v1710_v22 = vrot.slane %v5648_v12, 1  ;;  %v1742_v11 = vsel %vm6657_vm1, %v5648_v12, %v1726_v0 }
 0x595   : > { %v1763_v24 = vrot.slane %v1742_v11, 1 }
 0x596   : > { %v1711_v13 = vsel %vm1268_vm8, %v1710_v22, %v1709_v3 }
 0x597   : > { %1713 = vst [vmem:[%s6591_s2] sm:$0xff] %v1711_v13  ;;  %v6791_v26 = vsel %vm1268_vm8, %v1763_v24, %v1762_v25  ;;  %v1770_v24 = vld [vmem:[#allocation3] sm:$0xff] }
 0x598   : > { %1905 = vmatmul.mubr.f32.vlgmr.msra.gmra.mrb[2].mxu0 %v6791_v26  ;;  %1976 = vmatmul.mubr.f32.vlgmr.msra.gmra.mrb[2].mxu1 %v6791_v26 }
 0x599   : > { %4918 = vmatprep.mubr.msk.f32.mxu1 %vm6197_vm0, %v6195_v9  ;;  %2813 = vmatprep.mubr.f32.mxu0 %v6195_v9 }
 0x59a   : > { %5209 = vmatpush3.bf16.msra.mxu1 %v5208_v28 }
 0x59b   : > { %5210 = vmatprep.subr.bf16.mxu1 %v6196_v14 }
 0x59e   : > { %5212 = vmatpush3.bf16.msra.mxu1 %v5211_v30 }
 0x59f   : > { %5213 = vmatprep.subr.bf16.mxu1 %v6196_v14 }
 0x5a2   : > { %5215 = vmatpush3.bf16.msra.mxu1 %v5214_v33 }
 0x5a3   : > { %5216 = vmatprep.subr.bf16.mxu1 %v6196_v14 }
 0x5a6   : > { %5218 = vmatpush3.bf16.msra.mxu1 %v5217_v34 }
 0x5a7   : > { %5219 = vmatprep.subr.bf16.mxu1 %v6196_v14 }
 0x5aa   : > { %5221 = vmatpush3.bf16.msra.mxu1 %v5220_v39 }
 0x5ab   : > { %5222 = vmatprep.subr.bf16.mxu1 %v6196_v14 }
 0x5ae   : > { %5224 = vmatpush3.bf16.msra.mxu1 %v5223_v47 }
 0x5af   : > { %5225 = vmatprep.subr.bf16.mxu1 %v6196_v14 }
 0x5b2   : > { %5227 = vmatpush3.bf16.msra.mxu1 %v5226_v50 }
 0x5b3   : > { %5228 = vmatprep.subr.bf16.mxu1 %v6196_v14 }
 0x5b6   : > { %5230 = vmatpush3.bf16.msra.mxu1 %v5229_v57 }
 0x66b   : > { %v1906_v58 = vpop.f32.mrb[2].mxu0  ;;  %v1977_v60 = vpop.f32.mrb[2].mxu1 }
 0x66c   : > { %v5409_v61 = vadd.f32 %v1906_v58, %v6632_v41  ;;  %v1908_v62 = vpop.f32.mrb[3].mxu0  ;;  %v1979_v0 = vpop.f32.mrb[3].mxu1  ;;  %v5417_v37 = vadd.f32 %v1977_v60, %v6650_v55  ;;  %v2064_v58 = vld [vmem:[#allocation11 + $0x20] sm:$0xff] }
 0x66d   : > { %v5410_v1 = vadd.f32 %v1908_v62, %v6635_v42  ;;  %v5418_v8 = vadd.f32 %v1979_v0, %v6643_v52  ;;  %v2063_v0 = vld [vmem:[#allocation11 + $0x18] sm:$0xff] }
 0x66e   : > { %v4759_v2 = vmul.f32 -1.442695, %v5409_v61 }
 0x66f   : > { %v4760_v6 = vmul.f32 -1.442695, %v5410_v1  ;;  %v4761_v10 = vmul.f32 -1.442695, %v5418_v8  ;;  %v2065_v8 = vld [vmem:[#allocation11 + $0x28] sm:$0xff] }
 0x670   : > { %5649 = vpow2.f32 %v4759_v2 }
 0x671   : > { %5651 = vpow2.f32 %v4760_v6 }
 0x672   : > { %5653 = vpow2.f32 %v4761_v10 }
 0x673   : > { %5655 = vtanh.f32 %v5417_v37 }
 0x67a   : > { %v5650_v12 = vpop.eup %5649 }
 0x67b   : > { %v5652_v36 = vpop.eup %5651  ;;  %v1989_v20 = vadd.f32 1.0, %v5650_v12 }
 0x67c   : > { %v1995_v21 = vadd.f32 1.0, %v5652_v36  ;;  %v5654_v5 = vpop.eup %5653  ;;  %v2066_v36 = vld [vmem:[#allocation11 + $0x30] sm:$0xff] }
 0x67d   : > { %5657 = vrcp.f32 %v1989_v20  ;;  %v5656_v22 = vpop.eup %5655  ;;  %v2002_v25 = vadd.f32 1.0, %v5654_v5  ;;  %v2067_v5 = vld [vmem:[#allocation11 + $0x38] sm:$0xff] }
 0x67e   : > { %5659 = vrcp.f32 %v1995_v21 }
 0x67f   : > { %5661 = vrcp.f32 %v2002_v25 }
 0x687   : > { %v5658_v11 = vpop.eup %5657 }
 0x688   : > { %v5660_v23 = vpop.eup %5659  ;;  %v2006_v3 = vmul.f32 %v5658_v11, %v5656_v22 }
 0x689   : > { %v2005_v13 = vmul.f32 %v5660_v23, %v1770_v24  ;;  %v5662_v27 = vpop.eup %5661 }
 0x68b   : > { %v6809_v7 = vadd.f32 %v2006_v3, %v2005_v13 }
 0x68d   : > { %5663 = vtanh.f32 %v6809_v7 }
 0x697   : > { %v5664_v28 = vpop.eup %5663 }
 0x698   : > { %v2009_v15 = vmul.f32 %v5664_v28, %v5662_v27 }
 0x69a   : > { %4919 = vmatmul.mubr.f32.vlgmr.msra.gmra.mrb[8].mxu1 %v2009_v15  ;;  %v2018_v29 = vrot.slane %v2009_v15, %v6664_v16  ;;  %v2011_v30 = vcombine.high %v2009_v15, %v2009_v15 }
 0x69b   : > { %2884 = vmatprep.mubr.f32.mxu1 %v6195_v9 }
 0x69c   : > { %v2034_v31 = vrot.slane %v2018_v29, %v6664_v16  ;;  %v2026_v17 = vcombine.high %v2018_v29, %v2018_v29  ;;  %v2025_v33 = vrot.slane %v2011_v30, %v6664_v16 }
 0x69e   : > { %v2071_v32 = vrot.slane %v2034_v31, %v6623_v38  ;;  %v2048_v34 = vrot.slane %v2026_v17, %v6664_v16  ;;  %v2056_v35 = vcombine.high %v2034_v31, %v2034_v31  ;;  %v2041_v47 = vrot.slane %v2025_v33, %v6664_v16 }
 0x69f   : > { %v2027_v57 = vcombine.high %v2025_v33, %v2025_v33 }
 0x6a0   : > { %v2108_v39 = vmul.f32 %v2071_v32, %v2060_v18  ;;  %v2075_v43 = vrot.slane %v2048_v34, %v6623_v38  ;;  %v2079_v46 = vrot.slane %v2056_v35, %v6623_v38  ;;  %v2087_v51 = vrot.slane %v2041_v47, %v6623_v38 }
 0x6a1   : > { %v2058_v56 = vcombine.high %v2048_v34, %v2048_v34  ;;  %v2055_v62 = vrot.slane %v2027_v57, %v6664_v16  ;;  %v2057_v6 = vcombine.high %v2041_v47, %v2041_v47 }
 0x6a2   : > { %2116 = vadd.xlane.f32.xlu1 %v2108_v39  ;;  %v2109_v49 = vmul.f32 %v2075_v43, %v2061_v19  ;;  %v2110_v50 = vmul.f32 %v2079_v46, %v2062_v48  ;;  %v2112_v60 = vmul.f32 %v2087_v51, %v2064_v58 }
 0x6a3   : > { %v2083_v61 = vrot.slane %v2058_v56, %v6623_v38  ;;  %v2091_v2 = vrot.slane %v2055_v62, %v6623_v38  ;;  %v2095_v37 = vrot.slane %v2057_v6, %v6623_v38  ;;  %v2059_v12 = vcombine.high %v2055_v62, %v2055_v62 }
 0x6a4   : > { %2118 = vadd.xlane.f32.xlu0 %v2109_v49 }
 0x6a5   : > { %v2111_v1 = vmul.f32 %v2083_v61, %v2063_v0  ;;  %v2113_v10 = vmul.f32 %v2091_v2, %v2065_v8  ;;  %v2114_v20 = vmul.f32 %v2095_v37, %v2066_v36  ;;  %v2099_v21 = vrot.slane %v2059_v12, %v6623_v38 }
 0x6a6   : > { %2120 = vadd.xlane.f32.xlu1 %v2110_v50 }
 0x6a7   : > { %v2115_v22 = vmul.f32 %v2099_v21, %v2067_v5 }
 0x6aa   : > { %2124 = vadd.xlane.f32.xlu1 %v2112_v60 }
 0x6ae   : > { %2122 = vadd.xlane.f32.xlu1 %v2111_v1 }
 0x6b2   : > { %2126 = vadd.xlane.f32.xlu1 %v2113_v10 }
 0x6b6   : > { %2128 = vadd.xlane.f32.xlu1 %v2114_v20 }
 0x6ba   : > { %2130 = vadd.xlane.f32.xlu1 %v2115_v22 }
 0x72f   : > { %v2117_v11 = vpop.xlane.xlu1 %2116 }
 0x730   : > { %v2143_v27 = vrot.slane %v2117_v11, %v6683_v4 }
 0x731   : > { %v2119_v24 = vpop.xlane.xlu0 %2118 }
 0x732   : > { %v2147_v13 = vrot.slane %v2119_v24, %v6683_v4 }
 0x733   : > { %v2121_v23 = vpop.xlane.xlu1 %2120 }
 0x734   : > { %v2151_v28 = vrot.slane %v2121_v23, %v6683_v4  ;;  %v2172_v29 = vsel %vm1256_vm2, %v2147_v13, %v2143_v27 }
 0x736   : > { %v2173_v31 = vsel %vm1258_vm3, %v2151_v28, %v2172_v29 }
 0x737   : > { %v2125_v3 = vpop.xlane.xlu1 %2124 }
 0x738   : > { %v2159_v32 = vrot.slane %v2125_v3, %v6683_v4 }
 0x73b   : > { %v2123_v25 = vpop.xlane.xlu1 %2122 }
 0x73c   : > { %v2155_v30 = vrot.slane %v2123_v25, %v6683_v4 }
 0x73e   : > { %v2174_v33 = vsel %vm1260_vm4, %v2155_v30, %v2173_v31 }
 0x73f   : > { %v2127_v15 = vpop.xlane.xlu1 %2126  ;;  %v2175_v19 = vsel %vm1262_vm5, %v2159_v32, %v2174_v33 }
 0x740   : > { %v2163_v18 = vrot.slane %v2127_v15, %v6683_v4 }
 0x742   : > { %v2176_v43 = vsel %vm1264_vm6, %v2163_v18, %v2175_v19 }
 0x743   : > { %v2129_v17 = vpop.xlane.xlu1 %2128 }
 0x744   : > { %v2167_v34 = vrot.slane %v2129_v17, %v6683_v4 }
 0x746   : > { %v2177_v46 = vsel %vm1266_vm7, %v2167_v34, %v2176_v43 }
 0x747   : > { %v2131_v35 = vpop.xlane.xlu1 %2130 }
 0x748   : > { %v2171_v39 = vrot.slane %v2131_v35, %v6683_v4 }
 0x74a   : > { %v2178_v47 = vsel %vm1268_vm8, %v2171_v39, %v2177_v46 }
 0x74b   : > { %v2180_v48 = vsel %vm1271_vm9, %v2178_v47, -inf }
 0x74c   : > { %2181 = vmax.xlane.f32.xlu1 %v2180_v48 }
 0x76d   : > { %v6843_v49 = vpop.f32.mrb[8].mxu1 }
 0x76e   : > { %v4920_v50 = vpop.f32.mrb[9].mxu1 }
 0x7d9   : > { %v2182_v51 = vpop.xlane.xlu1 %2181 }
 0x7da   : > { %v2187_v56 = vrot.slane %v2182_v51, %v6623_v38  ;;  %v2191_v57 = vrot.slane %v2182_v51, %v6629_v40  ;;  %v2195_v58 = vrot.slane %v2182_v51, %v6646_v53  ;;  %v2203_v60 = vrot.slane %v2182_v51, %v6707_v45 }
 0x7db   : > { %v2199_v61 = vrot.slane %v2182_v51, %v6638_v44  ;;  %v2211_v2 = vrot.slane %v2182_v51, %v6715_v59  ;;  %v2207_v37 = vrot.slane %v2182_v51, %v6711_v54  ;;  %v2215_v5 = vrot.slane %v2182_v51, %v6719_v63 }
 0x7dc   : > { %v2224_v62 = vsub.f32 %v2117_v11, %v2187_v56  ;;  %v2225_v0 = vsub.f32 %v2119_v24, %v2191_v57  ;;  %v2226_v1 = vsub.f32 %v2121_v23, %v2195_v58  ;;  %v2228_v6 = vsub.f32 %v2125_v3, %v2203_v60 }
 0x7dd   : > { %v2227_v12 = vsub.f32 %v2123_v25, %v2199_v61  ;;  %v2230_v20 = vsub.f32 %v2129_v17, %v2211_v2  ;;  %v2229_v22 = vsub.f32 %v2127_v15, %v2207_v37  ;;  %v2231_v24 = vsub.f32 %v2131_v35, %v2215_v5 }
 0x7de   : > { %v2232_v8 = vmul.f32 1.442695, %v2224_v62  ;;  %v2234_v10 = vmul.f32 1.442695, %v2225_v0  ;;  %v2236_v36 = vmul.f32 1.442695, %v2226_v1 }
 0x7df   : > { %v2240_v21 = vmul.f32 1.442695, %v2228_v6  ;;  %v2238_v11 = vmul.f32 1.442695, %v2227_v12  ;;  %v2244_v23 = vmul.f32 1.442695, %v2230_v20 }
 0x7e0   : > { %5665 = vpow2.f32 %v2232_v8  ;;  %v2242_v3 = vmul.f32 1.442695, %v2229_v22  ;;  %v2246_v25 = vmul.f32 1.442695, %v2231_v24 }
 0x7e1   : > { %5667 = vpow2.f32 %v2234_v10 }
 0x7e2   : > { %5669 = vpow2.f32 %v2236_v36 }
 0x7e3   : > { %5671 = vpow2.f32 %v2240_v21 }
 0x7e4   : > { %5673 = vpow2.f32 %v2238_v11 }
 0x7e5   : > { %5675 = vpow2.f32 %v2244_v23 }
 0x7e6   : > { %5677 = vpow2.f32 %v2242_v3 }
 0x7e7   : > { %5679 = vpow2.f32 %v2246_v25 }
 0x7ea   : > { %v5666_v13 = vpop.eup %5665 }
 0x7eb   : > { %v5668_v27 = vpop.eup %5667  ;;  %2257 = vperm.xlu1 %5597, %v5666_v13  }
 0x7ec   : > { %2260 = vperm.xlu0 %5598, %v5668_v27   ;;  %v5670_v28 = vpop.eup %5669 }
 0x7ed   : > { %v5672_v29 = vpop.eup %5671 }
 0x7ee   : > { %v5674_v15 = vpop.eup %5673 }
 0x7ef   : > { %2263 = vperm.xlu1 %5597, %v5670_v28   ;;  %v5676_v30 = vpop.eup %5675 }
 0x7f0   : > { %2269 = vperm.xlu0 %5598, %v5672_v29   ;;  %v5678_v31 = vpop.eup %5677 }
 0x7f1   : > { %v5680_v17 = vpop.eup %5679 }
 0x7f3   : > { %2266 = vperm.xlu1 %5597, %v5674_v15  }
 0x7f4   : > { %2275 = vperm.xlu0 %5598, %v5676_v30  }
 0x7f7   : > { %2272 = vperm.xlu1 %5597, %v5678_v31  }
 0x7fb   : > { %2278 = vperm.xlu1 %5597, %v5680_v17  }
 0x86a   : > { %v2258_v33 = vpop.permute.xlu1 %2257 }
 0x86b   : > { %v2261_v18 = vpop.permute.xlu0 %2260  ;;  %v2283_v35 = vrot.slane %v2258_v33, %v6683_v4 }
 0x86c   : > { %v2287_v34 = vrot.slane %v2261_v18, %v6683_v4 }
 0x86e   : > { %v2264_v32 = vpop.permute.xlu1 %2263  ;;  %v2312_v46 = vsel %vm1256_vm2, %v2287_v34, %v2283_v35 }
 0x86f   : > { %v2291_v19 = vrot.slane %v2264_v32, %v6683_v4  ;;  %v2270_v39 = vpop.permute.xlu0 %2269 }
 0x870   : > { %v2299_v51 = vrot.slane %v2270_v39, %v6683_v4  ;;  %v2690_v39 = vld [vmem:[#allocation16 + $0x28] sm:$0xff] }
 0x871   : > { %v2313_v48 = vsel %vm1258_vm3, %v2291_v19, %v2312_v46  ;;  %v2686_v19 = vld [vmem:[#allocation16 + $0x8] sm:$0xff]  ;;  %v2692_v46 = vld [vmem:[#allocation16 + $0x38] sm:$0xff] }
 0x872   : > { %v2267_v43 = vpop.permute.xlu1 %2266 }
 0x873   : > { %v2295_v47 = vrot.slane %v2267_v43, %v6683_v4  ;;  %v2276_v57 = vpop.permute.xlu0 %2275  ;;  %v5231_v43 = vpack.c.bf16 %v2690_v39, %v2686_v19  ;;  %v2711_v19 = vld [vmem:[#allocation16 + $0xd0] sm:$0xff] }
 0x874   : > { %v2307_v62 = vrot.slane %v2276_v57, %v6683_v4  ;;  %v2698_v57 = vld [vmem:[#allocation16 + $0x68] sm:$0xff]  ;;  %v2715_v39 = vld [vmem:[#allocation16 + $0xf0] sm:$0xff] }
 0x875   : > { %v2314_v50 = vsel %vm1260_vm4, %v2295_v47, %v2313_v48  ;;  %v2685_v47 = vld [vmem:[#allocation16] sm:$0xff]  ;;  %5232 = vmatprep.subr.bf16.mxu0 %v5231_v43  ;;  %v2718_v43 = vld [vmem:[#allocation16 + $0x108] sm:$0xff] }
 0x876   : > { %v2273_v56 = vpop.permute.xlu1 %2272  ;;  %v2315_v60 = vsel %vm1262_vm5, %v2299_v51, %v2314_v50  ;;  %v2687_v51 = vld [vmem:[#allocation16 + $0x10] sm:$0xff] }
 0x877   : > { %v2303_v58 = vrot.slane %v2273_v56, %v6683_v4 }
 0x879   : > { %v2316_v61 = vsel %vm1264_vm6, %v2303_v58, %v2315_v60  ;;  %v2696_v58 = vld [vmem:[#allocation16 + $0x58] sm:$0xff] }
 0x87a   : > { %v2279_v0 = vpop.permute.xlu1 %2278  ;;  %v2317_v2 = vsel %vm1266_vm7, %v2307_v62, %v2316_v61  ;;  %v2700_v60 = vld [vmem:[#allocation16 + $0x78] sm:$0xff]  ;;  %v2693_v61 = vld [vmem:[#allocation16 + $0x40] sm:$0xff] }
 0x87b   : > { %v2311_v1 = vrot.slane %v2279_v0, %v6683_v4  ;;  %v2697_v62 = vld [vmem:[#allocation16 + $0x60] sm:$0xff]  ;;  %v5267_v0 = vpack.c.bf16 %v2700_v60, %v2696_v58  ;;  %v2730_v60 = vld [vmem:[#allocation16 + $0x168] sm:$0xff] }
 0x87d   : > { %v2318_v6 = vsel %vm1268_vm8, %v2311_v1, %v2317_v2  ;;  %v5237_v1 = vpack.c.bf16 %v2697_v62, %v2693_v61  ;;  %v2695_v2 = vld [vmem:[#allocation16 + $0x50] sm:$0xff]  ;;  %v2728_v61 = vld [vmem:[#allocation16 + $0x158] sm:$0xff] }
 0x87e   : > { %v2320_v8 = vsel %vm1271_vm9, %v2318_v6, 0.0  ;;  %v2699_v6 = vld [vmem:[#allocation16 + $0x70] sm:$0xff] }
 0x87f   : > { %2321 = vadd.xlane.f32.xlu0 %v2320_v8  ;;  %v5269_v8 = vpack.c.bf16 %v2699_v6, %v2695_v2  ;;  %v2729_v2 = vld [vmem:[#allocation16 + $0x160] sm:$0xff] }
 0x90c   : > { %v2322_v10 = vpop.xlane.xlu0 %2321 }
 0x90d   : > { %5681 = vrcp.f32 %v2322_v10 }
 0x917   : > { %v5682_v37 = vpop.eup %5681 }
 0x918   : > { %v2324_v12 = vmul.f32 %v5682_v37, %v2322_v10  ;;  %v2702_v10 = vld [vmem:[#allocation16 + $0x88] sm:$0xff] }
 0x91a   : > { %v2325_v36 = vsub.f32 2.0, %v2324_v12  ;;  %v2704_v12 = vld [vmem:[#allocation16 + $0x98] sm:$0xff] }
 0x91c   : > { %v2326_v20 = vmul.f32 %v5682_v37, %v2325_v36  ;;  %v2706_v37 = vld [vmem:[#allocation16 + $0xa8] sm:$0xff] }
 0x91d   : > { %v5239_v36 = vpack.c.bf16 %v2706_v37, %v2702_v10  ;;  %v2727_v10 = vld [vmem:[#allocation16 + $0x150] sm:$0xff] }
 0x91e   : > { %v2335_v21 = vrot.slane %v2326_v20, %v6629_v40  ;;  %v2339_v22 = vrot.slane %v2326_v20, %v6646_v53  ;;  %v2331_v23 = vrot.slane %v2326_v20, %v6623_v38  ;;  %v2343_v3 = vrot.slane %v2326_v20, %v6638_v44  ;;  %v2731_v37 = vld [vmem:[#allocation16 + $0x170] sm:$0xff] }
 0x91f   : > { %v2347_v33 = vrot.slane %v2326_v20, %v6707_v45  ;;  %v2351_v32 = vrot.slane %v2326_v20, %v6711_v54  ;;  %v2355_v34 = vrot.slane %v2326_v20, %v6715_v59  ;;  %v2359_v35 = vrot.slane %v2326_v20, %v6719_v63  ;;  %v2708_v20 = vld [vmem:[#allocation16 + $0xb8] sm:$0xff] }
 0x920   : > { %v2369_v5 = vmul.f32 %v5668_v27, %v2335_v21  ;;  %v2370_v11 = vmul.f32 %v5670_v28, %v2339_v22  ;;  %v2368_v24 = vmul.f32 %v5666_v13, %v2331_v23  ;;  %v2371_v25 = vmul.f32 %v5674_v15, %v2343_v3  ;;  %v2688_v15 = vld [vmem:[#allocation16 + $0x18] sm:$0xff]  ;;  %v2701_v21 = vld [vmem:[#allocation16 + $0x80] sm:$0xff]  ;;  %v2703_v23 = vld [vmem:[#allocation16 + $0x90] sm:$0xff] }
 0x921   : > { %v2372_v18 = vmul.f32 %v5672_v29, %v2347_v33  ;;  %v2373_v27 = vmul.f32 %v5678_v31, %v2351_v32  ;;  %v2374_v28 = vmul.f32 %v5676_v30, %v2355_v34  ;;  %v2375_v13 = vmul.f32 %v5680_v17, %v2359_v35  ;;  %v2689_v29 = vld [vmem:[#allocation16 + $0x20] sm:$0xff]  ;;  %v2691_v31 = vld [vmem:[#allocation16 + $0x30] sm:$0xff]  ;;  %v2694_v30 = vld [vmem:[#allocation16 + $0x48] sm:$0xff] }
 0x922   : > { %2391 = vperm.xlu1 %5597, %v2369_v5   ;;  %v5263_v48 = vpack.c.bf16 %v2692_v46, %v2688_v15  ;;  %v5233_v50 = vpack.c.bf16 %v2689_v29, %v2685_v47  ;;  %v5265_v56 = vpack.c.bf16 %v2691_v31, %v2687_v51  ;;  %v5235_v17 = vpack.c.bf16 %v2698_v57, %v2694_v30  ;;  %v2705_v5 = vld [vmem:[#allocation16 + $0xa0] sm:$0xff]  ;;  %v2714_v33 = vld [vmem:[#allocation16 + $0xe8] sm:$0xff]  ;;  %v2720_v47 = vld [vmem:[#allocation16 + $0x118] sm:$0xff] }
 0x923   : > { %v5271_v22 = vpack.c.bf16 %v2708_v20, %v2704_v12  ;;  %v2709_v34 = vld [vmem:[#allocation16 + $0xc0] sm:$0xff]  ;;  %v5277_v15 = vpack.c.bf16 %v2715_v39, %v2711_v19  ;;  %v2722_v46 = vld [vmem:[#allocation16 + $0x128] sm:$0xff]  ;;  %v2719_v30 = vld [vmem:[#allocation16 + $0x110] sm:$0xff]  ;;  %v5285_v12 = vpack.c.bf16 %v2731_v37, %v2727_v10 }
 0x924   : > { %5264 = vmatprep.subr.bf16.mxu1 %v5263_v48  ;;  %5234 = vmatpush1.bf16.msra.mxu0 %v5233_v50  ;;  %v5247_v29 = vpack.c.bf16 %v2722_v46, %v2718_v43  ;;  %v2724_v48 = vld [vmem:[#allocation16 + $0x138] sm:$0xff]  ;;  %v2717_v50 = vld [vmem:[#allocation16 + $0x100] sm:$0xff]  ;;  %v2723_v57 = vld [vmem:[#allocation16 + $0x130] sm:$0xff] }
 0x925   : > { %5266 = vmatpush1.bf16.msra.mxu1 %v5265_v56  ;;  %5236 = vmatprep.subr.bf16.mxu0 %v5235_v17  ;;  %v2721_v51 = vld [vmem:[#allocation16 + $0x120] sm:$0xff]  ;;  %v5279_v31 = vpack.c.bf16 %v2724_v48, %v2720_v47  ;;  %v5281_v58 = vpack.c.bf16 %v2723_v57, %v2719_v30  ;;  %v2726_v17 = vld [vmem:[#allocation16 + $0x148] sm:$0xff]  ;;  %v2743_v43 = vld [vmem:[#allocation16 + $0x1d0] sm:$0xff] }
 0x926   : > { %2396 = vperm.xlu1 %5597, %v2370_v11   ;;  %5268 = vmatprep.subr.bf16.mxu1 %v5267_v0  ;;  %v5241_v11 = vpack.c.bf16 %v2705_v5, %v2701_v21  ;;  %v5249_v56 = vpack.c.bf16 %v2721_v51, %v2717_v50  ;;  %v5251_v62 = vpack.c.bf16 %v2730_v60, %v2726_v17  ;;  %v2732_v0 = vld [vmem:[#allocation16 + $0x178] sm:$0xff]  ;;  %v2738_v20 = vld [vmem:[#allocation16 + $0x1a8] sm:$0xff]  ;;  %v2745_v19 = vld [vmem:[#allocation16 + $0x1e0] sm:$0xff] }
 0x927   : > { %v5283_v6 = vpack.c.bf16 %v2732_v0, %v2728_v61  ;;  %v2736_v21 = vld [vmem:[#allocation16 + $0x198] sm:$0xff]  ;;  %v2747_v46 = vld [vmem:[#allocation16 + $0x1f0] sm:$0xff]  ;;  %v2376_v57 = vld [vmem:[#allocation13] sm:$0xff] }
 0x928   : > { %5238 = vmatpush1.bf16.msra.mxu0 %v5237_v1  ;;  %v2725_v1 = vld [vmem:[#allocation16 + $0x140] sm:$0xff]  ;;  %v5293_v47 = vpack.c.bf16 %v2747_v46, %v2743_v43  ;;  %v2378_v51 = vld [vmem:[#allocation13 + $0x10] sm:$0xff]  ;;  %v2379_v0 = vld [vmem:[#allocation13 + $0x18] sm:$0xff] }
 0x929   : > { %5270 = vmatpush1.bf16.msra.mxu1 %v5269_v8  ;;  %5240 = vmatprep.subr.bf16.mxu0 %v5239_v36  ;;  %v5253_v8 = vpack.c.bf16 %v2729_v2, %v2725_v1  ;;  %v2734_v36 = vld [vmem:[#allocation16 + $0x188] sm:$0xff] }
 0x92a   : > { %2386 = vperm.xlu1 %5597, %v2368_v24   ;;  %v2707_v24 = vld [vmem:[#allocation16 + $0xb0] sm:$0xff]  ;;  %5272 = vmatprep.subr.bf16.mxu1 %v5271_v22  ;;  %v5255_v5 = vpack.c.bf16 %v2738_v20, %v2734_v36  ;;  %v2740_v22 = vld [vmem:[#allocation16 + $0x1b8] sm:$0xff]  ;;  %v2380_v20 = vld [vmem:[#allocation13 + $0x20] sm:$0xff] }
 0x92b   : > { %v5273_v3 = vpack.c.bf16 %v2707_v24, %v2703_v23  ;;  %v2737_v23 = vld [vmem:[#allocation16 + $0x1a0] sm:$0xff]  ;;  %v5287_v24 = vpack.c.bf16 %v2740_v22, %v2736_v21 }
 0x92c   : > { %5242 = vmatpush1.bf16.msra.mxu0 %v5241_v11  ;;  %v2733_v11 = vld [vmem:[#allocation16 + $0x180] sm:$0xff] }
 0x92d   : > { %5274 = vmatpush1.bf16.msra.mxu1 %v5273_v3  ;;  %v5257_v3 = vpack.c.bf16 %v2737_v23, %v2733_v11 }
 0x92e   : > { %2401 = vperm.xlu1 %5597, %v2371_v25   ;;  %v2710_v25 = vld [vmem:[#allocation16 + $0xc8] sm:$0xff] }
 0x92f   : > { %v5243_v32 = vpack.c.bf16 %v2714_v33, %v2710_v25  ;;  %v2735_v25 = vld [vmem:[#allocation16 + $0x190] sm:$0xff] }
 0x930   : > { %v2739_v33 = vld [vmem:[#allocation16 + $0x1b0] sm:$0xff] }
 0x931   : > { %5244 = vmatprep.subr.bf16.mxu0 %v5243_v32  ;;  %v2742_v32 = vld [vmem:[#allocation16 + $0x1c8] sm:$0xff] }
 0x932   : > { %2406 = vperm.xlu1 %5597, %v2372_v18   ;;  %v2712_v18 = vld [vmem:[#allocation16 + $0xd8] sm:$0xff] }
 0x936   : > { %2411 = vperm.xlu1 %5597, %v2373_v27   ;;  %v2716_v27 = vld [vmem:[#allocation16 + $0xf8] sm:$0xff] }
 0x937   : > { %v5275_v35 = vpack.c.bf16 %v2716_v27, %v2712_v18  ;;  %v5289_v18 = vpack.c.bf16 %v2739_v33, %v2735_v25  ;;  %v2746_v27 = vld [vmem:[#allocation16 + $0x1e8] sm:$0xff] }
 0x939   : > { %5276 = vmatprep.subr.bf16.mxu1 %v5275_v35  ;;  %v2748_v35 = vld [vmem:[#allocation16 + $0x1f8] sm:$0xff] }
 0x93a   : > { %2416 = vperm.xlu1 %5597, %v2374_v28   ;;  %v2713_v28 = vld [vmem:[#allocation16 + $0xe0] sm:$0xff]  ;;  %5278 = vmatpush1.bf16.msra.mxu1 %v5277_v15 }
 0x93b   : > { %5280 = vmatprep.subr.bf16.mxu1 %v5279_v31 }
 0x93e   : > { %2421 = vperm.xlu1 %5597, %v2375_v13   ;;  %v5245_v13 = vpack.c.bf16 %v2713_v28, %v2709_v34  ;;  %5282 = vmatpush1.bf16.msra.mxu1 %v5281_v58  ;;  %v2744_v34 = vld [vmem:[#allocation16 + $0x1d8] sm:$0xff]  ;;  %v5259_v28 = vpack.c.bf16 %v2746_v27, %v2742_v32 }
 0x93f   : > { %5284 = vmatprep.subr.bf16.mxu1 %v5283_v6  ;;  %v5291_v39 = vpack.c.bf16 %v2748_v35, %v2744_v34 }
 0x940   : > { %5246 = vmatpush1.bf16.msra.mxu0 %v5245_v13  ;;  %v2741_v13 = vld [vmem:[#allocation16 + $0x1c0] sm:$0xff] }
 0x941   : > { %5248 = vmatprep.subr.bf16.mxu0 %v5247_v29  ;;  %v5261_v15 = vpack.c.bf16 %v2745_v19, %v2741_v13  ;;  %v2377_v29 = vld [vmem:[#allocation13 + $0x8] sm:$0xff]  ;;  %v2382_v13 = vld [vmem:[#allocation13 + $0x30] sm:$0xff] }
 0x942   : > { %5286 = vmatpush1.bf16.msra.mxu1 %v5285_v12 }
 0x943   : > { %5288 = vmatprep.subr.bf16.mxu1 %v5287_v24  ;;  %v2381_v24 = vld [vmem:[#allocation13 + $0x28] sm:$0xff] }
 0x944   : > { %5250 = vmatpush1.bf16.msra.mxu0 %v5249_v56 }
 0x945   : > { %5252 = vmatprep.subr.bf16.mxu0 %v5251_v62 }
 0x946   : > { %5290 = vmatpush1.bf16.msra.mxu1 %v5289_v18 }
 0x947   : > { %5292 = vmatprep.subr.bf16.mxu1 %v5291_v39 }
 0x948   : > { %5254 = vmatpush1.bf16.msra.mxu0 %v5253_v8 }
 0x949   : > { %5256 = vmatprep.subr.bf16.mxu0 %v5255_v5 }
 0x94a   : > { %5294 = vmatpush1.bf16.msra.mxu1 %v5293_v47 }
 0x94c   : > { %5258 = vmatpush1.bf16.msra.mxu0 %v5257_v3 }
 0x94d   : > { %5260 = vmatprep.subr.bf16.mxu0 %v5259_v28 }
 0x950   : > { %5262 = vmatpush1.bf16.msra.mxu0 %v5261_v15 }
 0x951   : > { %5295 = vmatprep.subr.bf16.mxu0 %v6196_v14 }
 0x9a1   : > { %v2392_v48 = vpop.permute.xlu1 %2391 }
 0x9a2   : > { %v2425_v50 = vmul.f32 %v2392_v48, %v2377_v29 }
 0x9a4   : > { %v2438_v56 = vrot.slane %v2425_v50, 4 }
 0x9a5   : > { %v2397_v31 = vpop.permute.xlu1 %2396 }
 0x9a6   : > { %v2426_v30 = vmul.f32 %v2397_v31, %v2378_v51  ;;  %v2439_v60 = vadd.f32 %v2438_v56, %v2425_v50  ;;  %v2567_v31 = vrot.slane %v6843_v49, 1 }
 0x9a8   : > { %v2444_v58 = vrot.slane %v2426_v30, 4  ;;  %v2440_v6 = vrot.slane %v2439_v60, 2 }
 0x9a9   : > { %v2387_v17 = vpop.permute.xlu1 %2386 }
 0x9aa   : > { %v2424_v61 = vmul.f32 %v2387_v17, %v2376_v57  ;;  %v2445_v62 = vadd.f32 %v2444_v58, %v2426_v30  ;;  %v2441_v5 = vadd.f32 %v2440_v6, %v2439_v60  ;;  %v2383_v58 = vld [vmem:[#allocation13 + $0x38] sm:$0xff]  ;;  %v2568_v17 = vrot.slane %v6843_v49, 2 }
 0x9ac   : > { %v2432_v1 = vrot.slane %v2424_v61, 4  ;;  %v2446_v37 = vrot.slane %v2445_v62, 2  ;;  %v2442_v32 = vrot.slane %v2441_v5, 1 }
 0x9ad   : > { %v2402_v2 = vpop.permute.xlu1 %2401 }
 0x9ae   : > { %v2433_v8 = vadd.f32 %v2432_v1, %v2424_v61  ;;  %v2427_v10 = vmul.f32 %v2402_v2, %v2379_v0  ;;  %v2447_v11 = vadd.f32 %v2446_v37, %v2445_v62  ;;  %v2443_v47 = vadd.f32 %v2442_v32, %v2441_v5 }
 0x9b0   : > { %v2434_v12 = vrot.slane %v2433_v8, 2  ;;  %v2450_v36 = vrot.slane %v2427_v10, 4  ;;  %v2448_v28 = vrot.slane %v2447_v11, 1  ;;  %v2583_v0 = vadd.f32 %v2567_v31, %v2443_v47 }
 0x9b1   : > { %v2407_v21 = vpop.permute.xlu1 %2406 }
 0x9b2   : > { %v2451_v22 = vadd.f32 %v2450_v36, %v2427_v10  ;;  %v2428_v23 = vmul.f32 %v2407_v21, %v2380_v20  ;;  %v2435_v3 = vadd.f32 %v2434_v12, %v2433_v8  ;;  %v2449_v50 = vadd.f32 %v2448_v28, %v2447_v11 }
 0x9b3   : > { %v2569_v8 = vrot.slane %v6843_v49, 3  ;;  %v2570_v36 = vrot.slane %v6843_v49, 4  ;;  %5683 = vtanh.f32 %v2583_v0 }
 0x9b4   : > { %v2452_v25 = vrot.slane %v2451_v22, 2  ;;  %v2456_v33 = vrot.slane %v2428_v23, 4  ;;  %v2436_v19 = vrot.slane %v2435_v3, 1  ;;  %v2584_v6 = vadd.f32 %v2568_v17, %v2449_v50 }
 0x9b5   : > { %v2412_v18 = vpop.permute.xlu1 %2411 }
 0x9b6   : > { %v2453_v27 = vadd.f32 %v2452_v25, %v2451_v22  ;;  %v2429_v34 = vmul.f32 %v2412_v18, %v2381_v24  ;;  %v2457_v35 = vadd.f32 %v2456_v33, %v2428_v23  ;;  %v2437_v56 = vadd.f32 %v2436_v19, %v2435_v3 }
 0x9b7   : > { %v2571_v22 = vrot.slane %v6843_v49, 5  ;;  %5685 = vtanh.f32 %v2584_v6  ;;  %v2573_v19 = vrot.slane %v6843_v49, 7 }
 0x9b8   : > { %v2462_v39 = vrot.slane %v2429_v34, 4  ;;  %v2454_v15 = vrot.slane %v2453_v27, 1  ;;  %v2458_v43 = vrot.slane %v2457_v35, 2  ;;  %v2582_v12 = vadd.f32 %v6843_v49, %v2437_v56 }
 0x9b9   : > { %v2417_v46 = vpop.permute.xlu1 %2416  ;;  %v2631_v56 = vrot.slane %v6791_v26, 3 }
 0x9ba   : > { %v2463_v29 = vadd.f32 %v2462_v39, %v2429_v34  ;;  %v2430_v48 = vmul.f32 %v2417_v46, %v2382_v13  ;;  %v2459_v51 = vadd.f32 %v2458_v43, %v2457_v35  ;;  %v2455_v60 = vadd.f32 %v2454_v15, %v2453_v27 }
 0x9bb   : > { %5687 = vtanh.f32 %v2582_v12  ;;  %v2572_v27 = vrot.slane %v6843_v49, 6  ;;  %v6893_v43 = vstv %s2625_s14 }
 0x9bc   : > { %v2464_v30 = vrot.slane %v2463_v29, 2  ;;  %v2468_v57 = vrot.slane %v2430_v48, 4  ;;  %v2460_v61 = vrot.slane %v2459_v51, 1  ;;  %v2585_v5 = vadd.f32 %v2569_v8, %v2455_v60 }
 0x9bd   : > { %v2422_v62 = vpop.permute.xlu1 %2421  ;;  %v5684_v15 = vpop.eup %5683  ;;  %vm2627_vm10 = vcmp.eq.s32.totalorder %v6893_v43, 1 }
 0x9be   : > { %v2465_v1 = vadd.f32 %v2464_v30, %v2463_v29  ;;  %v2469_v2 = vadd.f32 %v2468_v57, %v2430_v48  ;;  %v2461_v10 = vadd.f32 %v2460_v61, %v2459_v51  ;;  %v2431_v37 = vmul.f32 %v2422_v62, %v2383_v58 }
 0x9bf   : > { %5689 = vtanh.f32 %v2585_v5  ;;  %v2629_v48 = vrot.slane %v6791_v26, 1  ;;  %v2630_v30 = vrot.slane %v6791_v26, 2  ;;  %v2632_v57 = vrot.slane %v6791_v26, 4 }
 0x9c0   : > { %v2466_v20 = vrot.slane %v2465_v1, 1  ;;  %v2470_v21 = vrot.slane %v2469_v2, 2  ;;  %v2474_v11 = vrot.slane %v2431_v37, 4  ;;  %v2586_v23 = vadd.f32 %v2570_v36, %v2461_v10 }
 0x9c1   : > { %v5686_v46 = vpop.eup %5685  ;;  %v2645_v31 = vsel %vm2627_vm10, %v5684_v15, %v2629_v48  ;;  %v2606_v58 = vrot.slane %v5684_v15, 7  ;;  %v2633_v61 = vrot.slane %v6791_v26, 5 }
 0x9c2   : > { %v2467_v24 = vadd.f32 %v2466_v20, %v2465_v1  ;;  %v2471_v3 = vadd.f32 %v2470_v21, %v2469_v2  ;;  %v2475_v25 = vadd.f32 %v2474_v11, %v2431_v37  ;;  %5691 = vtanh.f32 %v2586_v23 }
 0x9c3   : > { %v2660_v62 = vrot.slane %v2645_v31, 7  ;;  %v2646_v0 = vsel %vm2627_vm10, %v5686_v46, %v2630_v30  ;;  %v2634_v2 = vrot.slane %v6791_v26, 6  ;;  %v2608_v8 = vrot.slane %v5686_v46, 6  ;;  %v3390_v31 = vld [vmem:[#allocation17 + $0x8] sm:$0xff]  ;;  %v3392_v30 = vld [vmem:[#allocation17 + $0x18] sm:$0xff] }
 0x9c4   : > { %v2587_v33 = vadd.f32 %v2571_v22, %v2467_v24  ;;  %v2472_v18 = vrot.slane %v2471_v3, 1  ;;  %v2476_v32 = vrot.slane %v2475_v25, 2  ;;  %v2662_v22 = vrot.slane %v2646_v0, 6 }
 0x9c5   : > { %v5688_v29 = vpop.eup %5687 }
 0x9c6   : > { %v2473_v34 = vadd.f32 %v2472_v18, %v2471_v3  ;;  %5693 = vtanh.f32 %v2587_v33  ;;  %v2477_v28 = vadd.f32 %v2476_v32, %v2475_v25  ;;  %v2644_v17 = vsel %vm2627_vm10, %v5688_v29, %v6791_v26 }
 0x9c7   : > { %v2607_v10 = vsel %vm1256_vm2, %v2606_v58, %v5688_v29  ;;  %v2661_v36 = vsel %vm1256_vm2, %v2660_v62, %v2644_v17  ;;  %v3393_v58 = vld [vmem:[#allocation17 + $0x20] sm:$0xff]  ;;  %v3394_v17 = vld [vmem:[#allocation17 + $0x28] sm:$0xff]  ;;  %v3396_v62 = vld [vmem:[#allocation17 + $0x38] sm:$0xff] }
 0x9c8   : > { %v2588_v35 = vadd.f32 %v2572_v27, %v2473_v34  ;;  %v2478_v13 = vrot.slane %v2477_v28, 1  ;;  %v2609_v24 = vsel %vm1258_vm3, %v2608_v8, %v2607_v10  ;;  %v2663_v33 = vsel %vm1258_vm3, %v2662_v22, %v2661_v36  ;;  %v3399_v8 = vld [vmem:[#allocation17 + $0x50] sm:$0xff]  ;;  %v3400_v10 = vld [vmem:[#allocation17 + $0x58] sm:$0xff]  ;;  %v3402_v36 = vld [vmem:[#allocation17 + $0x68] sm:$0xff] }
 0x9c9   : > { %v5690_v50 = vpop.eup %5689  ;;  %v2635_v27 = vrot.slane %v6791_v26, 7 }
 0x9ca   : > { %5695 = vtanh.f32 %v2588_v35  ;;  %v2479_v39 = vadd.f32 %v2478_v13, %v2477_v28  ;;  %v2647_v60 = vsel %vm2627_vm10, %v5690_v50, %v2631_v56  ;;  %v2610_v37 = vrot.slane %v5690_v50, 5 }
 0x9cb   : > { %v2664_v20 = vrot.slane %v2647_v60, 5  ;;  %v5302_v60 = vpack.c.bf16 %v3394_v17, %v3393_v58 }
 0x9cc   : > { %v2589_v47 = vadd.f32 %v2573_v19, %v2479_v39  ;;  %v5692_v51 = vpop.eup %5691  ;;  %v2611_v18 = vsel %vm1260_vm4, %v2610_v37, %v2609_v24  ;;  %v5311_v37 = vpack.c.bf16 %v3400_v10, %v3399_v8  ;;  %v2970_v10 = vld [vmem:[#allocation11 + $0x8] sm:$0xff] }
 0x9cd   : > { %v2648_v1 = vsel %vm2627_vm10, %v5692_v51, %v2632_v57  ;;  %v2612_v21 = vrot.slane %v5692_v51, 4  ;;  %v2665_v28 = vsel %vm1260_vm4, %v2664_v20, %v2663_v33  ;;  %v3389_v51 = vld [vmem:[#allocation17] sm:$0xff] }
 0x9ce   : > { %5697 = vtanh.f32 %v2589_v47  ;;  %v2666_v11 = vrot.slane %v2648_v1, 4  ;;  %v5296_v56 = vpack.c.bf16 %v3390_v31, %v3389_v51  ;;  %v3397_v1 = vld [vmem:[#allocation17 + $0x40] sm:$0xff] }
 0x9cf   : > { %v2613_v35 = vsel %vm1262_vm5, %v2612_v21, %v2611_v18  ;;  %v3403_v21 = vld [vmem:[#allocation17 + $0x70] sm:$0xff] }
 0x9d0   : > { %v5694_v49 = vpop.eup %5693  ;;  %v2667_v13 = vsel %vm1262_vm5, %v2666_v11, %v2665_v28 }
 0x9d1   : > { %v2649_v12 = vsel %vm2627_vm10, %v5694_v49, %v2633_v61  ;;  %v2614_v23 = vrot.slane %v5694_v49, 3  ;;  %v3391_v49 = vld [vmem:[#allocation17 + $0x10] sm:$0xff] }
 0x9d2   : > { %v2668_v3 = vrot.slane %v2649_v12, 3  ;;  %v5299_v57 = vpack.c.bf16 %v3392_v30, %v3391_v49  ;;  %v3395_v61 = vld [vmem:[#allocation17 + $0x30] sm:$0xff]  ;;  %v3401_v12 = vld [vmem:[#allocation17 + $0x60] sm:$0xff] }
 0x9d3   : > { %v2615_v19 = vsel %vm1264_vm6, %v2614_v23, %v2613_v35  ;;  %v5305_v0 = vpack.c.bf16 %v3396_v62, %v3395_v61  ;;  %v5314_v20 = vpack.c.bf16 %v3402_v36, %v3401_v12 }
 0x9d4   : > { %v5696_v6 = vpop.eup %5695  ;;  %v2669_v46 = vsel %vm1264_vm6, %v2668_v3, %v2667_v13 }
 0x9d5   : > { %v2650_v5 = vsel %vm2627_vm10, %v5696_v6, %v2634_v2  ;;  %v2616_v25 = vrot.slane %v5696_v6, 2  ;;  %v3398_v2 = vld [vmem:[#allocation17 + $0x48] sm:$0xff] }
 0x9d6   : > { %v2670_v32 = vrot.slane %v2650_v5, 2  ;;  %v5308_v6 = vpack.c.bf16 %v3398_v2, %v3397_v1  ;;  %v3404_v5 = vld [vmem:[#allocation17 + $0x78] sm:$0xff]  ;;  %v2969_v1 = vld [vmem:[#allocation11] sm:$0xff] }
 0x9d7   : > { %v2617_v47 = vsel %vm1266_vm7, %v2616_v25, %v2615_v19  ;;  %v5317_v22 = vpack.c.bf16 %v3404_v5, %v3403_v21  ;;  %v2971_v21 = vld [vmem:[#allocation11 + $0x10] sm:$0xff] }
 0x9d8   : > { %v5698_v34 = vpop.eup %5697  ;;  %v2671_v26 = vsel %vm1266_vm7, %v2670_v32, %v2669_v46 }
 0x9d9   : > { %v2618_v39 = vrot.slane %v5698_v34, 1  ;;  %v2651_v15 = vsel %vm2627_vm10, %v5698_v34, %v2635_v27 }
 0x9da   : > { %v2672_v29 = vrot.slane %v2651_v15, 1 }
 0x9db   : > { %v2619_v48 = vsel %vm1268_vm8, %v2618_v39, %v2617_v47 }
 0x9dc   : > { %4762 = vst [vmem:[%s6591_s2 + $0x8] sm:$0xff] %v2619_v48  ;;  %v6935_v50 = vsel %vm1268_vm8, %v2672_v29, %v2671_v26  ;;  %v6954_v29 = vstv %s3534_s29  ;;  %v5800_v48 = vld [vmem:[#allocation3] sm:$0xff] }
 0x9dd   : > { %2814 = vmatmul.mubr.f32.vlgmr.msra.gmra.mrb[4].mxu0 %v6935_v50  ;;  %2885 = vmatmul.mubr.f32.vlgmr.msra.gmra.mrb[4].mxu1 %v6935_v50  ;;  %v2676_v51 = vsel %vm2627_vm10, %v6809_v7, %v5800_v48  ;;  %vm3536_vm11 = vcmp.eq.s32.totalorder %v6954_v29, 1  ;;  %v4298_v29 = vld [vmem:[#allocation17] sm:$0xff] }
 0x9de   : > { %4953 = vmatprep.mubr.msk.f32.mxu0 %vm6197_vm0, %v6195_v9  ;;  %3793 = vmatprep.mubr.f32.mxu1 %v6195_v9 }
 0x9df   : > { %5297 = vmatpush3.bf16.msra.mxu0 %v5296_v56 }
 0x9e0   : > { %5298 = vmatprep.subr.bf16.mxu0 %v6196_v14 }
 0x9e3   : > { %5300 = vmatpush3.bf16.msra.mxu0 %v5299_v57 }
 0x9e4   : > { %5301 = vmatprep.subr.bf16.mxu0 %v6196_v14 }
 0x9e7   : > { %5303 = vmatpush3.bf16.msra.mxu0 %v5302_v60 }
 0x9e8   : > { %5304 = vmatprep.subr.bf16.mxu0 %v6196_v14 }
 0x9eb   : > { %5306 = vmatpush3.bf16.msra.mxu0 %v5305_v0 }
 0x9ec   : > { %5307 = vmatprep.subr.bf16.mxu0 %v6196_v14 }
 0x9ef   : > { %5309 = vmatpush3.bf16.msra.mxu0 %v5308_v6 }
 0x9f0   : > { %5310 = vmatprep.subr.bf16.mxu0 %v6196_v14 }
 0x9f3   : > { %5312 = vmatpush3.bf16.msra.mxu0 %v5311_v37 }
 0x9f4   : > { %5313 = vmatprep.subr.bf16.mxu0 %v6196_v14 }
 0x9f7   : > { %5315 = vmatpush3.bf16.msra.mxu0 %v5314_v20 }
 0x9f8   : > { %5316 = vmatprep.subr.bf16.mxu0 %v6196_v14 }
 0x9fb   : > { %5318 = vmatpush3.bf16.msra.mxu0 %v5317_v22 }
 0xab0   : > { %v2815_v11 = vpop.f32.mrb[4].mxu0  ;;  %v2886_v23 = vpop.f32.mrb[4].mxu1 }
 0xab1   : > { %v5411_v24 = vadd.f32 %v2815_v11, %v6632_v41  ;;  %v2817_v3 = vpop.f32.mrb[5].mxu0  ;;  %v2888_v25 = vpop.f32.mrb[5].mxu1  ;;  %v5419_v28 = vadd.f32 %v2886_v23, %v6650_v55 }
 0xab2   : > { %v5412_v33 = vadd.f32 %v2817_v3, %v6635_v42  ;;  %v5420_v27 = vadd.f32 %v2888_v25, %v6643_v52  ;;  %v2973_v3 = vld [vmem:[#allocation11 + $0x20] sm:$0xff] }
 0xab3   : > { %v4763_v18 = vmul.f32 -1.442695, %v5411_v24 }
 0xab4   : > { %v4764_v32 = vmul.f32 -1.442695, %v5412_v33  ;;  %v4765_v34 = vmul.f32 -1.442695, %v5420_v27 }
 0xab5   : > { %5699 = vpow2.f32 %v4763_v18 }
 0xab6   : > { %5701 = vpow2.f32 %v4764_v32  ;;  %v2972_v32 = vld [vmem:[#allocation11 + $0x18] sm:$0xff] }
 0xab7   : > { %5703 = vpow2.f32 %v4765_v34 }
 0xab8   : > { %5705 = vtanh.f32 %v5419_v28 }
 0xabf   : > { %v5700_v35 = vpop.eup %5699 }
 0xac0   : > { %v5702_v13 = vpop.eup %5701  ;;  %v2898_v19 = vadd.f32 1.0, %v5700_v35  ;;  %v2974_v35 = vld [vmem:[#allocation11 + $0x28] sm:$0xff] }
 0xac1   : > { %v2904_v39 = vadd.f32 1.0, %v5702_v13  ;;  %v5704_v15 = vpop.eup %5703 }
 0xac2   : > { %5707 = vrcp.f32 %v2898_v19  ;;  %v5706_v46 = vpop.eup %5705  ;;  %v2911_v56 = vadd.f32 1.0, %v5704_v15  ;;  %v2975_v15 = vld [vmem:[#allocation11 + $0x30] sm:$0xff] }
 0xac3   : > { %5709 = vrcp.f32 %v2904_v39 }
 0xac4   : > { %5711 = vrcp.f32 %v2911_v56 }
 0xacc   : > { %v5708_v47 = vpop.eup %5707 }
 0xacd   : > { %v5710_v26 = vpop.eup %5709  ;;  %v2915_v31 = vmul.f32 %v5708_v47, %v5706_v46 }
 0xace   : > { %v2914_v49 = vmul.f32 %v5710_v26, %v2676_v51  ;;  %v5712_v58 = vpop.eup %5711  ;;  %v2976_v26 = vld [vmem:[#allocation11 + $0x38] sm:$0xff] }
 0xad0   : > { %v2916_v30 = vadd.f32 %v2915_v31, %v2914_v49 }
 0xad2   : > { %v6962_v57 = vsel %vm3536_vm11, %v2916_v30, %v2676_v51  ;;  %5713 = vtanh.f32 %v2916_v30 }
 0xadc   : > { %v5714_v17 = vpop.eup %5713 }
 0xadd   : > { %v2918_v60 = vmul.f32 %v5714_v17, %v5712_v58 }
 0xadf   : > { %4954 = vmatmul.mubr.f32.vlgmr.msra.gmra.mrb[10].mxu0 %v2918_v60  ;;  %v2927_v61 = vrot.slane %v2918_v60, %v6664_v16  ;;  %v2920_v43 = vcombine.high %v2918_v60, %v2918_v60 }
 0xae0   : > { %3722 = vmatprep.mubr.f32.mxu0 %v6195_v9 }
 0xae1   : > { %v2943_v7 = vrot.slane %v2927_v61, %v6664_v16  ;;  %v2935_v62 = vcombine.high %v2927_v61, %v2927_v61  ;;  %v2934_v0 = vrot.slane %v2920_v43, %v6664_v16 }
 0xae3   : > { %v2980_v2 = vrot.slane %v2943_v7, %v6623_v38  ;;  %v2957_v6 = vrot.slane %v2935_v62, %v6664_v16  ;;  %v2965_v8 = vcombine.high %v2943_v7, %v2943_v7  ;;  %v2950_v20 = vrot.slane %v2934_v0, %v6664_v16 }
 0xae4   : > { %v2936_v24 = vcombine.high %v2934_v0, %v2934_v0 }
 0xae5   : > { %v3017_v37 = vmul.f32 %v2980_v2, %v2969_v1  ;;  %v2984_v12 = vrot.slane %v2957_v6, %v6623_v38  ;;  %v2988_v36 = vrot.slane %v2965_v8, %v6623_v38  ;;  %v2996_v11 = vrot.slane %v2950_v20, %v6623_v38 }
 0xae6   : > { %v2967_v23 = vcombine.high %v2957_v6, %v2957_v6  ;;  %v2964_v18 = vrot.slane %v2936_v24, %v6664_v16  ;;  %v2966_v28 = vcombine.high %v2950_v20, %v2950_v20 }
 0xae7   : > { %3025 = vadd.xlane.f32.xlu0 %v3017_v37  ;;  %v3018_v5 = vmul.f32 %v2984_v12, %v2970_v10  ;;  %v3019_v22 = vmul.f32 %v2988_v36, %v2971_v21  ;;  %v3021_v25 = vmul.f32 %v2996_v11, %v2973_v3 }
 0xae8   : > { %v2992_v33 = vrot.slane %v2967_v23, %v6623_v38  ;;  %v3000_v34 = vrot.slane %v2964_v18, %v6623_v38  ;;  %v3004_v19 = vrot.slane %v2966_v28, %v6623_v38  ;;  %v2968_v39 = vcombine.high %v2964_v18, %v2964_v18 }
 0xae9   : > { %3027 = vadd.xlane.f32.xlu1 %v3018_v5 }
 0xaea   : > { %v3020_v27 = vmul.f32 %v2992_v33, %v2972_v32  ;;  %v3022_v13 = vmul.f32 %v3000_v34, %v2974_v35  ;;  %v3023_v46 = vmul.f32 %v3004_v19, %v2975_v15  ;;  %v3008_v47 = vrot.slane %v2968_v39, %v6623_v38 }
 0xaeb   : > { %3029 = vadd.xlane.f32.xlu0 %v3019_v22 }
 0xaec   : > { %v3024_v48 = vmul.f32 %v3008_v47, %v2976_v26 }
 0xaef   : > { %3033 = vadd.xlane.f32.xlu0 %v3021_v25 }
 0xaf3   : > { %3031 = vadd.xlane.f32.xlu0 %v3020_v27 }
 0xaf7   : > { %3035 = vadd.xlane.f32.xlu0 %v3022_v13 }
 0xafb   : > { %3037 = vadd.xlane.f32.xlu0 %v3023_v46 }
 0xaff   : > { %3039 = vadd.xlane.f32.xlu0 %v3024_v48 }
 0xb74   : > { %v3026_v51 = vpop.xlane.xlu0 %3025 }
 0xb75   : > { %v3052_v17 = vrot.slane %v3026_v51, %v6683_v4 }
 0xb76   : > { %v3028_v49 = vpop.xlane.xlu1 %3027 }
 0xb77   : > { %v3056_v58 = vrot.slane %v3028_v49, %v6683_v4 }
 0xb78   : > { %v3030_v31 = vpop.xlane.xlu0 %3029 }
 0xb79   : > { %v3060_v60 = vrot.slane %v3030_v31, %v6683_v4  ;;  %v3081_v43 = vsel %vm1256_vm2, %v3056_v58, %v3052_v17 }
 0xb7b   : > { %v3082_v62 = vsel %vm1258_vm3, %v3060_v60, %v3081_v43 }
 0xb7c   : > { %v3034_v56 = vpop.xlane.xlu0 %3033 }
 0xb7d   : > { %v3068_v6 = vrot.slane %v3034_v56, %v6683_v4 }
 0xb80   : > { %v3032_v30 = vpop.xlane.xlu0 %3031 }
 0xb81   : > { %v3064_v7 = vrot.slane %v3032_v30, %v6683_v4 }
 0xb83   : > { %v3083_v1 = vsel %vm1260_vm4, %v3064_v7, %v3082_v62 }
 0xb84   : > { %v3036_v61 = vpop.xlane.xlu0 %3035  ;;  %v3084_v37 = vsel %vm1262_vm5, %v3068_v6, %v3083_v1 }
 0xb85   : > { %v3072_v2 = vrot.slane %v3036_v61, %v6683_v4 }
 0xb87   : > { %v3085_v36 = vsel %vm1264_vm6, %v3072_v2, %v3084_v37 }
 0xb88   : > { %v3038_v0 = vpop.xlane.xlu0 %3037 }
 0xb89   : > { %v3076_v8 = vrot.slane %v3038_v0, %v6683_v4 }
 0xb8b   : > { %v3086_v20 = vsel %vm1266_vm7, %v3076_v8, %v3085_v36 }
 0xb8c   : > { %v3040_v10 = vpop.xlane.xlu0 %3039 }
 0xb8d   : > { %v3080_v12 = vrot.slane %v3040_v10, %v6683_v4 }
 0xb8f   : > { %v3087_v21 = vsel %vm1268_vm8, %v3080_v12, %v3086_v20 }
 0xb90   : > { %v3089_v5 = vsel %vm1271_vm9, %v3087_v21, -inf }
 0xb91   : > { %3090 = vmax.xlane.f32.xlu0 %v3089_v5 }
 0xbb2   : > { %v6995_v22 = vpop.f32.mrb[10].mxu0 }
 0xbb3   : > { %v4955_v11 = vpop.f32.mrb[11].mxu0 }
 0xc1e   : > { %v3091_v23 = vpop.xlane.xlu0 %3090 }
 0xc1f   : > { %v3096_v24 = vrot.slane %v3091_v23, %v6623_v38  ;;  %v3100_v3 = vrot.slane %v3091_v23, %v6629_v40  ;;  %v3104_v25 = vrot.slane %v3091_v23, %v6646_v53  ;;  %v3108_v33 = vrot.slane %v3091_v23, %v6638_v44 }
 0xc20   : > { %v3112_v18 = vrot.slane %v3091_v23, %v6707_v45  ;;  %v3116_v28 = vrot.slane %v3091_v23, %v6711_v54  ;;  %v3120_v39 = vrot.slane %v3091_v23, %v6715_v59  ;;  %v3124_v47 = vrot.slane %v3091_v23, %v6719_v63 }
 0xc21   : > { %v3133_v32 = vsub.f32 %v3026_v51, %v3096_v24  ;;  %v3134_v27 = vsub.f32 %v3028_v49, %v3100_v3  ;;  %v3135_v34 = vsub.f32 %v3030_v31, %v3104_v25  ;;  %v3136_v35 = vsub.f32 %v3032_v30, %v3108_v33 }
 0xc22   : > { %v3137_v15 = vsub.f32 %v3034_v56, %v3112_v18  ;;  %v3138_v26 = vsub.f32 %v3036_v61, %v3116_v28  ;;  %v3139_v58 = vsub.f32 %v3038_v0, %v3120_v39  ;;  %v3140_v49 = vsub.f32 %v3040_v10, %v3124_v47 }
 0xc23   : > { %v3141_v13 = vmul.f32 1.442695, %v3133_v32  ;;  %v3143_v19 = vmul.f32 1.442695, %v3134_v27  ;;  %v3145_v46 = vmul.f32 1.442695, %v3135_v34 }
 0xc24   : > { %v3147_v48 = vmul.f32 1.442695, %v3136_v35  ;;  %v3149_v51 = vmul.f32 1.442695, %v3137_v15  ;;  %v3151_v31 = vmul.f32 1.442695, %v3138_v26 }
 0xc25   : > { %5715 = vpow2.f32 %v3141_v13  ;;  %v3153_v30 = vmul.f32 1.442695, %v3139_v58  ;;  %v3155_v17 = vmul.f32 1.442695, %v3140_v49 }
 0xc26   : > { %5717 = vpow2.f32 %v3143_v19 }
 0xc27   : > { %5719 = vpow2.f32 %v3145_v46 }
 0xc28   : > { %5721 = vpow2.f32 %v3147_v48 }
 0xc29   : > { %5723 = vpow2.f32 %v3149_v51 }
 0xc2a   : > { %5725 = vpow2.f32 %v3151_v31 }
 0xc2b   : > { %5727 = vpow2.f32 %v3153_v30 }
 0xc2c   : > { %5729 = vpow2.f32 %v3155_v17 }
 0xc2f   : > { %v5716_v60 = vpop.eup %5715 }
 0xc30   : > { %v5718_v43 = vpop.eup %5717  ;;  %3166 = vperm.xlu0 %5598, %v5716_v60  }
 0xc31   : > { %3169 = vperm.xlu1 %5597, %v5718_v43   ;;  %v5720_v56 = vpop.eup %5719 }
 0xc32   : > { %v5722_v61 = vpop.eup %5721 }
 0xc33   : > { %v5724_v7 = vpop.eup %5723 }
 0xc34   : > { %3172 = vperm.xlu0 %5598, %v5720_v56   ;;  %v5726_v62 = vpop.eup %5725 }
 0xc35   : > { %3175 = vperm.xlu1 %5597, %v5722_v61   ;;  %v5728_v0 = vpop.eup %5727 }
 0xc36   : > { %v5730_v1 = vpop.eup %5729 }
 0xc38   : > { %3178 = vperm.xlu0 %5598, %v5724_v7  }
 0xc39   : > { %3181 = vperm.xlu1 %5597, %v5726_v62  }
 0xc3c   : > { %3184 = vperm.xlu0 %5598, %v5728_v0  }
 0xc3d   : > { %3187 = vperm.xlu1 %5597, %v5730_v1  }
 0xcaf   : > { %v3167_v2 = vpop.permute.xlu0 %3166 }
 0xcb0   : > { %v3170_v6 = vpop.permute.xlu1 %3169  ;;  %v3192_v10 = vrot.slane %v3167_v2, %v6683_v4 }
 0xcb1   : > { %v3196_v8 = vrot.slane %v3170_v6, %v6683_v4 }
 0xcb3   : > { %v3173_v37 = vpop.permute.xlu0 %3172  ;;  %v3221_v20 = vsel %vm1256_vm2, %v3196_v8, %v3192_v10 }
 0xcb4   : > { %v3176_v12 = vpop.permute.xlu1 %3175  ;;  %v3200_v36 = vrot.slane %v3173_v37, %v6683_v4 }
 0xcb5   : > { %v3204_v21 = vrot.slane %v3176_v12, %v6683_v4 }
 0xcb6   : > { %v3222_v5 = vsel %vm1258_vm3, %v3200_v36, %v3221_v20  ;;  %v3595_v36 = vld [vmem:[#allocation16 + $0x8] sm:$0xff] }
 0xcb7   : > { %v3179_v11 = vpop.permute.xlu0 %3178  ;;  %v3223_v25 = vsel %vm1260_vm4, %v3204_v21, %v3222_v5  ;;  %v3599_v20 = vld [vmem:[#allocation16 + $0x28] sm:$0xff]  ;;  %v3601_v5 = vld [vmem:[#allocation16 + $0x38] sm:$0xff] }
 0xcb8   : > { %v3182_v23 = vpop.permute.xlu1 %3181  ;;  %v3208_v24 = vrot.slane %v3179_v11, %v6683_v4  ;;  %v5319_v21 = vpack.c.bf16 %v3599_v20, %v3595_v36  ;;  %v3594_v11 = vld [vmem:[#allocation16] sm:$0xff]  ;;  %v3620_v20 = vld [vmem:[#allocation16 + $0xd0] sm:$0xff] }
 0xcb9   : > { %v3212_v3 = vrot.slane %v3182_v23, %v6683_v4 }
 0xcba   : > { %v3224_v33 = vsel %vm1262_vm5, %v3208_v24, %v3223_v25  ;;  %5320 = vmatprep.subr.bf16.mxu0 %v5319_v21 }
 0xcbb   : > { %v3185_v18 = vpop.permute.xlu0 %3184  ;;  %v3225_v28 = vsel %vm1264_vm6, %v3212_v3, %v3224_v33  ;;  %v3596_v3 = vld [vmem:[#allocation16 + $0x10] sm:$0xff]  ;;  %v3607_v33 = vld [vmem:[#allocation16 + $0x68] sm:$0xff] }
 0xcbc   : > { %v3188_v32 = vpop.permute.xlu1 %3187  ;;  %v3216_v27 = vrot.slane %v3185_v18, %v6683_v4  ;;  %v3605_v18 = vld [vmem:[#allocation16 + $0x58] sm:$0xff] }
 0xcbd   : > { %v3220_v34 = vrot.slane %v3188_v32, %v6683_v4  ;;  %v3609_v32 = vld [vmem:[#allocation16 + $0x78] sm:$0xff] }
 0xcbe   : > { %v3226_v35 = vsel %vm1266_vm7, %v3216_v27, %v3225_v28  ;;  %v3602_v27 = vld [vmem:[#allocation16 + $0x40] sm:$0xff]  ;;  %v5355_v28 = vpack.c.bf16 %v3609_v32, %v3605_v18  ;;  %v3632_v18 = vld [vmem:[#allocation16 + $0x130] sm:$0xff]  ;;  %v3635_v32 = vld [vmem:[#allocation16 + $0x148] sm:$0xff] }
 0xcbf   : > { %v3227_v13 = vsel %vm1268_vm8, %v3220_v34, %v3226_v35  ;;  %v3606_v34 = vld [vmem:[#allocation16 + $0x60] sm:$0xff] }
 0xcc0   : > { %v3229_v19 = vsel %vm1271_vm9, %v3227_v13, 0.0  ;;  %v5325_v35 = vpack.c.bf16 %v3606_v34, %v3602_v27  ;;  %v3604_v13 = vld [vmem:[#allocation16 + $0x50] sm:$0xff]  ;;  %v3639_v27 = vld [vmem:[#allocation16 + $0x168] sm:$0xff]  ;;  %v3637_v34 = vld [vmem:[#allocation16 + $0x158] sm:$0xff] }
 0xcc1   : > { %3230 = vadd.xlane.f32.xlu0 %v3229_v19  ;;  %v3608_v19 = vld [vmem:[#allocation16 + $0x70] sm:$0xff] }
 0xd4e   : > { %v3231_v39 = vpop.xlane.xlu0 %3230 }
 0xd4f   : > { %5731 = vrcp.f32 %v3231_v39 }
 0xd59   : > { %v5732_v15 = vpop.eup %5731 }
 0xd5a   : > { %v3233_v46 = vmul.f32 %v5732_v15, %v3231_v39  ;;  %v5357_v39 = vpack.c.bf16 %v3608_v19, %v3604_v13  ;;  %v3634_v13 = vld [vmem:[#allocation16 + $0x140] sm:$0xff] }
 0xd5b   : > { %v3638_v19 = vld [vmem:[#allocation16 + $0x160] sm:$0xff] }
 0xd5c   : > { %v3234_v47 = vsub.f32 2.0, %v3233_v46  ;;  %v3615_v46 = vld [vmem:[#allocation16 + $0xa8] sm:$0xff] }
 0xd5e   : > { %v3235_v26 = vmul.f32 %v5732_v15, %v3234_v47  ;;  %v3611_v15 = vld [vmem:[#allocation16 + $0x88] sm:$0xff]  ;;  %v3613_v47 = vld [vmem:[#allocation16 + $0x98] sm:$0xff] }
 0xd60   : > { %v3244_v48 = vrot.slane %v3235_v26, %v6629_v40  ;;  %v3248_v51 = vrot.slane %v3235_v26, %v6646_v53  ;;  %v3240_v31 = vrot.slane %v3235_v26, %v6623_v38  ;;  %v3252_v17 = vrot.slane %v3235_v26, %v6638_v44 }
 0xd61   : > { %v3256_v6 = vrot.slane %v3235_v26, %v6707_v45  ;;  %v3260_v10 = vrot.slane %v3235_v26, %v6711_v54  ;;  %v3264_v37 = vrot.slane %v3235_v26, %v6715_v59  ;;  %v3268_v12 = vrot.slane %v3235_v26, %v6719_v63 }
 0xd62   : > { %v3278_v58 = vmul.f32 %v5718_v43, %v3244_v48  ;;  %v3279_v49 = vmul.f32 %v5720_v56, %v3248_v51  ;;  %v3277_v30 = vmul.f32 %v5716_v60, %v3240_v31  ;;  %v3280_v2 = vmul.f32 %v5722_v61, %v3252_v17  ;;  %v3597_v61 = vld [vmem:[#allocation16 + $0x18] sm:$0xff]  ;;  %v3614_v51 = vld [vmem:[#allocation16 + $0xa0] sm:$0xff]  ;;  %v3616_v17 = vld [vmem:[#allocation16 + $0xb0] sm:$0xff] }
 0xd63   : > { %v3281_v8 = vmul.f32 %v5724_v7, %v3256_v6  ;;  %v3282_v43 = vmul.f32 %v5726_v62, %v3260_v10  ;;  %v3283_v56 = vmul.f32 %v5728_v0, %v3264_v37  ;;  %v3284_v60 = vmul.f32 %v5730_v1, %v3268_v12  ;;  %v3598_v7 = vld [vmem:[#allocation16 + $0x20] sm:$0xff]  ;;  %v3600_v62 = vld [vmem:[#allocation16 + $0x30] sm:$0xff]  ;;  %v3603_v0 = vld [vmem:[#allocation16 + $0x48] sm:$0xff] }
 0xd64   : > { %3300 = vperm.xlu1 %5597, %v3278_v58   ;;  %v5351_v23 = vpack.c.bf16 %v3601_v5, %v3597_v61  ;;  %v5321_v24 = vpack.c.bf16 %v3598_v7, %v3594_v11  ;;  %v5353_v25 = vpack.c.bf16 %v3600_v62, %v3596_v3  ;;  %v5323_v1 = vpack.c.bf16 %v3607_v33, %v3603_v0  ;;  %v3617_v48 = vld [vmem:[#allocation16 + $0xb8] sm:$0xff]  ;;  %v3610_v58 = vld [vmem:[#allocation16 + $0x80] sm:$0xff]  ;;  %v3619_v6 = vld [vmem:[#allocation16 + $0xc8] sm:$0xff] }
 0xd65   : > { %v5327_v26 = vpack.c.bf16 %v3615_v46, %v3611_v15  ;;  %v5329_v31 = vpack.c.bf16 %v3614_v51, %v3610_v58  ;;  %v3621_v10 = vld [vmem:[#allocation16 + $0xd8] sm:$0xff]  ;;  %v3622_v12 = vld [vmem:[#allocation16 + $0xe0] sm:$0xff]  ;;  %v3624_v61 = vld [vmem:[#allocation16 + $0xf0] sm:$0xff]  ;;  %v5341_v15 = vpack.c.bf16 %v3638_v19, %v3634_v13 }
 0xd66   : > { %5352 = vmatprep.subr.bf16.mxu1 %v5351_v23  ;;  %5322 = vmatpush1.bf16.msra.mxu0 %v5321_v24  ;;  %v3625_v37 = vld [vmem:[#allocation16 + $0xf8] sm:$0xff]  ;;  %v5365_v21 = vpack.c.bf16 %v3624_v61, %v3620_v20  ;;  %v3627_v5 = vld [vmem:[#allocation16 + $0x108] sm:$0xff]  ;;  %v3626_v3 = vld [vmem:[#allocation16 + $0x100] sm:$0xff] }
 0xd67   : > { %5354 = vmatpush1.bf16.msra.mxu1 %v5353_v25  ;;  %5324 = vmatprep.subr.bf16.mxu0 %v5323_v1  ;;  %v3631_v11 = vld [vmem:[#allocation16 + $0x128] sm:$0xff]  ;;  %v3629_v7 = vld [vmem:[#allocation16 + $0x118] sm:$0xff]  ;;  %v3630_v62 = vld [vmem:[#allocation16 + $0x120] sm:$0xff] }
 0xd68   : > { %3305 = vperm.xlu1 %5597, %v3279_v49   ;;  %5356 = vmatprep.subr.bf16.mxu1 %v5355_v28  ;;  %v5359_v49 = vpack.c.bf16 %v3617_v48, %v3613_v47  ;;  %v5335_v23 = vpack.c.bf16 %v3631_v11, %v3627_v5  ;;  %v3633_v24 = vld [vmem:[#allocation16 + $0x138] sm:$0xff]  ;;  %v5337_v0 = vpack.c.bf16 %v3630_v62, %v3626_v3  ;;  %v3628_v33 = vld [vmem:[#allocation16 + $0x110] sm:$0xff]  ;;  %v3643_v48 = vld [vmem:[#allocation16 + $0x188] sm:$0xff] }
 0xd69   : > { %v5367_v25 = vpack.c.bf16 %v3633_v24, %v3629_v7  ;;  %v5369_v1 = vpack.c.bf16 %v3632_v18, %v3628_v33  ;;  %v5339_v28 = vpack.c.bf16 %v3639_v27, %v3635_v32  ;;  %v3636_v46 = vld [vmem:[#allocation16 + $0x150] sm:$0xff]  ;;  %v3647_v58 = vld [vmem:[#allocation16 + $0x1a8] sm:$0xff]  ;;  %v3645_v51 = vld [vmem:[#allocation16 + $0x198] sm:$0xff] }
 0xd6a   : > { %5326 = vmatpush1.bf16.msra.mxu0 %v5325_v35  ;;  %v3641_v35 = vld [vmem:[#allocation16 + $0x178] sm:$0xff]  ;;  %v3640_v47 = vld [vmem:[#allocation16 + $0x170] sm:$0xff]  ;;  %v3650_v20 = vld [vmem:[#allocation16 + $0x1c0] sm:$0xff] }
 0xd6b   : > { %5358 = vmatpush1.bf16.msra.mxu1 %v5357_v39  ;;  %5328 = vmatprep.subr.bf16.mxu0 %v5327_v26  ;;  %v5371_v39 = vpack.c.bf16 %v3641_v35, %v3637_v34  ;;  %v5373_v26 = vpack.c.bf16 %v3640_v47, %v3636_v46  ;;  %v3654_v61 = vld [vmem:[#allocation16 + $0x1e0] sm:$0xff]  ;;  %v3652_v11 = vld [vmem:[#allocation16 + $0x1d0] sm:$0xff]  ;;  %v3286_v24 = vld [vmem:[#allocation13 + $0x8] sm:$0xff] }
 0xd6c   : > { %3295 = vperm.xlu1 %5597, %v3277_v30   ;;  %v3612_v30 = vld [vmem:[#allocation16 + $0x90] sm:$0xff]  ;;  %5360 = vmatprep.subr.bf16.mxu1 %v5359_v49  ;;  %v5343_v49 = vpack.c.bf16 %v3647_v58, %v3643_v48  ;;  %v5349_v5 = vpack.c.bf16 %v3654_v61, %v3650_v20  ;;  %v3288_v13 = vld [vmem:[#allocation13 + $0x18] sm:$0xff] }
 0xd6d   : > { %v3656_v7 = vld [vmem:[#allocation16 + $0x1f0] sm:$0xff] }
 0xd6e   : > { %5330 = vmatpush1.bf16.msra.mxu0 %v5329_v31  ;;  %v3649_v31 = vld [vmem:[#allocation16 + $0x1b8] sm:$0xff]  ;;  %v3291_v61 = vld [vmem:[#allocation13 + $0x30] sm:$0xff] }
 0xd70   : > { %3310 = vperm.xlu1 %5597, %v3280_v2   ;;  %v5361_v2 = vpack.c.bf16 %v3616_v17, %v3612_v30  ;;  %v3642_v30 = vld [vmem:[#allocation16 + $0x180] sm:$0xff] }
 0xd71   : > { %v3646_v17 = vld [vmem:[#allocation16 + $0x1a0] sm:$0xff] }
 0xd72   : > { %5362 = vmatpush1.bf16.msra.mxu1 %v5361_v2  ;;  %v5375_v2 = vpack.c.bf16 %v3649_v31, %v3645_v51  ;;  %v3289_v51 = vld [vmem:[#allocation13 + $0x20] sm:$0xff] }
 0xd74   : > { %3315 = vperm.xlu1 %5597, %v3281_v8   ;;  %v3623_v8 = vld [vmem:[#allocation16 + $0xe8] sm:$0xff] }
 0xd78   : > { %3320 = vperm.xlu1 %5597, %v3282_v43   ;;  %v5331_v43 = vpack.c.bf16 %v3623_v8, %v3619_v6  ;;  %v5345_v6 = vpack.c.bf16 %v3646_v17, %v3642_v30  ;;  %v3644_v8 = vld [vmem:[#allocation16 + $0x190] sm:$0xff] }
 0xd7a   : > { %5332 = vmatprep.subr.bf16.mxu0 %v5331_v43 }
 0xd7c   : > { %3325 = vperm.xlu1 %5597, %v3283_v56   ;;  %v3618_v56 = vld [vmem:[#allocation16 + $0xc0] sm:$0xff] }
 0xd7d   : > { %v5333_v36 = vpack.c.bf16 %v3622_v12, %v3618_v56  ;;  %v3655_v56 = vld [vmem:[#allocation16 + $0x1e8] sm:$0xff]  ;;  %v3653_v12 = vld [vmem:[#allocation16 + $0x1d8] sm:$0xff] }
 0xd7f   : > { %5334 = vmatpush1.bf16.msra.mxu0 %v5333_v36  ;;  %v3657_v36 = vld [vmem:[#allocation16 + $0x1f8] sm:$0xff] }
 0xd80   : > { %3330 = vperm.xlu1 %5597, %v3284_v60   ;;  %v5363_v60 = vpack.c.bf16 %v3625_v37, %v3621_v10  ;;  %5336 = vmatprep.subr.bf16.mxu0 %v5335_v23  ;;  %v3648_v10 = vld [vmem:[#allocation16 + $0x1b0] sm:$0xff]  ;;  %v3651_v37 = vld [vmem:[#allocation16 + $0x1c8] sm:$0xff]  ;;  %v5381_v23 = vpack.c.bf16 %v3656_v7, %v3652_v11 }
 0xd81   : > { %v5377_v43 = vpack.c.bf16 %v3648_v10, %v3644_v8 }
 0xd82   : > { %5364 = vmatprep.subr.bf16.mxu1 %v5363_v60  ;;  %v5347_v60 = vpack.c.bf16 %v3655_v56, %v3651_v37 }
 0xd83   : > { %5366 = vmatpush1.bf16.msra.mxu1 %v5365_v21  ;;  %5338 = vmatpush1.bf16.msra.mxu0 %v5337_v0  ;;  %v5379_v21 = vpack.c.bf16 %v3657_v36, %v3653_v12 }
 0xd84   : > { %5368 = vmatprep.subr.bf16.mxu1 %v5367_v25  ;;  %5340 = vmatprep.subr.bf16.mxu0 %v5339_v28  ;;  %v3287_v25 = vld [vmem:[#allocation13 + $0x10] sm:$0xff] }
 0xd87   : > { %5370 = vmatpush1.bf16.msra.mxu1 %v5369_v1  ;;  %5342 = vmatpush1.bf16.msra.mxu0 %v5341_v15  ;;  %v3285_v1 = vld [vmem:[#allocation13] sm:$0xff] }
 0xd88   : > { %5372 = vmatprep.subr.bf16.mxu1 %v5371_v39  ;;  %5344 = vmatprep.subr.bf16.mxu0 %v5343_v49 }
 0xd8b   : > { %5374 = vmatpush1.bf16.msra.mxu1 %v5373_v26  ;;  %5346 = vmatpush1.bf16.msra.mxu0 %v5345_v6  ;;  %v3290_v6 = vld [vmem:[#allocation13 + $0x28] sm:$0xff] }
 0xd8c   : > { %5376 = vmatprep.subr.bf16.mxu1 %v5375_v2  ;;  %5348 = vmatprep.subr.bf16.mxu0 %v5347_v60 }
 0xd8f   : > { %5378 = vmatpush1.bf16.msra.mxu1 %v5377_v43  ;;  %5350 = vmatpush1.bf16.msra.mxu0 %v5349_v5 }
 0xd90   : > { %5380 = vmatprep.subr.bf16.mxu1 %v5379_v21 }
 0xd93   : > { %5382 = vmatpush1.bf16.msra.mxu1 %v5381_v23 }
 0xd94   : > { %5383 = vmatprep.subr.bf16.mxu1 %v6196_v14 }
 0xde3   : > { %v3301_v3 = vpop.permute.xlu1 %3300 }
 0xde4   : > { %v3334_v62 = vmul.f32 %v3301_v3, %v3286_v24 }
 0xde6   : > { %v3347_v33 = vrot.slane %v3334_v62, 4 }
 0xde7   : > { %v3306_v0 = vpop.permute.xlu1 %3305 }
 0xde8   : > { %v3335_v18 = vmul.f32 %v3306_v0, %v3287_v25  ;;  %v3348_v34 = vadd.f32 %v3347_v33, %v3334_v62  ;;  %v3476_v33 = vrot.slane %v6995_v22, 1 }
 0xdea   : > { %v3353_v32 = vrot.slane %v3335_v18, 4  ;;  %v3349_v15 = vrot.slane %v3348_v34, 2 }
 0xdeb   : > { %v3296_v27 = vpop.permute.xlu1 %3295 }
 0xdec   : > { %v3333_v28 = vmul.f32 %v3296_v27, %v3285_v1  ;;  %v3354_v35 = vadd.f32 %v3353_v32, %v3335_v18  ;;  %v3350_v31 = vadd.f32 %v3349_v15, %v3348_v34  ;;  %v3292_v27 = vld [vmem:[#allocation13 + $0x38] sm:$0xff]  ;;  %v3477_v34 = vrot.slane %v6995_v22, 2 }
 0xdee   : > { %v3341_v19 = vrot.slane %v3333_v28, 4  ;;  %v3355_v26 = vrot.slane %v3354_v35, 2  ;;  %v3351_v56 = vrot.slane %v3350_v31, 1 }
 0xdef   : > { %v3311_v39 = vpop.permute.xlu1 %3310 }
 0xdf0   : > { %v3342_v46 = vadd.f32 %v3341_v19, %v3333_v28  ;;  %v3336_v47 = vmul.f32 %v3311_v39, %v3288_v13  ;;  %v3356_v17 = vadd.f32 %v3355_v26, %v3354_v35  ;;  %v3352_v24 = vadd.f32 %v3351_v56, %v3350_v31 }
 0xdf2   : > { %v3343_v48 = vrot.slane %v3342_v46, 2  ;;  %v3359_v58 = vrot.slane %v3336_v47, 4  ;;  %v3357_v36 = vrot.slane %v3356_v17, 1  ;;  %v3492_v19 = vadd.f32 %v3476_v33, %v3352_v24 }
 0xdf3   : > { %v3316_v49 = vpop.permute.xlu1 %3315 }
 0xdf4   : > { %v3360_v30 = vadd.f32 %v3359_v58, %v3336_v47  ;;  %v3337_v2 = vmul.f32 %v3316_v49, %v3289_v51  ;;  %v3344_v8 = vadd.f32 %v3343_v48, %v3342_v46  ;;  %v3358_v25 = vadd.f32 %v3357_v36, %v3356_v17 }
 0xdf5   : > { %v3478_v47 = vrot.slane %v6995_v22, 3  ;;  %v3479_v51 = vrot.slane %v6995_v22, 4  ;;  %v3480_v17 = vrot.slane %v6995_v22, 5  ;;  %5733 = vtanh.f32 %v3492_v19 }
 0xdf6   : > { %v3361_v10 = vrot.slane %v3360_v30, 2  ;;  %v3365_v43 = vrot.slane %v3337_v2, 4  ;;  %v3345_v21 = vrot.slane %v3344_v8, 1  ;;  %v3493_v46 = vadd.f32 %v3477_v34, %v3358_v25 }
 0xdf7   : > { %v3321_v37 = vpop.permute.xlu1 %3320 }
 0xdf8   : > { %v3362_v12 = vadd.f32 %v3361_v10, %v3360_v30  ;;  %v3338_v60 = vmul.f32 %v3321_v37, %v3290_v6  ;;  %v3366_v20 = vadd.f32 %v3365_v43, %v3337_v2  ;;  %v3346_v18 = vadd.f32 %v3345_v21, %v3344_v8 }
 0xdf9   : > { %5735 = vtanh.f32 %v3493_v46 }
 0xdfa   : > { %v3371_v5 = vrot.slane %v3338_v60, 4  ;;  %v3363_v11 = vrot.slane %v3362_v12, 1  ;;  %v3367_v7 = vrot.slane %v3366_v20, 2  ;;  %v3491_v58 = vadd.f32 %v6995_v22, %v3346_v18 }
 0xdfb   : > { %v3326_v23 = vpop.permute.xlu1 %3325  ;;  %v3540_v18 = vrot.slane %v6935_v50, 3 }
 0xdfc   : > { %v3372_v3 = vadd.f32 %v3371_v5, %v3338_v60  ;;  %v3339_v62 = vmul.f32 %v3326_v23, %v3291_v61  ;;  %v3368_v0 = vadd.f32 %v3367_v7, %v3366_v20  ;;  %v3364_v28 = vadd.f32 %v3363_v11, %v3362_v12 }
 0xdfd   : > { %5737 = vtanh.f32 %v3491_v58  ;;  %v3481_v60 = vrot.slane %v6995_v22, 6  ;;  %v3482_v5 = vrot.slane %v6995_v22, 7  ;;  %v3541_v22 = vrot.slane %v6935_v50, 4 }
 0xdfe   : > { %v3373_v1 = vrot.slane %v3372_v3, 2  ;;  %v3377_v32 = vrot.slane %v3339_v62, 4  ;;  %v3369_v35 = vrot.slane %v3368_v0, 1  ;;  %v3494_v30 = vadd.f32 %v3478_v47, %v3364_v28 }
 0xdff   : > { %v3331_v13 = vpop.permute.xlu1 %3330  ;;  %v5734_v7 = vpop.eup %5733 }
 0xe00   : > { %v3374_v39 = vadd.f32 %v3373_v1, %v3372_v3  ;;  %v3378_v15 = vadd.f32 %v3377_v32, %v3339_v62  ;;  %v3370_v26 = vadd.f32 %v3369_v35, %v3368_v0  ;;  %v3340_v48 = vmul.f32 %v3331_v13, %v3292_v27 }
 0xe01   : > { %5739 = vtanh.f32 %v3494_v30  ;;  %v3538_v62 = vrot.slane %v6935_v50, 1  ;;  %v3539_v32 = vrot.slane %v6935_v50, 2  ;;  %v3515_v27 = vrot.slane %v5734_v7, 7 }
 0xe02   : > { %v3375_v49 = vrot.slane %v3374_v39, 1  ;;  %v3379_v31 = vrot.slane %v3378_v15, 2  ;;  %v3383_v2 = vrot.slane %v3340_v48, 4  ;;  %v3495_v6 = vadd.f32 %v3479_v51, %v3370_v26 }
 0xe03   : > { %v5736_v23 = vpop.eup %5735  ;;  %v3554_v33 = vsel %vm3536_vm11, %v5734_v7, %v3538_v62  ;;  %v3542_v35 = vrot.slane %v6935_v50, 5 }
 0xe04   : > { %v3376_v8 = vadd.f32 %v3375_v49, %v3374_v39  ;;  %v3380_v10 = vadd.f32 %v3379_v31, %v3378_v15  ;;  %v3384_v43 = vadd.f32 %v3383_v2, %v3340_v48  ;;  %5741 = vtanh.f32 %v3495_v6 }
 0xe05   : > { %v3569_v13 = vrot.slane %v3554_v33, 7  ;;  %v3555_v19 = vsel %vm3536_vm11, %v5736_v23, %v3539_v32  ;;  %v3543_v15 = vrot.slane %v6935_v50, 6  ;;  %v3517_v47 = vrot.slane %v5736_v23, 6 }
 0xe06   : > { %v3496_v37 = vadd.f32 %v3480_v17, %v3376_v8  ;;  %v3381_v56 = vrot.slane %v3380_v10, 1  ;;  %v3385_v12 = vrot.slane %v3384_v43, 2  ;;  %v3571_v17 = vrot.slane %v3555_v19, 6  ;;  %v4307_v19 = vld [vmem:[#allocation17 + $0x48] sm:$0xff] }
 0xe07   : > { %v5738_v3 = vpop.eup %5737 }
 0xe08   : > { %v3382_v36 = vadd.f32 %v3381_v56, %v3380_v10  ;;  %5743 = vtanh.f32 %v3496_v37  ;;  %v3386_v20 = vadd.f32 %v3385_v12, %v3384_v43  ;;  %v3553_v34 = vsel %vm3536_vm11, %v5738_v3, %v6935_v50 }
 0xe09   : > { %v3516_v26 = vsel %vm1256_vm2, %v3515_v27, %v5738_v3  ;;  %v3570_v51 = vsel %vm1256_vm2, %v3569_v13, %v3553_v34  ;;  %v4303_v27 = vld [vmem:[#allocation17 + $0x28] sm:$0xff]  ;;  %v4306_v13 = vld [vmem:[#allocation17 + $0x40] sm:$0xff] }
 0xe0a   : > { %v3497_v61 = vadd.f32 %v3481_v60, %v3382_v36  ;;  %v3387_v21 = vrot.slane %v3386_v20, 1  ;;  %v3518_v8 = vsel %vm1258_vm3, %v3517_v47, %v3516_v26  ;;  %v3572_v37 = vsel %vm1258_vm3, %v3571_v17, %v3570_v51  ;;  %v4310_v26 = vld [vmem:[#allocation17 + $0x60] sm:$0xff]  ;;  %v4312_v51 = vld [vmem:[#allocation17 + $0x70] sm:$0xff] }
 0xe0b   : > { %v5740_v25 = vpop.eup %5739  ;;  %v3544_v60 = vrot.slane %v6935_v50, 7 }
 0xe0c   : > { %5745 = vtanh.f32 %v3497_v61  ;;  %v3388_v11 = vadd.f32 %v3387_v21, %v3386_v20  ;;  %v3556_v28 = vsel %vm3536_vm11, %v5740_v25, %v3540_v18  ;;  %v3519_v48 = vrot.slane %v5740_v25, 5  ;;  %v4300_v18 = vld [vmem:[#allocation17 + $0x10] sm:$0xff] }
 0xe0d   : > { %v3573_v49 = vrot.slane %v3556_v28, 5  ;;  %v4304_v28 = vld [vmem:[#allocation17 + $0x30] sm:$0xff] }
 0xe0e   : > { %v3498_v24 = vadd.f32 %v3482_v5, %v3388_v11  ;;  %v5742_v0 = vpop.eup %5741  ;;  %v3520_v56 = vsel %vm1260_vm4, %v3519_v48, %v3518_v8  ;;  %v4311_v48 = vld [vmem:[#allocation17 + $0x68] sm:$0xff] }
 0xe0f   : > { %v3557_v39 = vsel %vm3536_vm11, %v5742_v0, %v3541_v22  ;;  %v3521_v31 = vrot.slane %v5742_v0, 4  ;;  %v3574_v20 = vsel %vm1260_vm4, %v3573_v49, %v3572_v37  ;;  %v4299_v0 = vld [vmem:[#allocation17 + $0x8] sm:$0xff]  ;;  %v4302_v22 = vld [vmem:[#allocation17 + $0x20] sm:$0xff]  ;;  %v4313_v49 = vld [vmem:[#allocation17 + $0x78] sm:$0xff] }
 0xe10   : > { %5747 = vtanh.f32 %v3498_v24  ;;  %v3575_v2 = vrot.slane %v3557_v39, 4  ;;  %v5384_v33 = vpack.c.bf16 %v4299_v0, %v4298_v29  ;;  %v5390_v34 = vpack.c.bf16 %v4303_v27, %v4302_v22  ;;  %v4308_v39 = vld [vmem:[#allocation17 + $0x50] sm:$0xff] }
 0xe11   : > { %v3522_v61 = vsel %vm1262_vm5, %v3521_v31, %v3520_v56  ;;  %v5405_v31 = vpack.c.bf16 %v4313_v49, %v4312_v51 }
 0xe12   : > { %v5744_v1 = vpop.eup %5743  ;;  %v3576_v21 = vsel %vm1262_vm5, %v3575_v2, %v3574_v20 }
 0xe13   : > { %v3558_v58 = vsel %vm3536_vm11, %v5744_v1, %v3542_v35  ;;  %v3523_v6 = vrot.slane %v5744_v1, 3  ;;  %v4301_v1 = vld [vmem:[#allocation17 + $0x18] sm:$0xff] }
 0xe14   : > { %v3577_v10 = vrot.slane %v3558_v58, 3  ;;  %v5387_v32 = vpack.c.bf16 %v4301_v1, %v4300_v18  ;;  %v5402_v58 = vpack.c.bf16 %v4311_v48, %v4310_v26  ;;  %v3882_v48 = vld [vmem:[#allocation11 + $0x20] sm:$0xff] }
 0xe15   : > { %v3524_v5 = vsel %vm1264_vm6, %v3523_v6, %v3522_v61 }
 0xe16   : > { %v5746_v46 = vpop.eup %5745  ;;  %v3578_v23 = vsel %vm1264_vm6, %v3577_v10, %v3576_v21 }
 0xe17   : > { %v3559_v30 = vsel %vm3536_vm11, %v5746_v46, %v3543_v15  ;;  %v3525_v43 = vrot.slane %v5746_v46, 2  ;;  %v5396_v15 = vpack.c.bf16 %v4307_v19, %v4306_v13  ;;  %v4309_v46 = vld [vmem:[#allocation17 + $0x58] sm:$0xff]  ;;  %v3880_v19 = vld [vmem:[#allocation11 + $0x10] sm:$0xff] }
 0xe18   : > { %v3579_v12 = vrot.slane %v3559_v30, 2  ;;  %v5399_v47 = vpack.c.bf16 %v4309_v46, %v4308_v39 }
 0xe19   : > { %v3526_v24 = vsel %vm1266_vm7, %v3525_v43, %v3524_v5  ;;  %v7095_v5 = vstv %s4443_s27 }
 0xe1a   : > { %v5748_v36 = vpop.eup %5747  ;;  %v3580_v50 = vsel %vm1266_vm7, %v3579_v12, %v3578_v23  ;;  %vm4445_vm12 = vcmp.eq.s32.totalorder %v7095_v5, 1 }
 0xe1b   : > { %v3527_v11 = vrot.slane %v5748_v36, 1  ;;  %v3560_v7 = vsel %vm3536_vm11, %v5748_v36, %v3544_v60 }
 0xe1c   : > { %v3581_v3 = vrot.slane %v3560_v7, 1 }
 0xe1d   : > { %v3528_v62 = vsel %vm1268_vm8, %v3527_v11, %v3526_v24 }
 0xe1e   : > { %4766 = vst [vmem:[%s6591_s2 + $0x10] sm:$0xff] %v3528_v62  ;;  %v7077_v25 = vsel %vm1268_vm8, %v3581_v3, %v3580_v50 }
 0xe1f   : > { %3723 = vmatmul.mubr.f32.vlgmr.msra.gmra.mrb[6].mxu0 %v7077_v25  ;;  %3794 = vmatmul.mubr.f32.vlgmr.msra.gmra.mrb[6].mxu1 %v7077_v25 }
 0xe20   : > { %4988 = vmatprep.mubr.msk.f32.mxu1 %vm6197_vm0, %v6195_v9  ;;  %5385 = vmatpush3.bf16.msra.mxu1 %v5384_v33  ;;  %v4305_v9 = vld [vmem:[#allocation17 + $0x38] sm:$0xff] }
 0xe21   : > { %5386 = vmatprep.subr.bf16.mxu1 %v6196_v14  ;;  %v5393_v35 = vpack.c.bf16 %v4305_v9, %v4304_v28 }
 0xe24   : > { %5388 = vmatpush3.bf16.msra.mxu1 %v5387_v32  ;;  %v3878_v32 = vld [vmem:[#allocation11] sm:$0xff] }
 0xe25   : > { %5389 = vmatprep.subr.bf16.mxu1 %v6196_v14 }
 0xe28   : > { %5391 = vmatpush3.bf16.msra.mxu1 %v5390_v34  ;;  %v3879_v34 = vld [vmem:[#allocation11 + $0x8] sm:$0xff] }
 0xe29   : > { %5392 = vmatprep.subr.bf16.mxu1 %v6196_v14 }
 0xe2c   : > { %5394 = vmatpush3.bf16.msra.mxu1 %v5393_v35 }
 0xe2d   : > { %5395 = vmatprep.subr.bf16.mxu1 %v6196_v14 }
 0xe30   : > { %5397 = vmatpush3.bf16.msra.mxu1 %v5396_v15 }
 0xe31   : > { %5398 = vmatprep.subr.bf16.mxu1 %v6196_v14 }
 0xe34   : > { %5400 = vmatpush3.bf16.msra.mxu1 %v5399_v47 }
 0xe35   : > { %5401 = vmatprep.subr.bf16.mxu1 %v6196_v14 }
 0xe38   : > { %5403 = vmatpush3.bf16.msra.mxu1 %v5402_v58 }
 0xe39   : > { %5404 = vmatprep.subr.bf16.mxu1 %v6196_v14 }
 0xe3c   : > { %5406 = vmatpush3.bf16.msra.mxu1 %v5405_v31  ;;  %v3881_v31 = vld [vmem:[#allocation11 + $0x18] sm:$0xff] }
 0xef2   : > { %v3724_v30 = vpop.f32.mrb[6].mxu0  ;;  %v3795_v17 = vpop.f32.mrb[6].mxu1 }
 0xef3   : > { %v5413_v2 = vadd.f32 %v3724_v30, %v6632_v41  ;;  %v3726_v6 = vpop.f32.mrb[7].mxu0  ;;  %v3797_v8 = vpop.f32.mrb[7].mxu1  ;;  %v5421_v60 = vadd.f32 %v3795_v17, %v6650_v55 }
 0xef4   : > { %v5414_v10 = vadd.f32 %v3726_v6, %v6635_v42  ;;  %v5422_v56 = vadd.f32 %v3797_v8, %v6643_v52  ;;  %v3883_v6 = vld [vmem:[#allocation11 + $0x28] sm:$0xff] }
 0xef5   : > { %v4767_v43 = vmul.f32 -1.442695, %v5413_v2 }
 0xef6   : > { %v4768_v37 = vmul.f32 -1.442695, %v5414_v10  ;;  %v4769_v12 = vmul.f32 -1.442695, %v5422_v56 }
 0xef7   : > { %5749 = vpow2.f32 %v4767_v43 }
 0xef8   : > { %5751 = vpow2.f32 %v4768_v37  ;;  %v3884_v37 = vld [vmem:[#allocation11 + $0x30] sm:$0xff] }
 0xef9   : > { %5753 = vpow2.f32 %v4769_v12 }
 0xefa   : > { %5755 = vtanh.f32 %v5421_v60  ;;  %v3885_v60 = vld [vmem:[#allocation11 + $0x38] sm:$0xff] }
 0xf01   : > { %v5750_v14 = vpop.eup %5749 }
 0xf02   : > { %v5752_v36 = vpop.eup %5751  ;;  %v3807_v20 = vadd.f32 1.0, %v5750_v14 }
 0xf03   : > { %v3813_v41 = vadd.f32 1.0, %v5752_v36  ;;  %v5754_v42 = vpop.eup %5753 }
 0xf04   : > { %5757 = vrcp.f32 %v3807_v20  ;;  %v5756_v61 = vpop.eup %5755  ;;  %v3820_v7 = vadd.f32 1.0, %v5754_v42 }
 0xf05   : > { %5759 = vrcp.f32 %v3813_v41 }
 0xf06   : > { %5761 = vrcp.f32 %v3820_v7 }
 0xf0e   : > { %v5758_v21 = vpop.eup %5757 }
 0xf0f   : > { %v5760_v52 = vpop.eup %5759  ;;  %v3824_v11 = vmul.f32 %v5758_v21, %v5756_v61 }
 0xf10   : > { %v3823_v55 = vmul.f32 %v5760_v52, %v6962_v57  ;;  %v5762_v3 = vpop.eup %5761 }
 0xf12   : > { %v3825_v23 = vadd.f32 %v3824_v11, %v3823_v55 }
 0xf14   : > { %v4494_v24 = vsel %vm4445_vm12, %v3825_v23, %v6962_v57  ;;  %5763 = vtanh.f32 %v3825_v23 }
 0xf15   : > { %4495 = vst [vmem:[#allocation3] sm:$0xff] %v4494_v24 }
 0xf1e   : > { %v5764_v50 = vpop.eup %5763 }
 0xf1f   : > { %v3827_v62 = vmul.f32 %v5764_v50, %v5762_v3 }
 0xf21   : > { %4989 = vmatmul.mubr.f32.vlgmr.msra.gmra.mrb[10].mxu1 %v3827_v62  ;;  %v3836_v29 = vrot.slane %v3827_v62, %v6664_v16  ;;  %v3829_v0 = vcombine.high %v3827_v62, %v3827_v62 }
 0xf23   : > { %v3852_v33 = vrot.slane %v3836_v29, %v6664_v16  ;;  %v3844_v18 = vcombine.high %v3836_v29, %v3836_v29  ;;  %v3843_v1 = vrot.slane %v3829_v0, %v6664_v16 }
 0xf25   : > { %v3889_v22 = vrot.slane %v3852_v33, %v6623_v38  ;;  %v3866_v27 = vrot.slane %v3844_v18, %v6664_v16  ;;  %v3874_v57 = vcombine.high %v3852_v33, %v3852_v33  ;;  %v3859_v13 = vrot.slane %v3843_v1, %v6664_v16 }
 0xf26   : > { %v3845_v26 = vcombine.high %v3843_v1, %v3843_v1 }
 0xf27   : > { %v3926_v28 = vmul.f32 %v3889_v22, %v3878_v32  ;;  %v3893_v9 = vrot.slane %v3866_v27, %v6623_v38  ;;  %v3897_v35 = vrot.slane %v3874_v57, %v6623_v38  ;;  %v3905_v46 = vrot.slane %v3859_v13, %v6623_v38 }
 0xf28   : > { %v3876_v47 = vcombine.high %v3866_v27, %v3866_v27  ;;  %v3873_v49 = vrot.slane %v3845_v26, %v6664_v16  ;;  %v3875_v2 = vcombine.high %v3859_v13, %v3859_v13 }
 0xf29   : > { %3934 = vadd.xlane.f32.xlu0 %v3926_v28  ;;  %v3927_v39 = vmul.f32 %v3893_v9, %v3879_v34  ;;  %v3928_v15 = vmul.f32 %v3897_v35, %v3880_v19  ;;  %v3930_v58 = vmul.f32 %v3905_v46, %v3882_v48 }
 0xf2a   : > { %v3901_v51 = vrot.slane %v3876_v47, %v6623_v38  ;;  %v3909_v17 = vrot.slane %v3873_v49, %v6623_v38  ;;  %v3913_v10 = vrot.slane %v3875_v2, %v6623_v38  ;;  %v3877_v43 = vcombine.high %v3873_v49, %v3873_v49 }
 0xf2b   : > { %3936 = vadd.xlane.f32.xlu1 %v3927_v39 }
 0xf2c   : > { %v3929_v30 = vmul.f32 %v3901_v51, %v3881_v31  ;;  %v3931_v8 = vmul.f32 %v3909_v17, %v3883_v6  ;;  %v3932_v56 = vmul.f32 %v3913_v10, %v3884_v37  ;;  %v3917_v12 = vrot.slane %v3877_v43, %v6623_v38 }
 0xf2d   : > { %3938 = vadd.xlane.f32.xlu0 %v3928_v15 }
 0xf2e   : > { %v3933_v16 = vmul.f32 %v3917_v12, %v3885_v60 }
 0xf31   : > { %3942 = vadd.xlane.f32.xlu0 %v3930_v58 }
 0xf35   : > { %3940 = vadd.xlane.f32.xlu0 %v3929_v30 }
 0xf39   : > { %3944 = vadd.xlane.f32.xlu0 %v3931_v8 }
 0xf3d   : > { %3946 = vadd.xlane.f32.xlu0 %v3932_v56 }
 0xf41   : > { %3948 = vadd.xlane.f32.xlu0 %v3933_v16 }
 0xfb6   : > { %v3935_v14 = vpop.xlane.xlu0 %3934 }
 0xfb7   : > { %v3961_v21 = vrot.slane %v3935_v14, %v6683_v4 }
 0xfb8   : > { %v3937_v41 = vpop.xlane.xlu1 %3936 }
 0xfb9   : > { %v3965_v61 = vrot.slane %v3937_v41, %v6683_v4 }
 0xfba   : > { %v3939_v36 = vpop.xlane.xlu0 %3938 }
 0xfbb   : > { %v3969_v52 = vrot.slane %v3939_v36, %v6683_v4  ;;  %v3990_v7 = vsel %vm1256_vm2, %v3965_v61, %v3961_v21 }
 0xfbd   : > { %v3991_v23 = vsel %vm1258_vm3, %v3969_v52, %v3990_v7 }
 0xfbe   : > { %v3943_v20 = vpop.xlane.xlu0 %3942 }
 0xfbf   : > { %v3977_v62 = vrot.slane %v3943_v20, %v6683_v4 }
 0xfc2   : > { %v3941_v42 = vpop.xlane.xlu0 %3940 }
 0xfc3   : > { %v3973_v55 = vrot.slane %v3941_v42, %v6683_v4 }
 0xfc5   : > { %v3992_v3 = vsel %vm1260_vm4, %v3973_v55, %v3991_v23 }
 0xfc6   : > { %v3945_v11 = vpop.xlane.xlu0 %3944  ;;  %v3993_v33 = vsel %vm1262_vm5, %v3977_v62, %v3992_v3 }
 0xfc7   : > { %v3981_v50 = vrot.slane %v3945_v11, %v6683_v4 }
 0xfc9   : > { %v3994_v1 = vsel %vm1264_vm6, %v3981_v50, %v3993_v33 }
 0xfca   : > { %v3947_v24 = vpop.xlane.xlu0 %3946 }
 0xfcb   : > { %v3985_v29 = vrot.slane %v3947_v24, %v6683_v4 }
 0xfcd   : > { %v3995_v32 = vsel %vm1266_vm7, %v3985_v29, %v3994_v1 }
 0xfce   : > { %v3949_v0 = vpop.xlane.xlu0 %3948 }
 0xfcf   : > { %v3989_v18 = vrot.slane %v3949_v0, %v6683_v4 }
 0xfd1   : > { %v3996_v22 = vsel %vm1268_vm8, %v3989_v18, %v3995_v32 }
 0xfd2   : > { %v3998_v27 = vsel %vm1271_vm9, %v3996_v22, -inf }
 0xfd3   : > { %3999 = vmax.xlane.f32.xlu0 %v3998_v27 }
 0xff4   : > { %v7132_v57 = vpop.f32.mrb[10].mxu1 }
 0xff5   : > { %v4990_v34 = vpop.f32.mrb[11].mxu1 }
0x1060   : > { %v4000_v28 = vpop.xlane.xlu0 %3999 }
0x1061   : > { %v4005_v9 = vrot.slane %v4000_v28, %v6623_v38  ;;  %v4009_v35 = vrot.slane %v4000_v28, %v6629_v40  ;;  %v4013_v13 = vrot.slane %v4000_v28, %v6646_v53  ;;  %v4017_v19 = vrot.slane %v4000_v28, %v6638_v44 }
0x1062   : > { %v4021_v39 = vrot.slane %v4000_v28, %v6707_v45  ;;  %v4025_v26 = vrot.slane %v4000_v28, %v6711_v54  ;;  %v4029_v49 = vrot.slane %v4000_v28, %v6715_v59  ;;  %v4033_v17 = vrot.slane %v4000_v28, %v6719_v63 }
0x1063   : > { %v4042_v15 = vsub.f32 %v3935_v14, %v4005_v9  ;;  %v4043_v46 = vsub.f32 %v3937_v41, %v4009_v35  ;;  %v4044_v47 = vsub.f32 %v3939_v36, %v4013_v13  ;;  %v4045_v48 = vsub.f32 %v3941_v42, %v4017_v19 }
0x1064   : > { %v4046_v31 = vsub.f32 %v3943_v20, %v4021_v39  ;;  %v4047_v2 = vsub.f32 %v3945_v11, %v4025_v26  ;;  %v4048_v8 = vsub.f32 %v3947_v24, %v4029_v49  ;;  %v4049_v43 = vsub.f32 %v3949_v0, %v4033_v17 }
0x1065   : > { %v4050_v58 = vmul.f32 1.442695, %v4042_v15  ;;  %v4052_v51 = vmul.f32 1.442695, %v4043_v46  ;;  %v4054_v30 = vmul.f32 1.442695, %v4044_v47 }
0x1066   : > { %v4056_v6 = vmul.f32 1.442695, %v4045_v48  ;;  %v4058_v10 = vmul.f32 1.442695, %v4046_v31  ;;  %v4060_v37 = vmul.f32 1.442695, %v4047_v2 }
0x1067   : > { %5765 = vpow2.f32 %v4050_v58  ;;  %v4062_v56 = vmul.f32 1.442695, %v4048_v8  ;;  %v4064_v12 = vmul.f32 1.442695, %v4049_v43 }
0x1068   : > { %5767 = vpow2.f32 %v4052_v51 }
0x1069   : > { %5769 = vpow2.f32 %v4054_v30 }
0x106a   : > { %5771 = vpow2.f32 %v4056_v6 }
0x106b   : > { %5773 = vpow2.f32 %v4058_v10 }
0x106c   : > { %5775 = vpow2.f32 %v4060_v37 }
0x106d   : > { %5777 = vpow2.f32 %v4062_v56 }
0x106e   : > { %5779 = vpow2.f32 %v4064_v12  ;;  %v4196_v12 = vld [vmem:[#allocation13 + $0x10] sm:$0xff] }
0x1071   : > { %v5766_v60 = vpop.eup %5765 }
0x1072   : > { %v5768_v16 = vpop.eup %5767  ;;  %4075 = vperm.xlu0 %5598, %v5766_v60  }
0x1073   : > { %4078 = vperm.xlu1 %5597, %v5768_v16   ;;  %v5770_v14 = vpop.eup %5769 }
0x1074   : > { %v5772_v36 = vpop.eup %5771 }
0x1075   : > { %v5774_v20 = vpop.eup %5773 }
0x1076   : > { %4081 = vperm.xlu0 %5598, %v5770_v14   ;;  %v5776_v41 = vpop.eup %5775 }
0x1077   : > { %4084 = vperm.xlu1 %5597, %v5772_v36   ;;  %v5778_v42 = vpop.eup %5777 }
0x1078   : > { %v5780_v61 = vpop.eup %5779 }
0x107a   : > { %4087 = vperm.xlu0 %5598, %v5774_v20  }
0x107b   : > { %4090 = vperm.xlu1 %5597, %v5776_v41  }
0x107e   : > { %4093 = vperm.xlu0 %5598, %v5778_v42  }
0x107f   : > { %4096 = vperm.xlu1 %5597, %v5780_v61  }
0x10f1   : > { %v4076_v21 = vpop.permute.xlu0 %4075 }
0x10f2   : > { %v4079_v52 = vpop.permute.xlu1 %4078  ;;  %v4101_v7 = vrot.slane %v4076_v21, %v6683_v4  ;;  %v4197_v21 = vld [vmem:[#allocation13 + $0x18] sm:$0xff] }
0x10f3   : > { %v4105_v11 = vrot.slane %v4079_v52, %v6683_v4 }
0x10f5   : > { %v4082_v55 = vpop.permute.xlu0 %4081  ;;  %v4130_v3 = vsel %vm1256_vm2, %v4105_v11, %v4101_v7 }
0x10f6   : > { %v4085_v23 = vpop.permute.xlu1 %4084  ;;  %v4109_v24 = vrot.slane %v4082_v55, %v6683_v4 }
0x10f7   : > { %v4113_v50 = vrot.slane %v4085_v23, %v6683_v4 }
0x10f8   : > { %v4131_v62 = vsel %vm1258_vm3, %v4109_v24, %v4130_v3  ;;  %v4198_v24 = vld [vmem:[#allocation13 + $0x20] sm:$0xff] }
0x10f9   : > { %v4088_v29 = vpop.permute.xlu0 %4087  ;;  %v4132_v1 = vsel %vm1260_vm4, %v4113_v50, %v4131_v62 }
0x10fa   : > { %v4091_v0 = vpop.permute.xlu1 %4090  ;;  %v4117_v33 = vrot.slane %v4088_v29, %v6683_v4 }
0x10fb   : > { %v4121_v18 = vrot.slane %v4091_v0, %v6683_v4 }
0x10fc   : > { %v4133_v32 = vsel %vm1262_vm5, %v4117_v33, %v4132_v1  ;;  %v4199_v33 = vld [vmem:[#allocation13 + $0x28] sm:$0xff] }
0x10fd   : > { %v4094_v22 = vpop.permute.xlu0 %4093  ;;  %v4134_v9 = vsel %vm1264_vm6, %v4121_v18, %v4133_v32 }
0x10fe   : > { %v4097_v27 = vpop.permute.xlu1 %4096  ;;  %v4125_v34 = vrot.slane %v4094_v22, %v6683_v4 }
0x10ff   : > { %v4129_v28 = vrot.slane %v4097_v27, %v6683_v4 }
0x1100   : > { %v4135_v35 = vsel %vm1266_vm7, %v4125_v34, %v4134_v9 }
0x1101   : > { %v4136_v13 = vsel %vm1268_vm8, %v4129_v28, %v4135_v35 }
0x1102   : > { %v4138_v19 = vsel %vm1271_vm9, %v4136_v13, 0.0  ;;  %v4200_v13 = vld [vmem:[#allocation13 + $0x30] sm:$0xff] }
0x1103   : > { %4139 = vadd.xlane.f32.xlu0 %v4138_v19 }
0x1190   : > { %v4140_v39 = vpop.xlane.xlu0 %4139 }
0x1191   : > { %5781 = vrcp.f32 %v4140_v39 }
0x119b   : > { %v5782_v15 = vpop.eup %5781 }
0x119c   : > { %v4142_v46 = vmul.f32 %v5782_v15, %v4140_v39 }
0x119e   : > { %v4143_v47 = vsub.f32 2.0, %v4142_v46 }
0x11a0   : > { %v4144_v26 = vmul.f32 %v5782_v15, %v4143_v47 }
0x11a2   : > { %v4153_v48 = vrot.slane %v4144_v26, %v6629_v40  ;;  %v4157_v4 = vrot.slane %v4144_v26, %v6646_v53  ;;  %v4149_v49 = vrot.slane %v4144_v26, %v6623_v38  ;;  %v4161_v30 = vrot.slane %v4144_v26, %v6638_v44  ;;  %v4195_v44 = vld [vmem:[#allocation13 + $0x8] sm:$0xff] }
0x11a3   : > { %v4165_v2 = vrot.slane %v4144_v26, %v6707_v45  ;;  %v4169_v8 = vrot.slane %v4144_v26, %v6711_v54  ;;  %v4173_v53 = vrot.slane %v4144_v26, %v6715_v59  ;;  %v4177_v38 = vrot.slane %v4144_v26, %v6719_v63 }
0x11a4   : > { %v4187_v58 = vmul.f32 %v5768_v16, %v4153_v48  ;;  %v4188_v51 = vmul.f32 %v5770_v14, %v4157_v4  ;;  %v4186_v31 = vmul.f32 %v5766_v60, %v4149_v49  ;;  %v4189_v17 = vmul.f32 %v5772_v36, %v4161_v30  ;;  %v4194_v14 = vld [vmem:[#allocation13] sm:$0xff] }
0x11a5   : > { %v4190_v6 = vmul.f32 %v5774_v20, %v4165_v2  ;;  %v4191_v40 = vmul.f32 %v5776_v41, %v4169_v8  ;;  %v4192_v10 = vmul.f32 %v5778_v42, %v4173_v53  ;;  %v4193_v43 = vmul.f32 %v5780_v61, %v4177_v38  ;;  %v4201_v2 = vld [vmem:[#allocation13 + $0x38] sm:$0xff] }
0x11a6   : > { %4209 = vperm.xlu1 %5597, %v4187_v58   ;;  %v4385_v49 = vrot.slane %v7132_v57, 1 }
0x11aa   : > { %4214 = vperm.xlu1 %5597, %v4188_v51  }
0x11ae   : > { %4204 = vperm.xlu1 %5597, %v4186_v31  }
0x11b2   : > { %4219 = vperm.xlu1 %5597, %v4189_v17  }
0x11b6   : > { %4224 = vperm.xlu1 %5597, %v4190_v6   ;;  %v4386_v6 = vrot.slane %v7132_v57, 2 }
0x11ba   : > { %4229 = vperm.xlu1 %5597, %v4191_v40  }
0x11be   : > { %4234 = vperm.xlu1 %5597, %v4192_v10  }
0x11c2   : > { %4239 = vperm.xlu1 %5597, %v4193_v43  }
0x1225   : > { %v4210_v37 = vpop.permute.xlu1 %4209 }
0x1226   : > { %v4243_v56 = vmul.f32 %v4210_v37, %v4195_v44  ;;  %v4387_v37 = vrot.slane %v7132_v57, 3 }
0x1228   : > { %v4256_v60 = vrot.slane %v4243_v56, 4 }
0x1229   : > { %v4215_v45 = vpop.permute.xlu1 %4214 }
0x122a   : > { %v4244_v16 = vmul.f32 %v4215_v45, %v4196_v12  ;;  %v4257_v20 = vadd.f32 %v4256_v60, %v4243_v56  ;;  %v4388_v60 = vrot.slane %v7132_v57, 4 }
0x122c   : > { %v4262_v54 = vrot.slane %v4244_v16, 4  ;;  %v4258_v63 = vrot.slane %v4257_v20, 2 }
0x122d   : > { %v4205_v36 = vpop.permute.xlu1 %4204 }
0x122e   : > { %v4242_v41 = vmul.f32 %v4205_v36, %v4194_v14  ;;  %v4263_v59 = vadd.f32 %v4262_v54, %v4244_v16  ;;  %v4259_v50 = vadd.f32 %v4258_v63, %v4257_v20  ;;  %v4389_v36 = vrot.slane %v7132_v57, 5 }
0x1230   : > { %v4250_v42 = vrot.slane %v4242_v41, 4  ;;  %v4264_v7 = vrot.slane %v4263_v59, 2  ;;  %v4260_v27 = vrot.slane %v4259_v50, 1 }
0x1231   : > { %v4220_v52 = vpop.permute.xlu1 %4219 }
0x1232   : > { %v4251_v11 = vadd.f32 %v4250_v42, %v4242_v41  ;;  %v4245_v61 = vmul.f32 %v4220_v52, %v4197_v21  ;;  %v4265_v29 = vadd.f32 %v4264_v7, %v4263_v59  ;;  %v4261_v26 = vadd.f32 %v4260_v27, %v4259_v50 }
0x1233   : > { %v4449_v27 = vrot.slane %v7077_v25, 3 }
0x1234   : > { %v4252_v55 = vrot.slane %v4251_v11, 2  ;;  %v4268_v23 = vrot.slane %v4245_v61, 4  ;;  %v4266_v9 = vrot.slane %v4265_v29, 1  ;;  %v4401_v10 = vadd.f32 %v4385_v49, %v4261_v26 }
0x1235   : > { %v4225_v3 = vpop.permute.xlu1 %4224 }
0x1236   : > { %v4269_v62 = vadd.f32 %v4268_v23, %v4245_v61  ;;  %v4246_v0 = vmul.f32 %v4225_v3, %v4198_v24  ;;  %v4253_v18 = vadd.f32 %v4252_v55, %v4251_v11  ;;  %v4267_v4 = vadd.f32 %v4266_v9, %v4265_v29 }
0x1237   : > { %5783 = vtanh.f32 %v4401_v10  ;;  %v4390_v61 = vrot.slane %v7132_v57, 6  ;;  %v4391_v3 = vrot.slane %v7132_v57, 7 }
0x1238   : > { %v4270_v1 = vrot.slane %v4269_v62, 2  ;;  %v4274_v32 = vrot.slane %v4246_v0, 4  ;;  %v4254_v19 = vrot.slane %v4253_v18, 1  ;;  %v4402_v44 = vadd.f32 %v4386_v6, %v4267_v4 }
0x1239   : > { %v4230_v22 = vpop.permute.xlu1 %4229 }
0x123a   : > { %v4271_v34 = vadd.f32 %v4270_v1, %v4269_v62  ;;  %v4247_v28 = vmul.f32 %v4230_v22, %v4199_v33  ;;  %v4275_v35 = vadd.f32 %v4274_v32, %v4246_v0  ;;  %v4255_v31 = vadd.f32 %v4254_v19, %v4253_v18 }
0x123b   : > { %5785 = vtanh.f32 %v4402_v44  ;;  %v4447_v18 = vrot.slane %v7077_v25, 1  ;;  %v4451_v19 = vrot.slane %v7077_v25, 5 }
0x123c   : > { %v4280_v39 = vrot.slane %v4247_v28, 4  ;;  %v4272_v15 = vrot.slane %v4271_v34, 1  ;;  %v4276_v46 = vrot.slane %v4275_v35, 2  ;;  %v4400_v45 = vadd.f32 %v7132_v57, %v4255_v31 }
0x123d   : > { %v4235_v47 = vpop.permute.xlu1 %4234  ;;  %v4450_v57 = vrot.slane %v7077_v25, 4 }
0x123e   : > { %v4281_v48 = vadd.f32 %v4280_v39, %v4247_v28  ;;  %v4248_v58 = vmul.f32 %v4235_v47, %v4200_v13  ;;  %v4277_v51 = vadd.f32 %v4276_v46, %v4275_v35  ;;  %v4273_v8 = vadd.f32 %v4272_v15, %v4271_v34 }
0x123f   : > { %5787 = vtanh.f32 %v4400_v45  ;;  %v4448_v28 = vrot.slane %v7077_v25, 2  ;;  %v4452_v47 = vrot.slane %v7077_v25, 6 }
0x1240   : > { %v4282_v30 = vrot.slane %v4281_v48, 2  ;;  %v4286_v17 = vrot.slane %v4248_v58, 4  ;;  %v4278_v40 = vrot.slane %v4277_v51, 1  ;;  %v4403_v54 = vadd.f32 %v4387_v37, %v4273_v8 }
0x1241   : > { %v4240_v53 = vpop.permute.xlu1 %4239  ;;  %v5784_v62 = vpop.eup %5783  ;;  %v4453_v37 = vrot.slane %v7077_v25, 7 }
0x1242   : > { %v4283_v38 = vadd.f32 %v4282_v30, %v4281_v48  ;;  %v4287_v43 = vadd.f32 %v4286_v17, %v4248_v58  ;;  %v4279_v56 = vadd.f32 %v4278_v40, %v4277_v51  ;;  %v4249_v12 = vmul.f32 %v4240_v53, %v4201_v2 }
0x1243   : > { %5789 = vtanh.f32 %v4403_v54  ;;  %v4463_v22 = vsel %vm4445_vm12, %v5784_v62, %v4447_v18  ;;  %v4424_v9 = vrot.slane %v5784_v62, 7 }
0x1244   : > { %v4284_v16 = vrot.slane %v4283_v38, 1  ;;  %v4288_v14 = vrot.slane %v4287_v43, 2  ;;  %v4292_v20 = vrot.slane %v4249_v12, 4  ;;  %v4404_v41 = vadd.f32 %v4388_v60, %v4279_v56 }
0x1245   : > { %v5786_v29 = vpop.eup %5785  ;;  %v4478_v39 = vrot.slane %v4463_v22, 7 }
0x1246   : > { %v4285_v59 = vadd.f32 %v4284_v16, %v4283_v38  ;;  %v4289_v21 = vadd.f32 %v4288_v14, %v4287_v43  ;;  %v4293_v42 = vadd.f32 %v4292_v20, %v4249_v12  ;;  %5791 = vtanh.f32 %v4404_v41 }
0x1247   : > { %v4464_v15 = vsel %vm4445_vm12, %v5786_v29, %v4448_v28  ;;  %v4426_v48 = vrot.slane %v5786_v29, 6 }
0x1248   : > { %v4405_v52 = vadd.f32 %v4389_v36, %v4285_v59  ;;  %v4290_v63 = vrot.slane %v4289_v21, 1  ;;  %v4294_v11 = vrot.slane %v4293_v42, 2  ;;  %v4480_v2 = vrot.slane %v4464_v15, 6 }
0x1249   : > { %v5788_v33 = vpop.eup %5787 }
0x124a   : > { %v4291_v7 = vadd.f32 %v4290_v63, %v4289_v21  ;;  %5793 = vtanh.f32 %v4405_v52  ;;  %v4295_v55 = vadd.f32 %v4294_v11, %v4293_v42  ;;  %v4462_v35 = vsel %vm4445_vm12, %v5788_v33, %v7077_v25  ;;  %v4502_v52 = vld [vmem:[#allocation3] sm:$0xff] (!%p4771_p12) }
0x124b   : > { %v4425_v58 = vsel %vm1256_vm2, %v4424_v9, %v5788_v33  ;;  %v4479_v49 = vsel %vm1256_vm2, %v4478_v39, %v4462_v35  ;;  %4503 = vst [vmem:[#allocation22] sm:$0xff] (!%p4771_p12), %v4502_v52 }
0x124c   : > { %v4406_v23 = vadd.f32 %v4390_v61, %v4291_v7  ;;  %v4296_v24 = vrot.slane %v4295_v55, 1  ;;  %v4427_v40 = vsel %vm1258_vm3, %v4426_v48, %v4425_v58  ;;  %v4481_v38 = vsel %vm1258_vm3, %v4480_v2, %v4479_v49 }
0x124d   : > { %v5790_v1 = vpop.eup %5789 }
0x124e   : > { %5795 = vtanh.f32 %v4406_v23  ;;  %v4297_v50 = vadd.f32 %v4296_v24, %v4295_v55  ;;  %v4465_v13 = vsel %vm4445_vm12, %v5790_v1, %v4449_v27  ;;  %v4428_v4 = vrot.slane %v5790_v1, 5 }
0x124f   : > { %v4482_v31 = vrot.slane %v4465_v13, 5 }
0x1250   : > { %v4407_v0 = vadd.f32 %v4391_v3, %v4297_v50  ;;  %v5792_v32 = vpop.eup %5791  ;;  %v4429_v43 = vsel %vm1260_vm4, %v4428_v4, %v4427_v40 }
0x1251   : > { %v4466_v46 = vsel %vm4445_vm12, %v5792_v32, %v4450_v57  ;;  %v4430_v30 = vrot.slane %v5792_v32, 4  ;;  %v4483_v12 = vsel %vm1260_vm4, %v4482_v31, %v4481_v38 }
0x1252   : > { %5797 = vtanh.f32 %v4407_v0  ;;  %v4484_v6 = vrot.slane %v4466_v46, 4 }
0x1253   : > { %v4431_v45 = vsel %vm1262_vm5, %v4430_v30, %v4429_v43 }
0x1254   : > { %v5794_v34 = vpop.eup %5793  ;;  %v4485_v60 = vsel %vm1262_vm5, %v4484_v6, %v4483_v12 }
0x1255   : > { %v4467_v51 = vsel %vm4445_vm12, %v5794_v34, %v4451_v19  ;;  %v4432_v8 = vrot.slane %v5794_v34, 3 }
0x1256   : > { %v4486_v53 = vrot.slane %v4467_v51, 3 }
0x1257   : > { %v4433_v16 = vsel %vm1264_vm6, %v4432_v8, %v4431_v45 }
0x1258   : > { %v5796_v26 = vpop.eup %5795  ;;  %v4487_v36 = vsel %vm1264_vm6, %v4486_v53, %v4485_v60 }
0x1259   : > { %v4468_v17 = vsel %vm4445_vm12, %v5796_v26, %v4452_v47  ;;  %v4434_v10 = vrot.slane %v5796_v26, 2 }
0x125a   : > { %v4488_v44 = vrot.slane %v4468_v17, 2 }
0x125b   : > { %v4435_v20 = vsel %vm1266_vm7, %v4434_v10, %v4433_v16  ;;  %4499 = sbr.rel (%p4771_p12) target bundleno = 4714 (0x126a), region = 96 }
0x125c   : > { %v5798_v56 = vpop.eup %5797  ;;  %v4489_v25 = vsel %vm1266_vm7, %v4488_v44, %v4487_v36 }
0x125d   : > { %v4436_v14 = vrot.slane %v5798_v56, 1  ;;  %v4469_v54 = vsel %vm4445_vm12, %v5798_v56, %v4453_v37 }
0x125e   : > { %v4490_v41 = vrot.slane %v4469_v54, 1 }
0x125f   : > { %v4437_v59 = vsel %vm1268_vm8, %v4436_v14, %v4435_v20 }
0x1260   : > { %4770 = vst [vmem:[%s6591_s2 + $0x18] sm:$0xff] %v4437_v59  ;;  %v4491_v21 = vsel %vm1268_vm8, %v4490_v41, %v4489_v25 }
0x1261   : > { %4493 = vst [vmem:[#allocation2] sm:$0xff] %v4491_v21 }
0x1268   : > { %v4500_v42 = vld [vmem:[#allocation2] sm:$0xff] }
0x1269   : > { %4501 = vst [vmem:[#allocation20] sm:$0xff] %v4500_v42 }
0x126a PF: > { %s6200_s25 = smov [#allocation20]   ;;  %s7372_s24 = sld [smem:[#allocation30_spill]] }
0x126b   : > { %s4535_s26 = sshll.u32 %s6200_s25, 4  ;;  %p7373_p8 = scmp.ne.s32.totalorder %s7360_s1, 0  ;;  %s4536_s26 = int_to_ptr.vmem [resolvable:$true] %s4535_s26 }
0x126c   : > { %s6027_s10 = scalar_lea.vmem %s4536_s26, 128  ;;  %p6034_p3 = scmp.lt.s32.totalorder %s4536_s26, %s4536_s26 }
0x126d   : > { %p6028_p0 = scmp.ne.s32.totalorder %s4536_s26, %s6027_s10  ;;  %p6035_p11 = scmp.lt.s32.totalorder %s6027_s10, %s6027_s10 }
0x126f   : > { %p6029_p9 = pnand %p6028_p0, %p7373_p8  ;;  %p6036_p2 = por %p6035_p11, %p6034_p3 }
0x1270   : > { %s4782_s23 = sshll.u32 %s7372_s24, 9 }
0x1271   : > { %p6030_p1 = pneg %p6029_p9 }
0x1273   : > { %p6037_p10 = pnand %p6036_p2, %p6030_p1 }
0x1275   : > { %6040 = shalt.err (!%p6037_p10)
}
0x1276   : > { %s7374_s3 = sld [smem:[#allocation36_spill]] }
0x127c   : > { %s6041_s13 = scalar_lea.hbm %s7374_s3, 128 }
0x127d   : > { %p6042_p6 = scmp.ne.s32.totalorder %s7374_s3, %s6041_s13  ;;  %p6047_p7 = scmp.lt.u32.totalorder %s6041_s13, %s7374_s3 }
0x127f   : > { %p6043_p13 = pnand %p6042_p6, %p7373_p8 }
0x1281   : > { %p6044_p5 = pneg %p6043_p13 }
0x1283   : > { %p6049_p4 = pnand %p6047_p7, %p6044_p5 }
0x1285   : > { %6052 = shalt.err (!%p6049_p4)
}
0x1286   : > { %5471 = dma.vmem_to_hbm [thread:$0]  (%p7373_p8), %s4536_s26, 128, %s7374_s3, [#allocation21]  }
0x1287   : > { %s7375_s9 = sld [smem:[#allocation35_spill]]  ;;  %s4519_s14 = sshll.u32 %s6591_s2, 4  ;;  %s7239_s14 = int_to_ptr.vmem [resolvable:$true] %s4519_s14 }
0x1288   : > { %s4505_s13 = scalar_lea.sflag [#allocation7], %s6565_s15  ;;  %s6053_s7 = scalar_lea.vmem %s7239_s14, 512 }
0x1289   : > { %p6054_p12 = scmp.ne.s32.totalorder %s7239_s14, %s6053_s7  ;;  %p7376_p0 = scmp.ne.s32.totalorder %s7361_s11, 0 }
0x128a   : > { %s6201_s29 = smov [#allocation19]  }
0x128b   : > { %p6055_p9 = pnand %p6054_p12, %p7376_p0  ;;  %s6057_s30 = sshll.u32 %s6201_s29, 4  ;;  %s6058_s30 = int_to_ptr.vmem [resolvable:$false] %s6057_s30 }
0x128c   : > { %s6059_s26 = scalar_lea.vmem %s6058_s30, 1024  ;;  %p6060_p3 = scmp.lt.s32.totalorder %s7239_s14, %s6058_s30 }
0x128d   : > { %s7236_s20 = scalar_lea.hbm %s7375_s9, %s4782_s23  ;;  %p6056_p1 = pneg %p6055_p9 }
0x128e   : > { %p6061_p11 = scmp.lt.s32.totalorder %s6059_s26, %s6053_s7 }
0x1290   : > { %p6062_p2 = por %p6061_p11, %p6060_p3 }
0x1292   : > { %p6063_p10 = pnand %p6062_p2, %p6056_p1 }
0x1294   : > { %6066 = shalt.err (!%p6063_p10)
}
0x1295   : > { %s6067_s2 = scalar_lea.hbm %s7236_s20, 512  ;;  %s6071_s25 = scalar_lea.hbm %s7375_s9, 1024 }
0x1296   : > { %p6068_p6 = scmp.ne.s32.totalorder %s7236_s20, %s6067_s2  ;;  %p6072_p7 = scmp.lt.u32.totalorder %s7236_s20, %s7375_s9 }
0x1297   : > { %p6073_p4 = scmp.lt.u32.totalorder %s6071_s25, %s6067_s2  ;;  %p6075_p9 = scmp.lt.u32.totalorder %s6067_s2, %s7236_s20 }
0x1298   : > { %p6069_p13 = pnand %p6068_p6, %p7376_p0 }
0x1299   : > { %p6074_p12 = por %p6073_p4, %p6072_p7 }
0x129a   : > { %p6070_p5 = pneg %p6069_p13 }
0x129b   : > { %p6076_p1 = por %p6075_p9, %p6074_p12 }
0x129d   : > { %p6077_p3 = pnand %p6076_p1, %p6070_p5 }
0x129f   : > { %6080 = shalt.err (!%p6077_p3)
}
0x12a0   : > { %s6202_s7 = smov 128   ;;  %s6203_s29 = smov 8  }
0x12a1   : > { %5469 = dma.vmem_to_hbm [thread:$0]  (%p7376_p0), %s7239_s14, 512, %s7236_s20, %s4505_s13, %s6202_s7, %s6202_s7, %s6203_s29  }
0x12a2   : > { %s6204_s30 = smov [#allocation22]  }
0x12a3   : > { %s4548_s26 = sshll.u32 %s6204_s30, 4  ;;  %s4549_s26 = int_to_ptr.vmem [resolvable:$true] %s4548_s26 }
0x12a4   : > { %s6081_s23 = scalar_lea.vmem %s4549_s26, 128  ;;  %p6088_p6 = scmp.lt.s32.totalorder %s4549_s26, %s4549_s26 }
0x12a5   : > { %p6082_p11 = scmp.ne.s32.totalorder %s4549_s26, %s6081_s23  ;;  %p6089_p13 = scmp.lt.s32.totalorder %s6081_s23, %s6081_s23 }
0x12a7   : > { %p6083_p2 = pnand %p6082_p11, %p7373_p8  ;;  %p6090_p5 = por %p6089_p13, %p6088_p6 }
0x12a9   : > { %p6084_p10 = pneg %p6083_p2 }
0x12ab   : > { %p6091_p7 = pnand %p6090_p5, %p6084_p10 }
0x12ad   : > { %6094 = shalt.err (!%p6091_p7)
}
0x12ae   : > { %s7377_s25 = sld [smem:[#allocation37_spill]] }
0x12b4   : > { %s6095_s11 = scalar_lea.hbm %s7377_s25, 128 }
0x12b5   : > { %p6096_p0 = scmp.ne.s32.totalorder %s7377_s25, %s6095_s11  ;;  %p6101_p9 = scmp.lt.u32.totalorder %s6095_s11, %s7377_s25 }
0x12b7   : > { %p6097_p4 = pnand %p6096_p0, %p7373_p8 }
0x12b9   : > { %p6098_p12 = pneg %p6097_p4 }
0x12bb   : > { %p6103_p1 = pnand %p6101_p9, %p6098_p12 }
0x12bd   : > { %6106 = shalt.err (!%p6103_p1)
}
0x12be   : > { %5473 = dma.vmem_to_hbm [thread:$0]  (%p7373_p8), %s4549_s26, 128, %s7377_s25, [#allocation21]  }
0x12bf   : > { %6152 = dma.done.wait (%p7373_p8), [#allocation21], 256  }
0x12c0   : > { %6154 = vsyncadd (%p7373_p8), [#allocation21], 4294967040 }
0x12c1 PF: > { %s4568_s7 = sand.u32 1, %s6161_s17   ;;  %p7378_p3 = scmp.ne.s32.totalorder %s7362_s12, 0 }
0x12c2   : > { %p7379_p11 = scmp.ge.s32.totalorder %s6181_s22, 2  ;;  %s4569_s29 = scalar_lea.sflag [#allocation7], %s4568_s7 }
0x12c4   : > { %p5506_p2 = pnand %p7379_p11, %p7378_p3 }
0x12c6   : > { %6156 = dma.done.wait (!%p5506_p2), %s4569_s29, 512  }
0x12c7   : > { %6158 = vsyncadd (!%p5506_p2), %s4569_s29, 4294966784  ;;  %s33_s22 = sadd.s32 1, %s6181_s22   ;;  %s7380_s17 = smov %s6165_s18 }
0x12c8   : > { %p30_p10 = scmp.ge.s32.totalorder %s33_s22, 4   ;;  %s7381_s18 = smov %s6169_s19 }
0x12c9   : > { %s7382_s19 = smov %s6510_s16  ;;  %s7383_s20 = smov %s6177_s21 }
0x12ca   : > { %s7384_s21 = smov %s7386_s28  ;;  %32 = sbr.rel (!%p30_p10) target bundleno = 19 (0x13), region = 165 }
0x12d1   :  { %4574 = vsyncpa [#allocation6], 1 }
0x12d2   :  { %4576 = vsyncpa [#allocation6 + $0x1], 1 }
0x12d3   :  { %4577 = vsyncpa [#allocation9], 1 }
0x12d4   :  { %4578 = vsyncpa [#allocation12], 1 }
0x12d5   :  { %4579 = vsyncpa [#allocation15], 1 }
0x12d6   :  { %4580 = vsyncpa [#allocation18], 1 }
0x12d7   :  { %4581 = vsyncpa [#allocation7], 1 }
0x12d8   :  { %4583 = vsyncpa [#allocation7 + $0x1], 1 }
0x12d9   :  { %4584 = vsyncpa [#allocation21], 1 }

</bundles_post_ra>
